<compile_context>
chip_gen: v5e
topology: v5e:2x2
jax: 0.10.0
libtpu: 0.0.40
codegen_flags: <defaults>
</compile_context>

<pallas_src>
import math

import jax
import jax.numpy as jnp
from jax.experimental import pallas as pl
from jax.experimental.pallas import tpu as pltpu

F32 = jnp.float32


# --------------------------------------------------------------------------
# Fused forward kernel factory
# --------------------------------------------------------------------------
def make_fused_kernel(cfg):
    ncv = cfg['num_conv_layers']
    nls = cfg['num_lstm_layers']
    nat = cfg['num_attn_layers']
    K = cfg['kernel_size']
    pad = K // 2
    H = cfg['num_lstm_hidden_units']
    E = H                                     # unidirectional LSTM -> E == H
    nh = cfg['num_attn_heads']
    dh = E // nh
    NC = cfg['n_classes']
    NCP = ((NC + 127) // 128) * 128           # lane-dense logits width
    attn_scale = 1.0 / math.sqrt(dh)

    def kernel(*refs):
        it = iter(refs)
        # -------- inputs --------
        x_ref = next(it)                                          # (Bb, T, CH)
        conv_ps = [(next(it), next(it), next(it)) for _ in range(ncv)]
        lstm_ps = [(next(it), next(it), next(it)) for _ in range(nls)]
        attn_ps = [(next(it), next(it), next(it), next(it)) for _ in range(nat)]
        ow_ref = next(it)                                         # (E, NCP)
        ob_ref = next(it)                                         # (1, NCP)
        # -------- outputs --------
        logits_ref = next(it)                                     # (Bb, T, NCP)
        feats_ref = next(it)                                      # (Bb, T, E)

        Bb, T, _ = x_ref.shape
        BT = Bb * T
        h3 = x_ref[...]                                           # (Bb, T, Cin)

        # ---------- Conv2d((K,1), pad=(K//2,0)) + folded BN + ReLU ----------
        # One im2col matmul per layer: zero-halo + K shifted views concatenated
        # along lanes -> (BT, K*Cin) @ (K*Cin, Cout).
        for (w_ref, sc_ref, bi_ref) in conv_ps:
            KC, Cout = w_ref.shape
            Cin = KC // K
            zpad = jnp.zeros((Bb, pad, Cin), F32)
            hp = jnp.concatenate([zpad, h3, zpad], axis=1)        # (Bb,T+2p,Cin)
            cols = [hp[:, k:k + T, :] for k in range(K)]          # shifted views
            im2col = jnp.concatenate(cols, axis=-1)               # (Bb,T,K*Cin)
            y = jnp.dot(im2col.reshape(BT, KC), w_ref[...],
                        preferred_element_type=F32)               # (BT, Cout)
            y = jnp.maximum(y * sc_ref[...] + bi_ref[...], 0.0)
            h3 = y.reshape(Bb, T, Cout)

        # (conv_dropout_layer / per-LSTM dropout: identity in inference mode)

        # ---------- wavefronted unidirectional LSTM stack -------------------
        # PyTorch gate order i|f|g|o.  The i/f/o columns of wih/whh/b are
        # pre-scaled by 0.5 (init_params), so a single tanh gives:
        #   sigmoid lanes: 0.5*tanh(z/2)+0.5     tanh lanes: tanh(z)
        lane4h = jax.lax.broadcasted_iota(jnp.int32, (Bb, 4 * H), 1)
        is_g = jnp.logical_and(lane4h >= 2 * H, lane4h < 3 * H)
        post_scale = jnp.where(is_g, 1.0, 0.5).astype(F32)        # hoisted
        post_off = jnp.where(is_g, 0.0, 0.5).astype(F32)          # hoisted

        wih = [p[0][...] for p in lstm_ps]
        whh = [p[1][...] for p in lstm_ps]
        bia = [None] + [jnp.broadcast_to(p[2][...], (Bb, 4 * H))
                        for p in lstm_ps[1:]]                     # hoisted bcast

        # Layer-0 input gates for all timesteps in one flat MXU matmul.
        Fin0 = lstm_ps[0][0].shape[0]
        xg0 = (jnp.dot(h3.reshape(BT, Fin0), wih[0],
                       preferred_element_type=F32)
               + lstm_ps[0][2][...]).reshape(Bb, T, 4 * H)

        h_st = [jnp.zeros((Bb, H), F32) for _ in range(nls)]
        c_st = [jnp.zeros((Bb, H), F32) for _ in range(nls)]
        out_seq = []
        for s in range(T + nls - 1):          # static wavefront unroll
            prev_h = list(h_st)               # snapshot: steps within s are
            for l in range(nls):              # independent -> latency overlap
                t = s - l
                if t < 0 or t >= T:
                    continue
                if l == 0:
                    g = xg0[:, t, :] + jnp.dot(prev_h[0], whh[0],
                                               preferred_element_type=F32)
                else:
                    g = (jnp.dot(prev_h[l - 1], wih[l],
                                 preferred_element_type=F32)
                         + jnp.dot(prev_h[l], whh[l],
                                   preferred_element_type=F32)
                         + bia[l])
                act = jnp.tanh(g) * post_scale + post_off         # single tanh
                i_g = act[:, 0:H]
                f_g = act[:, H:2 * H]
                g_g = act[:, 2 * H:3 * H]
                o_g = act[:, 3 * H:4 * H]
                c_st[l] = f_g * c_st[l] + i_g * g_g
                h_st[l] = o_g * jnp.tanh(c_st[l])
                if l == nls - 1:
                    out_seq.append(h_st[l])   # register-resident, no VMEM store
        h3 = jnp.stack(out_seq, axis=1)                           # (Bb, T, H)

        # ---------- nn.MultiheadAttention (self-attn, batch_first, eval) -----
        hf = h3.reshape(BT, E)                # flat layout between stages
        for (wqkv_ref, bqkv_ref, wo_ref, bo_ref) in attn_ps:
            qkv = (jnp.dot(hf, wqkv_ref[...], preferred_element_type=F32)
                   + bqkv_ref[...]).reshape(Bb, T, 3 * E)         # Q | K | V
            heads = []
            for hh in range(nh):
                q = qkv[:, :, hh * dh:(hh + 1) * dh] * attn_scale
                k = qkv[:, :, E + hh * dh:E + (hh + 1) * dh]
                v = qkv[:, :, 2 * E + hh * dh:2 * E + (hh + 1) * dh]
                s = jnp.einsum('bqd,bkd->bqk', q, k,
                               preferred_element_type=F32)        # (Bb, T, T)
                m = jnp.max(s, axis=-1, keepdims=True)
                ex = jnp.exp(s - m)
                p = ex * pl.reciprocal(jnp.sum(ex, axis=-1, keepdims=True),
                                       approx=True)
                heads.append(jnp.einsum('bqk,bkd->bqd', p, v,
                                        preferred_element_type=F32))
            ctx = jnp.concatenate(heads, axis=-1)                 # (Bb, T, E)
            hf = (jnp.dot(ctx.reshape(BT, E), wo_ref[...],
                          preferred_element_type=F32) + bo_ref[...])

        # ---------- outputs: feats + Conv2d(E, NC, 1) == per-step linear -----
        feats_ref[...] = hf.reshape(Bb, T, E)
        logits = jnp.dot(hf, ow_ref[...], preferred_element_type=F32) + ob_ref[...]
        logits_ref[...] = logits.reshape(Bb, T, NCP)              # lane-dense

    return kernel


# --------------------------------------------------------------------------
# Forward pass wrapper (single pallas_call, everything VMEM-resident)
# --------------------------------------------------------------------------
def deep_conv_lstm_self_attn_forward(params, x, cfg, *, batch_block=None):
    """x: (B, CH, T, 1) like the PyTorch module. Returns (logits, None, feats).

    batch_block: rows per grid step. Default (None) keeps the whole batch in
    one grid step (best for single-TC v5e/v6e at this latency-bound size);
    pass ceil(B/2) on v7x to spread the "parallel" batch grid over both
    TensorCores.
    """
    B, _, T, _ = x.shape
    CH = cfg['in_ch']
    H = cfg['num_lstm_hidden_units']
    E = H
    NC = cfg['n_classes']
    NCP = ((NC + 127) // 128) * 128

    bb = B if batch_block is None else max(1, min(int(batch_block), B))
    nblk = pl.cdiv(B, bb)

    h = jnp.transpose(x[..., 0], (0, 2, 1)).astype(F32)           # (B, T, CH)

    # Lane-dense logits head: pad NC -> NCP output lanes, slice back below.
    ow = jnp.pad(params['out_w'], ((0, 0), (0, NCP - NC)))
    ob = jnp.pad(params['out_b'], ((0, 0), (0, NCP - NC)))

    flat = []
    for c in params['convs']:
        flat += [c['w'], c['scale'], c['bias']]
    for l in params['lstms']:
        flat += [l['wih'], l['whh'], l['b']]
    for a in params['attns']:
        flat += [a['wqkv'], a['bqkv'], a['wo'], a['bo']]
    flat += [ow, ob]

    def _const_spec(arr):                       # full-array block, grid-invariant
        nd = arr.ndim
        return pl.BlockSpec(arr.shape, lambda b: (0,) * nd)

    x_spec = pl.BlockSpec((bb, T, CH), lambda b: (b, 0, 0))
    out_specs = (pl.BlockSpec((bb, T, NCP), lambda b: (b, 0, 0)),
                 pl.BlockSpec((bb, T, E), lambda b: (b, 0, 0)))

    # Working set is <2 MiB here; re-derive against 64 MiB (v7x) and set
    # vmem_limit_bytes / a T-tiled grid if B, T or H are scaled up.
    logits_btc, feats_btc = pl.pallas_call(
        make_fused_kernel(cfg),
        out_shape=(jax.ShapeDtypeStruct((B, T, NCP), F32),
                   jax.ShapeDtypeStruct((B, T, E), F32)),
        grid=(nblk,),
        in_specs=[x_spec] + [_const_spec(w) for w in flat],
        out_specs=out_specs,
        compiler_params=pltpu.CompilerParams(
            dimension_semantics=("parallel",)),
    )(h, *flat)

    logits = jnp.transpose(logits_btc[..., :NC], (0, 2, 1))[..., None]  # (B,NC,T,1)
    feats = jnp.transpose(feats_btc, (0, 2, 1))[..., None]              # (B,E,T,1)
    # TODO(synk): mixup=True branch (host-side numpy beta sampling + mixup_process)
    # is a training-only path and is not implemented in-kernel.
    # TODO(synk): bidirectional_lstm=True and the 'flatten-linear' out_layer_type
    # variants are not implemented; this kernel covers the default Conv2d head.
    return logits, None, feats


# --------------------------------------------------------------------------
# Deterministic synthetic parameters (kernel-ready layouts)
# --------------------------------------------------------------------------
def init_params(key, cfg):
    in_ch = cfg['in_ch']
    nf = cfg['num_conv_filters']
    K = cfg['kernel_size']
    H = cfg['num_lstm_hidden_units']
    E = H
    NC = cfg['n_classes']

    keys = iter(jax.random.split(key, 128))

    def nrm(shape, s=0.1):
        return (s * jax.random.normal(next(keys), shape)).astype(F32)

    convs = []
    cin = in_ch
    for _ in range(cfg['num_conv_layers']):
        # w[k, ci, co] == PyTorch Conv2d.weight[co, ci, k, 0]; stored flattened
        # as (K*Cin, Cout) for the im2col matmul.
        w = nrm((K, cin, nf))
        conv_b = nrm((nf,))
        gamma = 1.0 + nrm((nf,))
        beta = nrm((nf,))
        run_mean = nrm((nf,))
        run_var = jnp.abs(1.0 + nrm((nf,)))
        eps = 1e-5
        scale = gamma / jnp.sqrt(run_var + eps)                   # folded BN
        bias = (conv_b - run_mean) * scale + beta
        convs.append({'w': w.reshape(K * cin, nf),
                      'scale': scale.reshape(1, nf).astype(F32),
                      'bias': bias.reshape(1, nf).astype(F32)})
        cin = nf

    # LSTM: wih == weight_ih.T (gate columns i|f|g|o), whh == weight_hh.T,
    # b == b_ih + b_hh.  The i/f/o columns are PRE-SCALED by 0.5 so the kernel
    # can evaluate all gates with a single tanh: sigmoid(z) = 0.5*tanh(z/2)+0.5.
    gate_scale = jnp.concatenate(
        [jnp.full((H,), 0.5), jnp.full((H,), 0.5),
         jnp.ones((H,)), jnp.full((H,), 0.5)]).astype(F32)
    lstms = []
    fin = nf
    for _ in range(cfg['num_lstm_layers']):
        lstms.append({'wih': nrm((fin, 4 * H)) * gate_scale,
                      'whh': nrm((H, 4 * H)) * gate_scale,
                      'b': ((nrm((4 * H,)) + nrm((4 * H,))) * gate_scale
                            ).reshape(1, 4 * H)})
        fin = H

    attns = []
    for _ in range(cfg['num_attn_layers']):
        # wqkv == in_proj_weight.T (columns Q|K|V, head-major inside each),
        # wo == out_proj.weight.T
        attns.append({'wqkv': nrm((E, 3 * E)), 'bqkv': nrm((1, 3 * E)),
                      'wo': nrm((E, E)), 'bo': nrm((1, E))})

    return {'convs': convs, 'lstms': lstms, 'attns': attns,
            'out_w': nrm((E, NC)), 'out_b': nrm((1, NC))}


if __name__ == "__main__":
    cfg = dict(in_ch=4, window_size=16, n_classes=6, kernel_size=5,
               num_conv_layers=2, num_conv_filters=32,
               num_lstm_hidden_units=32, num_lstm_layers=2,
               num_attn_heads=2, num_attn_layers=1)

    key = jax.random.PRNGKey(0)
    kp, kx = jax.random.split(key)
    params = init_params(kp, cfg)
    x = jax.random.normal(kx, (2, cfg['in_ch'], cfg['window_size'], 1),
                          dtype=F32)                               # (B, CH, T, 1)

    fwd = jax.jit(lambda p, xx: deep_conv_lstm_self_attn_forward(p, xx, cfg))
    logits, _, feats = fwd(params, x)
    logits = jax.block_until_ready(logits)
    feats = jax.block_until_ready(feats)

    assert logits.shape == (2, cfg['n_classes'], cfg['window_size'], 1)
    assert feats.shape == (2, cfg['num_lstm_hidden_units'],
                           cfg['window_size'], 1)
    assert bool(jnp.all(jnp.isfinite(logits)))
    assert bool(jnp.all(jnp.isfinite(feats)))
    print("KERNEL_OK")
</pallas_src>

<mosaic_0001>
module attributes {stable_mosaic.version = 11 : i64} {
  func.func @kernel(%arg0: i32, %arg1: memref<2x16x4xf32, #tpu.memory_space<vmem>>, %arg2: memref<20x32xf32, #tpu.memory_space<vmem>>, %arg3: memref<1x32xf32, #tpu.memory_space<vmem>>, %arg4: memref<1x32xf32, #tpu.memory_space<vmem>>, %arg5: memref<160x32xf32, #tpu.memory_space<vmem>>, %arg6: memref<1x32xf32, #tpu.memory_space<vmem>>, %arg7: memref<1x32xf32, #tpu.memory_space<vmem>>, %arg8: memref<32x128xf32, #tpu.memory_space<vmem>>, %arg9: memref<32x128xf32, #tpu.memory_space<vmem>>, %arg10: memref<1x128xf32, #tpu.memory_space<vmem>>, %arg11: memref<32x128xf32, #tpu.memory_space<vmem>>, %arg12: memref<32x128xf32, #tpu.memory_space<vmem>>, %arg13: memref<1x128xf32, #tpu.memory_space<vmem>>, %arg14: memref<32x96xf32, #tpu.memory_space<vmem>>, %arg15: memref<1x96xf32, #tpu.memory_space<vmem>>, %arg16: memref<32x32xf32, #tpu.memory_space<vmem>>, %arg17: memref<1x32xf32, #tpu.memory_space<vmem>>, %arg18: memref<32x128xf32, #tpu.memory_space<vmem>>, %arg19: memref<1x128xf32, #tpu.memory_space<vmem>>, %arg20: memref<2x16x128xf32, #tpu.memory_space<vmem>>, %arg21: memref<2x16x32xf32, #tpu.memory_space<vmem>>) attributes {dimension_semantics = [#tpu.dimension_semantics<parallel>], iteration_bounds = array<i64: 1>, scalar_prefetch = 0 : i64, scratch_operands = 0 : i64, tpu.core_type = #tpu.core_type<tc>, window_params = [{transform_indices = @transform_0, window_bounds = array<i64: 2, 16, 4>}, {pipeline_mode = #tpu.pipeline_mode<synchronous>, transform_indices = @transform_1, window_bounds = array<i64: 20, 32>}, {pipeline_mode = #tpu.pipeline_mode<synchronous>, transform_indices = @transform_2, window_bounds = array<i64: 1, 32>}, {pipeline_mode = #tpu.pipeline_mode<synchronous>, transform_indices = @transform_3, window_bounds = array<i64: 1, 32>}, {pipeline_mode = #tpu.pipeline_mode<synchronous>, transform_indices = @transform_4, window_bounds = array<i64: 160, 32>}, {pipeline_mode = #tpu.pipeline_mode<synchronous>, transform_indices = @transform_5, window_bounds = array<i64: 1, 32>}, {pipeline_mode = #tpu.pipeline_mode<synchronous>, transform_indices = @transform_6, window_bounds = array<i64: 1, 32>}, {pipeline_mode = #tpu.pipeline_mode<synchronous>, transform_indices = @transform_7, window_bounds = array<i64: 32, 128>}, {pipeline_mode = #tpu.pipeline_mode<synchronous>, transform_indices = @transform_8, window_bounds = array<i64: 32, 128>}, {pipeline_mode = #tpu.pipeline_mode<synchronous>, transform_indices = @transform_9, window_bounds = array<i64: 1, 128>}, {pipeline_mode = #tpu.pipeline_mode<synchronous>, transform_indices = @transform_10, window_bounds = array<i64: 32, 128>}, {pipeline_mode = #tpu.pipeline_mode<synchronous>, transform_indices = @transform_11, window_bounds = array<i64: 32, 128>}, {pipeline_mode = #tpu.pipeline_mode<synchronous>, transform_indices = @transform_12, window_bounds = array<i64: 1, 128>}, {pipeline_mode = #tpu.pipeline_mode<synchronous>, transform_indices = @transform_13, window_bounds = array<i64: 32, 96>}, {pipeline_mode = #tpu.pipeline_mode<synchronous>, transform_indices = @transform_14, window_bounds = array<i64: 1, 96>}, {pipeline_mode = #tpu.pipeline_mode<synchronous>, transform_indices = @transform_15, window_bounds = array<i64: 32, 32>}, {pipeline_mode = #tpu.pipeline_mode<synchronous>, transform_indices = @transform_16, window_bounds = array<i64: 1, 32>}, {pipeline_mode = #tpu.pipeline_mode<synchronous>, transform_indices = @transform_17, window_bounds = array<i64: 32, 128>}, {pipeline_mode = #tpu.pipeline_mode<synchronous>, transform_indices = @transform_18, window_bounds = array<i64: 1, 128>}, {transform_indices = @transform_19, window_bounds = array<i64: 2, 16, 128>}, {transform_indices = @transform_20, window_bounds = array<i64: 2, 16, 32>}]} {
    %c0 = arith.constant 0 : index
    %c0_0 = arith.constant 0 : index
    %c0_1 = arith.constant 0 : index
    %0 = vector.load %arg1[%c0, %c0_0, %c0_1] : memref<2x16x4xf32, #tpu.memory_space<vmem>>, vector<2x16x4xf32>
    %cst = arith.constant 0.000000e+00 : f32
    %1 = vector.broadcast %cst : f32 to vector<2x2x4xf32>
    %2 = tpu.concatenate %1, %0, %1 in 1 : vector<2x2x4xf32>, vector<2x16x4xf32>, vector<2x2x4xf32> -> vector<2x20x4xf32>
    %3 = vector.extract_strided_slice %2 {offsets = [0, 0, 0], sizes = [2, 16, 4], strides = [1, 1, 1]} : vector<2x20x4xf32> to vector<2x16x4xf32>
    %4 = vector.extract_strided_slice %2 {offsets = [0, 1, 0], sizes = [2, 16, 4], strides = [1, 1, 1]} : vector<2x20x4xf32> to vector<2x16x4xf32>
    %5 = vector.extract_strided_slice %2 {offsets = [0, 2, 0], sizes = [2, 16, 4], strides = [1, 1, 1]} : vector<2x20x4xf32> to vector<2x16x4xf32>
    %6 = vector.extract_strided_slice %2 {offsets = [0, 3, 0], sizes = [2, 16, 4], strides = [1, 1, 1]} : vector<2x20x4xf32> to vector<2x16x4xf32>
    %7 = vector.extract_strided_slice %2 {offsets = [0, 4, 0], sizes = [2, 16, 4], strides = [1, 1, 1]} : vector<2x20x4xf32> to vector<2x16x4xf32>
    %8 = tpu.concatenate %3, %4, %5, %6, %7 in 2 : vector<2x16x4xf32>, vector<2x16x4xf32>, vector<2x16x4xf32>, vector<2x16x4xf32>, vector<2x16x4xf32> -> vector<2x16x20xf32>
    %9 = vector.shape_cast %8 : vector<2x16x20xf32> to vector<32x20xf32>
    %c0_2 = arith.constant 0 : index
    %c0_3 = arith.constant 0 : index
    %10 = vector.load %arg2[%c0_2, %c0_3] : memref<20x32xf32, #tpu.memory_space<vmem>>, vector<20x32xf32>
    %cst_4 = arith.constant dense<0.000000e+00> : vector<32x32xf32>
    %11 = tpu.matmul %9, %10, %cst_4 {dimension_numbers = #tpu.dot_dimension_numbers<[1], [0], [0], [1], [0, 0, 1, 1], [], []>} : vector<32x20xf32>, vector<20x32xf32>, vector<32x32xf32> -> vector<32x32xf32>
    %c0_5 = arith.constant 0 : index
    %c0_6 = arith.constant 0 : index
    %12 = vector.load %arg3[%c0_5, %c0_6] : memref<1x32xf32, #tpu.memory_space<vmem>>, vector<1x32xf32>
    %13 = vector.broadcast %12 : vector<1x32xf32> to vector<32x32xf32>
    %14 = arith.mulf %11, %13 : vector<32x32xf32>
    %c0_7 = arith.constant 0 : index
    %c0_8 = arith.constant 0 : index
    %15 = vector.load %arg4[%c0_7, %c0_8] : memref<1x32xf32, #tpu.memory_space<vmem>>, vector<1x32xf32>
    %16 = vector.broadcast %15 : vector<1x32xf32> to vector<32x32xf32>
    %17 = arith.addf %14, %16 : vector<32x32xf32>
    %cst_9 = arith.constant 0.000000e+00 : f32
    %18 = vector.broadcast %cst_9 : f32 to vector<32x32xf32>
    %19 = arith.maximumf %17, %18 : vector<32x32xf32>
    %20 = vector.shape_cast %19 : vector<32x32xf32> to vector<2x16x32xf32>
    %cst_10 = arith.constant 0.000000e+00 : f32
    %21 = vector.broadcast %cst_10 : f32 to vector<2x2x32xf32>
    %22 = tpu.concatenate %21, %20, %21 in 1 : vector<2x2x32xf32>, vector<2x16x32xf32>, vector<2x2x32xf32> -> vector<2x20x32xf32>
    %23 = vector.extract_strided_slice %22 {offsets = [0, 0, 0], sizes = [2, 16, 32], strides = [1, 1, 1]} : vector<2x20x32xf32> to vector<2x16x32xf32>
    %24 = vector.extract_strided_slice %22 {offsets = [0, 1, 0], sizes = [2, 16, 32], strides = [1, 1, 1]} : vector<2x20x32xf32> to vector<2x16x32xf32>
    %25 = vector.extract_strided_slice %22 {offsets = [0, 2, 0], sizes = [2, 16, 32], strides = [1, 1, 1]} : vector<2x20x32xf32> to vector<2x16x32xf32>
    %26 = vector.extract_strided_slice %22 {offsets = [0, 3, 0], sizes = [2, 16, 32], strides = [1, 1, 1]} : vector<2x20x32xf32> to vector<2x16x32xf32>
    %27 = vector.extract_strided_slice %22 {offsets = [0, 4, 0], sizes = [2, 16, 32], strides = [1, 1, 1]} : vector<2x20x32xf32> to vector<2x16x32xf32>
    %28 = tpu.concatenate %23, %24, %25, %26, %27 in 2 : vector<2x16x32xf32>, vector<2x16x32xf32>, vector<2x16x32xf32>, vector<2x16x32xf32>, vector<2x16x32xf32> -> vector<2x16x160xf32>
    %29 = vector.shape_cast %28 : vector<2x16x160xf32> to vector<32x160xf32>
    %c0_11 = arith.constant 0 : index
    %c0_12 = arith.constant 0 : index
    %30 = vector.load %arg5[%c0_11, %c0_12] : memref<160x32xf32, #tpu.memory_space<vmem>>, vector<160x32xf32>
    %cst_13 = arith.constant dense<0.000000e+00> : vector<32x32xf32>
    %31 = tpu.matmul %29, %30, %cst_13 {dimension_numbers = #tpu.dot_dimension_numbers<[1], [0], [0], [1], [0, 0, 1, 1], [], []>} : vector<32x160xf32>, vector<160x32xf32>, vector<32x32xf32> -> vector<32x32xf32>
    %c0_14 = arith.constant 0 : index
    %c0_15 = arith.constant 0 : index
    %32 = vector.load %arg6[%c0_14, %c0_15] : memref<1x32xf32, #tpu.memory_space<vmem>>, vector<1x32xf32>
    %33 = vector.broadcast %32 : vector<1x32xf32> to vector<32x32xf32>
    %34 = arith.mulf %31, %33 : vector<32x32xf32>
    %c0_16 = arith.constant 0 : index
    %c0_17 = arith.constant 0 : index
    %35 = vector.load %arg7[%c0_16, %c0_17] : memref<1x32xf32, #tpu.memory_space<vmem>>, vector<1x32xf32>
    %36 = vector.broadcast %35 : vector<1x32xf32> to vector<32x32xf32>
    %37 = arith.addf %34, %36 : vector<32x32xf32>
    %cst_18 = arith.constant 0.000000e+00 : f32
    %38 = vector.broadcast %cst_18 : f32 to vector<32x32xf32>
    %39 = arith.maximumf %37, %38 : vector<32x32xf32>
    %40 = vector.shape_cast %39 : vector<32x32xf32> to vector<2x16x32xf32>
    %41 = tpu.iota {dimensions = array<i32: 1>} : vector<2x128xi32>
    %c64_i32 = arith.constant 64 : i32
    %42 = vector.broadcast %c64_i32 : i32 to vector<2x128xi32>
    %43 = arith.cmpi sge, %41, %42 : vector<2x128xi32>
    %c96_i32 = arith.constant 96 : i32
    %44 = vector.broadcast %c96_i32 : i32 to vector<2x128xi32>
    %45 = arith.cmpi slt, %41, %44 : vector<2x128xi32>
    %46 = arith.andi %43, %45 : vector<2x128xi1>
    %cst_19 = arith.constant 1.000000e+00 : f32
    %cst_20 = arith.constant 5.000000e-01 : f32
    %47 = vector.broadcast %cst_19 : f32 to vector<2x128xf32>
    %48 = vector.broadcast %cst_20 : f32 to vector<2x128xf32>
    %49 = arith.select %46, %47, %48 : vector<2x128xi1>, vector<2x128xf32>
    %cst_21 = arith.constant 0.000000e+00 : f32
    %cst_22 = arith.constant 5.000000e-01 : f32
    %50 = vector.broadcast %cst_21 : f32 to vector<2x128xf32>
    %51 = vector.broadcast %cst_22 : f32 to vector<2x128xf32>
    %52 = arith.select %46, %50, %51 : vector<2x128xi1>, vector<2x128xf32>
    %c0_23 = arith.constant 0 : index
    %c0_24 = arith.constant 0 : index
    %53 = vector.load %arg8[%c0_23, %c0_24] : memref<32x128xf32, #tpu.memory_space<vmem>>, vector<32x128xf32>
    %c0_25 = arith.constant 0 : index
    %c0_26 = arith.constant 0 : index
    %54 = vector.load %arg11[%c0_25, %c0_26] : memref<32x128xf32, #tpu.memory_space<vmem>>, vector<32x128xf32>
    %c0_27 = arith.constant 0 : index
    %c0_28 = arith.constant 0 : index
    %55 = vector.load %arg9[%c0_27, %c0_28] : memref<32x128xf32, #tpu.memory_space<vmem>>, vector<32x128xf32>
    %c0_29 = arith.constant 0 : index
    %c0_30 = arith.constant 0 : index
    %56 = vector.load %arg12[%c0_29, %c0_30] : memref<32x128xf32, #tpu.memory_space<vmem>>, vector<32x128xf32>
    %c0_31 = arith.constant 0 : index
    %c0_32 = arith.constant 0 : index
    %57 = vector.load %arg13[%c0_31, %c0_32] : memref<1x128xf32, #tpu.memory_space<vmem>>, vector<1x128xf32>
    %58 = vector.shape_cast %57 : vector<1x128xf32> to vector<1x128xf32>
    %59 = vector.broadcast %58 : vector<1x128xf32> to vector<2x128xf32>
    %60 = vector.shape_cast %40 : vector<2x16x32xf32> to vector<32x32xf32>
    %cst_33 = arith.constant dense<0.000000e+00> : vector<32x128xf32>
    %61 = tpu.matmul %60, %53, %cst_33 {dimension_numbers = #tpu.dot_dimension_numbers<[1], [0], [0], [1], [0, 0, 1, 1], [], []>} : vector<32x32xf32>, vector<32x128xf32>, vector<32x128xf32> -> vector<32x128xf32>
    %c0_34 = arith.constant 0 : index
    %c0_35 = arith.constant 0 : index
    %62 = vector.load %arg10[%c0_34, %c0_35] : memref<1x128xf32, #tpu.memory_space<vmem>>, vector<1x128xf32>
    %63 = vector.broadcast %62 : vector<1x128xf32> to vector<32x128xf32>
    %64 = arith.addf %61, %63 : vector<32x128xf32>
    %65 = vector.shape_cast %64 : vector<32x128xf32> to vector<2x16x128xf32>
    %cst_36 = arith.constant 0.000000e+00 : f32
    %66 = vector.broadcast %cst_36 : f32 to vector<2x32xf32>
    %cst_37 = arith.constant 0.000000e+00 : f32
    %67 = vector.broadcast %cst_37 : f32 to vector<2x32xf32>
    %cst_38 = arith.constant 0.000000e+00 : f32
    %68 = vector.broadcast %cst_38 : f32 to vector<2x32xf32>
    %cst_39 = arith.constant 0.000000e+00 : f32
    %69 = vector.broadcast %cst_39 : f32 to vector<2x32xf32>
    %70 = vector.extract_strided_slice %65 {offsets = [0, 0, 0], sizes = [2, 1, 128], strides = [1, 1, 1]} : vector<2x16x128xf32> to vector<2x1x128xf32>
    %71 = vector.shape_cast %70 : vector<2x1x128xf32> to vector<2x128xf32>
    %cst_40 = arith.constant dense<0.000000e+00> : vector<2x128xf32>
    %72 = tpu.matmul %66, %55, %cst_40 {dimension_numbers = #tpu.dot_dimension_numbers<[1], [0], [0], [1], [0, 0, 1, 1], [], []>} : vector<2x32xf32>, vector<32x128xf32>, vector<2x128xf32> -> vector<2x128xf32>
    %73 = arith.addf %71, %72 : vector<2x128xf32>
    %74 = math.tanh %73 : vector<2x128xf32>
    %75 = arith.mulf %74, %49 : vector<2x128xf32>
    %76 = arith.addf %75, %52 : vector<2x128xf32>
    %77 = vector.extract_strided_slice %76 {offsets = [0, 0], sizes = [2, 32], strides = [1, 1]} : vector<2x128xf32> to vector<2x32xf32>
    %78 = vector.extract_strided_slice %76 {offsets = [0, 32], sizes = [2, 32], strides = [1, 1]} : vector<2x128xf32> to vector<2x32xf32>
    %79 = vector.extract_strided_slice %76 {offsets = [0, 64], sizes = [2, 32], strides = [1, 1]} : vector<2x128xf32> to vector<2x32xf32>
    %80 = vector.extract_strided_slice %76 {offsets = [0, 96], sizes = [2, 32], strides = [1, 1]} : vector<2x128xf32> to vector<2x32xf32>
    %81 = arith.mulf %78, %68 : vector<2x32xf32>
    %82 = arith.mulf %77, %79 : vector<2x32xf32>
    %83 = arith.addf %81, %82 : vector<2x32xf32>
    %84 = math.tanh %83 : vector<2x32xf32>
    %85 = arith.mulf %80, %84 : vector<2x32xf32>
    %86 = vector.extract_strided_slice %65 {offsets = [0, 1, 0], sizes = [2, 1, 128], strides = [1, 1, 1]} : vector<2x16x128xf32> to vector<2x1x128xf32>
    %87 = vector.shape_cast %86 : vector<2x1x128xf32> to vector<2x128xf32>
    %cst_41 = arith.constant dense<0.000000e+00> : vector<2x128xf32>
    %88 = tpu.matmul %85, %55, %cst_41 {dimension_numbers = #tpu.dot_dimension_numbers<[1], [0], [0], [1], [0, 0, 1, 1], [], []>} : vector<2x32xf32>, vector<32x128xf32>, vector<2x128xf32> -> vector<2x128xf32>
    %89 = arith.addf %87, %88 : vector<2x128xf32>
    %90 = math.tanh %89 : vector<2x128xf32>
    %91 = arith.mulf %90, %49 : vector<2x128xf32>
    %92 = arith.addf %91, %52 : vector<2x128xf32>
    %93 = vector.extract_strided_slice %92 {offsets = [0, 0], sizes = [2, 32], strides = [1, 1]} : vector<2x128xf32> to vector<2x32xf32>
    %94 = vector.extract_strided_slice %92 {offsets = [0, 32], sizes = [2, 32], strides = [1, 1]} : vector<2x128xf32> to vector<2x32xf32>
    %95 = vector.extract_strided_slice %92 {offsets = [0, 64], sizes = [2, 32], strides = [1, 1]} : vector<2x128xf32> to vector<2x32xf32>
    %96 = vector.extract_strided_slice %92 {offsets = [0, 96], sizes = [2, 32], strides = [1, 1]} : vector<2x128xf32> to vector<2x32xf32>
    %97 = arith.mulf %94, %83 : vector<2x32xf32>
    %98 = arith.mulf %93, %95 : vector<2x32xf32>
    %99 = arith.addf %97, %98 : vector<2x32xf32>
    %100 = math.tanh %99 : vector<2x32xf32>
    %101 = arith.mulf %96, %100 : vector<2x32xf32>
    %cst_42 = arith.constant dense<0.000000e+00> : vector<2x128xf32>
    %102 = tpu.matmul %85, %54, %cst_42 {dimension_numbers = #tpu.dot_dimension_numbers<[1], [0], [0], [1], [0, 0, 1, 1], [], []>} : vector<2x32xf32>, vector<32x128xf32>, vector<2x128xf32> -> vector<2x128xf32>
    %cst_43 = arith.constant dense<0.000000e+00> : vector<2x128xf32>
    %103 = tpu.matmul %67, %56, %cst_43 {dimension_numbers = #tpu.dot_dimension_numbers<[1], [0], [0], [1], [0, 0, 1, 1], [], []>} : vector<2x32xf32>, vector<32x128xf32>, vector<2x128xf32> -> vector<2x128xf32>
    %104 = arith.addf %102, %103 : vector<2x128xf32>
    %105 = arith.addf %104, %59 : vector<2x128xf32>
    %106 = math.tanh %105 : vector<2x128xf32>
    %107 = arith.mulf %106, %49 : vector<2x128xf32>
    %108 = arith.addf %107, %52 : vector<2x128xf32>
    %109 = vector.extract_strided_slice %108 {offsets = [0, 0], sizes = [2, 32], strides = [1, 1]} : vector<2x128xf32> to vector<2x32xf32>
    %110 = vector.extract_strided_slice %108 {offsets = [0, 32], sizes = [2, 32], strides = [1, 1]} : vector<2x128xf32> to vector<2x32xf32>
    %111 = vector.extract_strided_slice %108 {offsets = [0, 64], sizes = [2, 32], strides = [1, 1]} : vector<2x128xf32> to vector<2x32xf32>
    %112 = vector.extract_strided_slice %108 {offsets = [0, 96], sizes = [2, 32], strides = [1, 1]} : vector<2x128xf32> to vector<2x32xf32>
    %113 = arith.mulf %110, %69 : vector<2x32xf32>
    %114 = arith.mulf %109, %111 : vector<2x32xf32>
    %115 = arith.addf %113, %114 : vector<2x32xf32>
    %116 = math.tanh %115 : vector<2x32xf32>
    %117 = arith.mulf %112, %116 : vector<2x32xf32>
    %118 = vector.extract_strided_slice %65 {offsets = [0, 2, 0], sizes = [2, 1, 128], strides = [1, 1, 1]} : vector<2x16x128xf32> to vector<2x1x128xf32>
    %119 = vector.shape_cast %118 : vector<2x1x128xf32> to vector<2x128xf32>
    %cst_44 = arith.constant dense<0.000000e+00> : vector<2x128xf32>
    %120 = tpu.matmul %101, %55, %cst_44 {dimension_numbers = #tpu.dot_dimension_numbers<[1], [0], [0], [1], [0, 0, 1, 1], [], []>} : vector<2x32xf32>, vector<32x128xf32>, vector<2x128xf32> -> vector<2x128xf32>
    %121 = arith.addf %119, %120 : vector<2x128xf32>
    %122 = math.tanh %121 : vector<2x128xf32>
    %123 = arith.mulf %122, %49 : vector<2x128xf32>
    %124 = arith.addf %123, %52 : vector<2x128xf32>
    %125 = vector.extract_strided_slice %124 {offsets = [0, 0], sizes = [2, 32], strides = [1, 1]} : vector<2x128xf32> to vector<2x32xf32>
    %126 = vector.extract_strided_slice %124 {offsets = [0, 32], sizes = [2, 32], strides = [1, 1]} : vector<2x128xf32> to vector<2x32xf32>
    %127 = vector.extract_strided_slice %124 {offsets = [0, 64], sizes = [2, 32], strides = [1, 1]} : vector<2x128xf32> to vector<2x32xf32>
    %128 = vector.extract_strided_slice %124 {offsets = [0, 96], sizes = [2, 32], strides = [1, 1]} : vector<2x128xf32> to vector<2x32xf32>
    %129 = arith.mulf %126, %99 : vector<2x32xf32>
    %130 = arith.mulf %125, %127 : vector<2x32xf32>
    %131 = arith.addf %129, %130 : vector<2x32xf32>
    %132 = math.tanh %131 : vector<2x32xf32>
    %133 = arith.mulf %128, %132 : vector<2x32xf32>
    %cst_45 = arith.constant dense<0.000000e+00> : vector<2x128xf32>
    %134 = tpu.matmul %101, %54, %cst_45 {dimension_numbers = #tpu.dot_dimension_numbers<[1], [0], [0], [1], [0, 0, 1, 1], [], []>} : vector<2x32xf32>, vector<32x128xf32>, vector<2x128xf32> -> vector<2x128xf32>
    %cst_46 = arith.constant dense<0.000000e+00> : vector<2x128xf32>
    %135 = tpu.matmul %117, %56, %cst_46 {dimension_numbers = #tpu.dot_dimension_numbers<[1], [0], [0], [1], [0, 0, 1, 1], [], []>} : vector<2x32xf32>, vector<32x128xf32>, vector<2x128xf32> -> vector<2x128xf32>
    %136 = arith.addf %134, %135 : vector<2x128xf32>
    %137 = arith.addf %136, %59 : vector<2x128xf32>
    %138 = math.tanh %137 : vector<2x128xf32>
    %139 = arith.mulf %138, %49 : vector<2x128xf32>
    %140 = arith.addf %139, %52 : vector<2x128xf32>
    %141 = vector.extract_strided_slice %140 {offsets = [0, 0], sizes = [2, 32], strides = [1, 1]} : vector<2x128xf32> to vector<2x32xf32>
    %142 = vector.extract_strided_slice %140 {offsets = [0, 32], sizes = [2, 32], strides = [1, 1]} : vector<2x128xf32> to vector<2x32xf32>
    %143 = vector.extract_strided_slice %140 {offsets = [0, 64], sizes = [2, 32], strides = [1, 1]} : vector<2x128xf32> to vector<2x32xf32>
    %144 = vector.extract_strided_slice %140 {offsets = [0, 96], sizes = [2, 32], strides = [1, 1]} : vector<2x128xf32> to vector<2x32xf32>
    %145 = arith.mulf %142, %115 : vector<2x32xf32>
    %146 = arith.mulf %141, %143 : vector<2x32xf32>
    %147 = arith.addf %145, %146 : vector<2x32xf32>
    %148 = math.tanh %147 : vector<2x32xf32>
    %149 = arith.mulf %144, %148 : vector<2x32xf32>
    %150 = vector.extract_strided_slice %65 {offsets = [0, 3, 0], sizes = [2, 1, 128], strides = [1, 1, 1]} : vector<2x16x128xf32> to vector<2x1x128xf32>
    %151 = vector.shape_cast %150 : vector<2x1x128xf32> to vector<2x128xf32>
    %cst_47 = arith.constant dense<0.000000e+00> : vector<2x128xf32>
    %152 = tpu.matmul %133, %55, %cst_47 {dimension_numbers = #tpu.dot_dimension_numbers<[1], [0], [0], [1], [0, 0, 1, 1], [], []>} : vector<2x32xf32>, vector<32x128xf32>, vector<2x128xf32> -> vector<2x128xf32>
    %153 = arith.addf %151, %152 : vector<2x128xf32>
    %154 = math.tanh %153 : vector<2x128xf32>
    %155 = arith.mulf %154, %49 : vector<2x128xf32>
    %156 = arith.addf %155, %52 : vector<2x128xf32>
    %157 = vector.extract_strided_slice %156 {offsets = [0, 0], sizes = [2, 32], strides = [1, 1]} : vector<2x128xf32> to vector<2x32xf32>
    %158 = vector.extract_strided_slice %156 {offsets = [0, 32], sizes = [2, 32], strides = [1, 1]} : vector<2x128xf32> to vector<2x32xf32>
    %159 = vector.extract_strided_slice %156 {offsets = [0, 64], sizes = [2, 32], strides = [1, 1]} : vector<2x128xf32> to vector<2x32xf32>
    %160 = vector.extract_strided_slice %156 {offsets = [0, 96], sizes = [2, 32], strides = [1, 1]} : vector<2x128xf32> to vector<2x32xf32>
    %161 = arith.mulf %158, %131 : vector<2x32xf32>
    %162 = arith.mulf %157, %159 : vector<2x32xf32>
    %163 = arith.addf %161, %162 : vector<2x32xf32>
    %164 = math.tanh %163 : vector<2x32xf32>
    %165 = arith.mulf %160, %164 : vector<2x32xf32>
    %cst_48 = arith.constant dense<0.000000e+00> : vector<2x128xf32>
    %166 = tpu.matmul %133, %54, %cst_48 {dimension_numbers = #tpu.dot_dimension_numbers<[1], [0], [0], [1], [0, 0, 1, 1], [], []>} : vector<2x32xf32>, vector<32x128xf32>, vector<2x128xf32> -> vector<2x128xf32>
    %cst_49 = arith.constant dense<0.000000e+00> : vector<2x128xf32>
    %167 = tpu.matmul %149, %56, %cst_49 {dimension_numbers = #tpu.dot_dimension_numbers<[1], [0], [0], [1], [0, 0, 1, 1], [], []>} : vector<2x32xf32>, vector<32x128xf32>, vector<2x128xf32> -> vector<2x128xf32>
    %168 = arith.addf %166, %167 : vector<2x128xf32>
    %169 = arith.addf %168, %59 : vector<2x128xf32>
    %170 = math.tanh %169 : vector<2x128xf32>
    %171 = arith.mulf %170, %49 : vector<2x128xf32>
    %172 = arith.addf %171, %52 : vector<2x128xf32>
    %173 = vector.extract_strided_slice %172 {offsets = [0, 0], sizes = [2, 32], strides = [1, 1]} : vector<2x128xf32> to vector<2x32xf32>
    %174 = vector.extract_strided_slice %172 {offsets = [0, 32], sizes = [2, 32], strides = [1, 1]} : vector<2x128xf32> to vector<2x32xf32>
    %175 = vector.extract_strided_slice %172 {offsets = [0, 64], sizes = [2, 32], strides = [1, 1]} : vector<2x128xf32> to vector<2x32xf32>
    %176 = vector.extract_strided_slice %172 {offsets = [0, 96], sizes = [2, 32], strides = [1, 1]} : vector<2x128xf32> to vector<2x32xf32>
    %177 = arith.mulf %174, %147 : vector<2x32xf32>
    %178 = arith.mulf %173, %175 : vector<2x32xf32>
    %179 = arith.addf %177, %178 : vector<2x32xf32>
    %180 = math.tanh %179 : vector<2x32xf32>
    %181 = arith.mulf %176, %180 : vector<2x32xf32>
    %182 = vector.extract_strided_slice %65 {offsets = [0, 4, 0], sizes = [2, 1, 128], strides = [1, 1, 1]} : vector<2x16x128xf32> to vector<2x1x128xf32>
    %183 = vector.shape_cast %182 : vector<2x1x128xf32> to vector<2x128xf32>
    %cst_50 = arith.constant dense<0.000000e+00> : vector<2x128xf32>
    %184 = tpu.matmul %165, %55, %cst_50 {dimension_numbers = #tpu.dot_dimension_numbers<[1], [0], [0], [1], [0, 0, 1, 1], [], []>} : vector<2x32xf32>, vector<32x128xf32>, vector<2x128xf32> -> vector<2x128xf32>
    %185 = arith.addf %183, %184 : vector<2x128xf32>
    %186 = math.tanh %185 : vector<2x128xf32>
    %187 = arith.mulf %186, %49 : vector<2x128xf32>
    %188 = arith.addf %187, %52 : vector<2x128xf32>
    %189 = vector.extract_strided_slice %188 {offsets = [0, 0], sizes = [2, 32], strides = [1, 1]} : vector<2x128xf32> to vector<2x32xf32>
    %190 = vector.extract_strided_slice %188 {offsets = [0, 32], sizes = [2, 32], strides = [1, 1]} : vector<2x128xf32> to vector<2x32xf32>
    %191 = vector.extract_strided_slice %188 {offsets = [0, 64], sizes = [2, 32], strides = [1, 1]} : vector<2x128xf32> to vector<2x32xf32>
    %192 = vector.extract_strided_slice %188 {offsets = [0, 96], sizes = [2, 32], strides = [1, 1]} : vector<2x128xf32> to vector<2x32xf32>
    %193 = arith.mulf %190, %163 : vector<2x32xf32>
    %194 = arith.mulf %189, %191 : vector<2x32xf32>
    %195 = arith.addf %193, %194 : vector<2x32xf32>
    %196 = math.tanh %195 : vector<2x32xf32>
    %197 = arith.mulf %192, %196 : vector<2x32xf32>
    %cst_51 = arith.constant dense<0.000000e+00> : vector<2x128xf32>
    %198 = tpu.matmul %165, %54, %cst_51 {dimension_numbers = #tpu.dot_dimension_numbers<[1], [0], [0], [1], [0, 0, 1, 1], [], []>} : vector<2x32xf32>, vector<32x128xf32>, vector<2x128xf32> -> vector<2x128xf32>
    %cst_52 = arith.constant dense<0.000000e+00> : vector<2x128xf32>
    %199 = tpu.matmul %181, %56, %cst_52 {dimension_numbers = #tpu.dot_dimension_numbers<[1], [0], [0], [1], [0, 0, 1, 1], [], []>} : vector<2x32xf32>, vector<32x128xf32>, vector<2x128xf32> -> vector<2x128xf32>
    %200 = arith.addf %198, %199 : vector<2x128xf32>
    %201 = arith.addf %200, %59 : vector<2x128xf32>
    %202 = math.tanh %201 : vector<2x128xf32>
    %203 = arith.mulf %202, %49 : vector<2x128xf32>
    %204 = arith.addf %203, %52 : vector<2x128xf32>
    %205 = vector.extract_strided_slice %204 {offsets = [0, 0], sizes = [2, 32], strides = [1, 1]} : vector<2x128xf32> to vector<2x32xf32>
    %206 = vector.extract_strided_slice %204 {offsets = [0, 32], sizes = [2, 32], strides = [1, 1]} : vector<2x128xf32> to vector<2x32xf32>
    %207 = vector.extract_strided_slice %204 {offsets = [0, 64], sizes = [2, 32], strides = [1, 1]} : vector<2x128xf32> to vector<2x32xf32>
    %208 = vector.extract_strided_slice %204 {offsets = [0, 96], sizes = [2, 32], strides = [1, 1]} : vector<2x128xf32> to vector<2x32xf32>
    %209 = arith.mulf %206, %179 : vector<2x32xf32>
    %210 = arith.mulf %205, %207 : vector<2x32xf32>
    %211 = arith.addf %209, %210 : vector<2x32xf32>
    %212 = math.tanh %211 : vector<2x32xf32>
    %213 = arith.mulf %208, %212 : vector<2x32xf32>
    %214 = vector.extract_strided_slice %65 {offsets = [0, 5, 0], sizes = [2, 1, 128], strides = [1, 1, 1]} : vector<2x16x128xf32> to vector<2x1x128xf32>
    %215 = vector.shape_cast %214 : vector<2x1x128xf32> to vector<2x128xf32>
    %cst_53 = arith.constant dense<0.000000e+00> : vector<2x128xf32>
    %216 = tpu.matmul %197, %55, %cst_53 {dimension_numbers = #tpu.dot_dimension_numbers<[1], [0], [0], [1], [0, 0, 1, 1], [], []>} : vector<2x32xf32>, vector<32x128xf32>, vector<2x128xf32> -> vector<2x128xf32>
    %217 = arith.addf %215, %216 : vector<2x128xf32>
    %218 = math.tanh %217 : vector<2x128xf32>
    %219 = arith.mulf %218, %49 : vector<2x128xf32>
    %220 = arith.addf %219, %52 : vector<2x128xf32>
    %221 = vector.extract_strided_slice %220 {offsets = [0, 0], sizes = [2, 32], strides = [1, 1]} : vector<2x128xf32> to vector<2x32xf32>
    %222 = vector.extract_strided_slice %220 {offsets = [0, 32], sizes = [2, 32], strides = [1, 1]} : vector<2x128xf32> to vector<2x32xf32>
    %223 = vector.extract_strided_slice %220 {offsets = [0, 64], sizes = [2, 32], strides = [1, 1]} : vector<2x128xf32> to vector<2x32xf32>
    %224 = vector.extract_strided_slice %220 {offsets = [0, 96], sizes = [2, 32], strides = [1, 1]} : vector<2x128xf32> to vector<2x32xf32>
    %225 = arith.mulf %222, %195 : vector<2x32xf32>
    %226 = arith.mulf %221, %223 : vector<2x32xf32>
    %227 = arith.addf %225, %226 : vector<2x32xf32>
    %228 = math.tanh %227 : vector<2x32xf32>
    %229 = arith.mulf %224, %228 : vector<2x32xf32>
    %cst_54 = arith.constant dense<0.000000e+00> : vector<2x128xf32>
    %230 = tpu.matmul %197, %54, %cst_54 {dimension_numbers = #tpu.dot_dimension_numbers<[1], [0], [0], [1], [0, 0, 1, 1], [], []>} : vector<2x32xf32>, vector<32x128xf32>, vector<2x128xf32> -> vector<2x128xf32>
    %cst_55 = arith.constant dense<0.000000e+00> : vector<2x128xf32>
    %231 = tpu.matmul %213, %56, %cst_55 {dimension_numbers = #tpu.dot_dimension_numbers<[1], [0], [0], [1], [0, 0, 1, 1], [], []>} : vector<2x32xf32>, vector<32x128xf32>, vector<2x128xf32> -> vector<2x128xf32>
    %232 = arith.addf %230, %231 : vector<2x128xf32>
    %233 = arith.addf %232, %59 : vector<2x128xf32>
    %234 = math.tanh %233 : vector<2x128xf32>
    %235 = arith.mulf %234, %49 : vector<2x128xf32>
    %236 = arith.addf %235, %52 : vector<2x128xf32>
    %237 = vector.extract_strided_slice %236 {offsets = [0, 0], sizes = [2, 32], strides = [1, 1]} : vector<2x128xf32> to vector<2x32xf32>
    %238 = vector.extract_strided_slice %236 {offsets = [0, 32], sizes = [2, 32], strides = [1, 1]} : vector<2x128xf32> to vector<2x32xf32>
    %239 = vector.extract_strided_slice %236 {offsets = [0, 64], sizes = [2, 32], strides = [1, 1]} : vector<2x128xf32> to vector<2x32xf32>
    %240 = vector.extract_strided_slice %236 {offsets = [0, 96], sizes = [2, 32], strides = [1, 1]} : vector<2x128xf32> to vector<2x32xf32>
    %241 = arith.mulf %238, %211 : vector<2x32xf32>
    %242 = arith.mulf %237, %239 : vector<2x32xf32>
    %243 = arith.addf %241, %242 : vector<2x32xf32>
    %244 = math.tanh %243 : vector<2x32xf32>
    %245 = arith.mulf %240, %244 : vector<2x32xf32>
    %246 = vector.extract_strided_slice %65 {offsets = [0, 6, 0], sizes = [2, 1, 128], strides = [1, 1, 1]} : vector<2x16x128xf32> to vector<2x1x128xf32>
    %247 = vector.shape_cast %246 : vector<2x1x128xf32> to vector<2x128xf32>
    %cst_56 = arith.constant dense<0.000000e+00> : vector<2x128xf32>
    %248 = tpu.matmul %229, %55, %cst_56 {dimension_numbers = #tpu.dot_dimension_numbers<[1], [0], [0], [1], [0, 0, 1, 1], [], []>} : vector<2x32xf32>, vector<32x128xf32>, vector<2x128xf32> -> vector<2x128xf32>
    %249 = arith.addf %247, %248 : vector<2x128xf32>
    %250 = math.tanh %249 : vector<2x128xf32>
    %251 = arith.mulf %250, %49 : vector<2x128xf32>
    %252 = arith.addf %251, %52 : vector<2x128xf32>
    %253 = vector.extract_strided_slice %252 {offsets = [0, 0], sizes = [2, 32], strides = [1, 1]} : vector<2x128xf32> to vector<2x32xf32>
    %254 = vector.extract_strided_slice %252 {offsets = [0, 32], sizes = [2, 32], strides = [1, 1]} : vector<2x128xf32> to vector<2x32xf32>
    %255 = vector.extract_strided_slice %252 {offsets = [0, 64], sizes = [2, 32], strides = [1, 1]} : vector<2x128xf32> to vector<2x32xf32>
    %256 = vector.extract_strided_slice %252 {offsets = [0, 96], sizes = [2, 32], strides = [1, 1]} : vector<2x128xf32> to vector<2x32xf32>
    %257 = arith.mulf %254, %227 : vector<2x32xf32>
    %258 = arith.mulf %253, %255 : vector<2x32xf32>
    %259 = arith.addf %257, %258 : vector<2x32xf32>
    %260 = math.tanh %259 : vector<2x32xf32>
    %261 = arith.mulf %256, %260 : vector<2x32xf32>
    %cst_57 = arith.constant dense<0.000000e+00> : vector<2x128xf32>
    %262 = tpu.matmul %229, %54, %cst_57 {dimension_numbers = #tpu.dot_dimension_numbers<[1], [0], [0], [1], [0, 0, 1, 1], [], []>} : vector<2x32xf32>, vector<32x128xf32>, vector<2x128xf32> -> vector<2x128xf32>
    %cst_58 = arith.constant dense<0.000000e+00> : vector<2x128xf32>
    %263 = tpu.matmul %245, %56, %cst_58 {dimension_numbers = #tpu.dot_dimension_numbers<[1], [0], [0], [1], [0, 0, 1, 1], [], []>} : vector<2x32xf32>, vector<32x128xf32>, vector<2x128xf32> -> vector<2x128xf32>
    %264 = arith.addf %262, %263 : vector<2x128xf32>
    %265 = arith.addf %264, %59 : vector<2x128xf32>
    %266 = math.tanh %265 : vector<2x128xf32>
    %267 = arith.mulf %266, %49 : vector<2x128xf32>
    %268 = arith.addf %267, %52 : vector<2x128xf32>
    %269 = vector.extract_strided_slice %268 {offsets = [0, 0], sizes = [2, 32], strides = [1, 1]} : vector<2x128xf32> to vector<2x32xf32>
    %270 = vector.extract_strided_slice %268 {offsets = [0, 32], sizes = [2, 32], strides = [1, 1]} : vector<2x128xf32> to vector<2x32xf32>
    %271 = vector.extract_strided_slice %268 {offsets = [0, 64], sizes = [2, 32], strides = [1, 1]} : vector<2x128xf32> to vector<2x32xf32>
    %272 = vector.extract_strided_slice %268 {offsets = [0, 96], sizes = [2, 32], strides = [1, 1]} : vector<2x128xf32> to vector<2x32xf32>
    %273 = arith.mulf %270, %243 : vector<2x32xf32>
    %274 = arith.mulf %269, %271 : vector<2x32xf32>
    %275 = arith.addf %273, %274 : vector<2x32xf32>
    %276 = math.tanh %275 : vector<2x32xf32>
    %277 = arith.mulf %272, %276 : vector<2x32xf32>
    %278 = vector.extract_strided_slice %65 {offsets = [0, 7, 0], sizes = [2, 1, 128], strides = [1, 1, 1]} : vector<2x16x128xf32> to vector<2x1x128xf32>
    %279 = vector.shape_cast %278 : vector<2x1x128xf32> to vector<2x128xf32>
    %cst_59 = arith.constant dense<0.000000e+00> : vector<2x128xf32>
    %280 = tpu.matmul %261, %55, %cst_59 {dimension_numbers = #tpu.dot_dimension_numbers<[1], [0], [0], [1], [0, 0, 1, 1], [], []>} : vector<2x32xf32>, vector<32x128xf32>, vector<2x128xf32> -> vector<2x128xf32>
    %281 = arith.addf %279, %280 : vector<2x128xf32>
    %282 = math.tanh %281 : vector<2x128xf32>
    %283 = arith.mulf %282, %49 : vector<2x128xf32>
    %284 = arith.addf %283, %52 : vector<2x128xf32>
    %285 = vector.extract_strided_slice %284 {offsets = [0, 0], sizes = [2, 32], strides = [1, 1]} : vector<2x128xf32> to vector<2x32xf32>
    %286 = vector.extract_strided_slice %284 {offsets = [0, 32], sizes = [2, 32], strides = [1, 1]} : vector<2x128xf32> to vector<2x32xf32>
    %287 = vector.extract_strided_slice %284 {offsets = [0, 64], sizes = [2, 32], strides = [1, 1]} : vector<2x128xf32> to vector<2x32xf32>
    %288 = vector.extract_strided_slice %284 {offsets = [0, 96], sizes = [2, 32], strides = [1, 1]} : vector<2x128xf32> to vector<2x32xf32>
    %289 = arith.mulf %286, %259 : vector<2x32xf32>
    %290 = arith.mulf %285, %287 : vector<2x32xf32>
    %291 = arith.addf %289, %290 : vector<2x32xf32>
    %292 = math.tanh %291 : vector<2x32xf32>
    %293 = arith.mulf %288, %292 : vector<2x32xf32>
    %cst_60 = arith.constant dense<0.000000e+00> : vector<2x128xf32>
    %294 = tpu.matmul %261, %54, %cst_60 {dimension_numbers = #tpu.dot_dimension_numbers<[1], [0], [0], [1], [0, 0, 1, 1], [], []>} : vector<2x32xf32>, vector<32x128xf32>, vector<2x128xf32> -> vector<2x128xf32>
    %cst_61 = arith.constant dense<0.000000e+00> : vector<2x128xf32>
    %295 = tpu.matmul %277, %56, %cst_61 {dimension_numbers = #tpu.dot_dimension_numbers<[1], [0], [0], [1], [0, 0, 1, 1], [], []>} : vector<2x32xf32>, vector<32x128xf32>, vector<2x128xf32> -> vector<2x128xf32>
    %296 = arith.addf %294, %295 : vector<2x128xf32>
    %297 = arith.addf %296, %59 : vector<2x128xf32>
    %298 = math.tanh %297 : vector<2x128xf32>
    %299 = arith.mulf %298, %49 : vector<2x128xf32>
    %300 = arith.addf %299, %52 : vector<2x128xf32>
    %301 = vector.extract_strided_slice %300 {offsets = [0, 0], sizes = [2, 32], strides = [1, 1]} : vector<2x128xf32> to vector<2x32xf32>
    %302 = vector.extract_strided_slice %300 {offsets = [0, 32], sizes = [2, 32], strides = [1, 1]} : vector<2x128xf32> to vector<2x32xf32>
    %303 = vector.extract_strided_slice %300 {offsets = [0, 64], sizes = [2, 32], strides = [1, 1]} : vector<2x128xf32> to vector<2x32xf32>
    %304 = vector.extract_strided_slice %300 {offsets = [0, 96], sizes = [2, 32], strides = [1, 1]} : vector<2x128xf32> to vector<2x32xf32>
    %305 = arith.mulf %302, %275 : vector<2x32xf32>
    %306 = arith.mulf %301, %303 : vector<2x32xf32>
    %307 = arith.addf %305, %306 : vector<2x32xf32>
    %308 = math.tanh %307 : vector<2x32xf32>
    %309 = arith.mulf %304, %308 : vector<2x32xf32>
    %310 = vector.extract_strided_slice %65 {offsets = [0, 8, 0], sizes = [2, 1, 128], strides = [1, 1, 1]} : vector<2x16x128xf32> to vector<2x1x128xf32>
    %311 = vector.shape_cast %310 : vector<2x1x128xf32> to vector<2x128xf32>
    %cst_62 = arith.constant dense<0.000000e+00> : vector<2x128xf32>
    %312 = tpu.matmul %293, %55, %cst_62 {dimension_numbers = #tpu.dot_dimension_numbers<[1], [0], [0], [1], [0, 0, 1, 1], [], []>} : vector<2x32xf32>, vector<32x128xf32>, vector<2x128xf32> -> vector<2x128xf32>
    %313 = arith.addf %311, %312 : vector<2x128xf32>
    %314 = math.tanh %313 : vector<2x128xf32>
    %315 = arith.mulf %314, %49 : vector<2x128xf32>
    %316 = arith.addf %315, %52 : vector<2x128xf32>
    %317 = vector.extract_strided_slice %316 {offsets = [0, 0], sizes = [2, 32], strides = [1, 1]} : vector<2x128xf32> to vector<2x32xf32>
    %318 = vector.extract_strided_slice %316 {offsets = [0, 32], sizes = [2, 32], strides = [1, 1]} : vector<2x128xf32> to vector<2x32xf32>
    %319 = vector.extract_strided_slice %316 {offsets = [0, 64], sizes = [2, 32], strides = [1, 1]} : vector<2x128xf32> to vector<2x32xf32>
    %320 = vector.extract_strided_slice %316 {offsets = [0, 96], sizes = [2, 32], strides = [1, 1]} : vector<2x128xf32> to vector<2x32xf32>
    %321 = arith.mulf %318, %291 : vector<2x32xf32>
    %322 = arith.mulf %317, %319 : vector<2x32xf32>
    %323 = arith.addf %321, %322 : vector<2x32xf32>
    %324 = math.tanh %323 : vector<2x32xf32>
    %325 = arith.mulf %320, %324 : vector<2x32xf32>
    %cst_63 = arith.constant dense<0.000000e+00> : vector<2x128xf32>
    %326 = tpu.matmul %293, %54, %cst_63 {dimension_numbers = #tpu.dot_dimension_numbers<[1], [0], [0], [1], [0, 0, 1, 1], [], []>} : vector<2x32xf32>, vector<32x128xf32>, vector<2x128xf32> -> vector<2x128xf32>
    %cst_64 = arith.constant dense<0.000000e+00> : vector<2x128xf32>
    %327 = tpu.matmul %309, %56, %cst_64 {dimension_numbers = #tpu.dot_dimension_numbers<[1], [0], [0], [1], [0, 0, 1, 1], [], []>} : vector<2x32xf32>, vector<32x128xf32>, vector<2x128xf32> -> vector<2x128xf32>
    %328 = arith.addf %326, %327 : vector<2x128xf32>
    %329 = arith.addf %328, %59 : vector<2x128xf32>
    %330 = math.tanh %329 : vector<2x128xf32>
    %331 = arith.mulf %330, %49 : vector<2x128xf32>
    %332 = arith.addf %331, %52 : vector<2x128xf32>
    %333 = vector.extract_strided_slice %332 {offsets = [0, 0], sizes = [2, 32], strides = [1, 1]} : vector<2x128xf32> to vector<2x32xf32>
    %334 = vector.extract_strided_slice %332 {offsets = [0, 32], sizes = [2, 32], strides = [1, 1]} : vector<2x128xf32> to vector<2x32xf32>
    %335 = vector.extract_strided_slice %332 {offsets = [0, 64], sizes = [2, 32], strides = [1, 1]} : vector<2x128xf32> to vector<2x32xf32>
    %336 = vector.extract_strided_slice %332 {offsets = [0, 96], sizes = [2, 32], strides = [1, 1]} : vector<2x128xf32> to vector<2x32xf32>
    %337 = arith.mulf %334, %307 : vector<2x32xf32>
    %338 = arith.mulf %333, %335 : vector<2x32xf32>
    %339 = arith.addf %337, %338 : vector<2x32xf32>
    %340 = math.tanh %339 : vector<2x32xf32>
    %341 = arith.mulf %336, %340 : vector<2x32xf32>
    %342 = vector.extract_strided_slice %65 {offsets = [0, 9, 0], sizes = [2, 1, 128], strides = [1, 1, 1]} : vector<2x16x128xf32> to vector<2x1x128xf32>
    %343 = vector.shape_cast %342 : vector<2x1x128xf32> to vector<2x128xf32>
    %cst_65 = arith.constant dense<0.000000e+00> : vector<2x128xf32>
    %344 = tpu.matmul %325, %55, %cst_65 {dimension_numbers = #tpu.dot_dimension_numbers<[1], [0], [0], [1], [0, 0, 1, 1], [], []>} : vector<2x32xf32>, vector<32x128xf32>, vector<2x128xf32> -> vector<2x128xf32>
    %345 = arith.addf %343, %344 : vector<2x128xf32>
    %346 = math.tanh %345 : vector<2x128xf32>
    %347 = arith.mulf %346, %49 : vector<2x128xf32>
    %348 = arith.addf %347, %52 : vector<2x128xf32>
    %349 = vector.extract_strided_slice %348 {offsets = [0, 0], sizes = [2, 32], strides = [1, 1]} : vector<2x128xf32> to vector<2x32xf32>
    %350 = vector.extract_strided_slice %348 {offsets = [0, 32], sizes = [2, 32], strides = [1, 1]} : vector<2x128xf32> to vector<2x32xf32>
    %351 = vector.extract_strided_slice %348 {offsets = [0, 64], sizes = [2, 32], strides = [1, 1]} : vector<2x128xf32> to vector<2x32xf32>
    %352 = vector.extract_strided_slice %348 {offsets = [0, 96], sizes = [2, 32], strides = [1, 1]} : vector<2x128xf32> to vector<2x32xf32>
    %353 = arith.mulf %350, %323 : vector<2x32xf32>
    %354 = arith.mulf %349, %351 : vector<2x32xf32>
    %355 = arith.addf %353, %354 : vector<2x32xf32>
    %356 = math.tanh %355 : vector<2x32xf32>
    %357 = arith.mulf %352, %356 : vector<2x32xf32>
    %cst_66 = arith.constant dense<0.000000e+00> : vector<2x128xf32>
    %358 = tpu.matmul %325, %54, %cst_66 {dimension_numbers = #tpu.dot_dimension_numbers<[1], [0], [0], [1], [0, 0, 1, 1], [], []>} : vector<2x32xf32>, vector<32x128xf32>, vector<2x128xf32> -> vector<2x128xf32>
    %cst_67 = arith.constant dense<0.000000e+00> : vector<2x128xf32>
    %359 = tpu.matmul %341, %56, %cst_67 {dimension_numbers = #tpu.dot_dimension_numbers<[1], [0], [0], [1], [0, 0, 1, 1], [], []>} : vector<2x32xf32>, vector<32x128xf32>, vector<2x128xf32> -> vector<2x128xf32>
    %360 = arith.addf %358, %359 : vector<2x128xf32>
    %361 = arith.addf %360, %59 : vector<2x128xf32>
    %362 = math.tanh %361 : vector<2x128xf32>
    %363 = arith.mulf %362, %49 : vector<2x128xf32>
    %364 = arith.addf %363, %52 : vector<2x128xf32>
    %365 = vector.extract_strided_slice %364 {offsets = [0, 0], sizes = [2, 32], strides = [1, 1]} : vector<2x128xf32> to vector<2x32xf32>
    %366 = vector.extract_strided_slice %364 {offsets = [0, 32], sizes = [2, 32], strides = [1, 1]} : vector<2x128xf32> to vector<2x32xf32>
    %367 = vector.extract_strided_slice %364 {offsets = [0, 64], sizes = [2, 32], strides = [1, 1]} : vector<2x128xf32> to vector<2x32xf32>
    %368 = vector.extract_strided_slice %364 {offsets = [0, 96], sizes = [2, 32], strides = [1, 1]} : vector<2x128xf32> to vector<2x32xf32>
    %369 = arith.mulf %366, %339 : vector<2x32xf32>
    %370 = arith.mulf %365, %367 : vector<2x32xf32>
    %371 = arith.addf %369, %370 : vector<2x32xf32>
    %372 = math.tanh %371 : vector<2x32xf32>
    %373 = arith.mulf %368, %372 : vector<2x32xf32>
    %374 = vector.extract_strided_slice %65 {offsets = [0, 10, 0], sizes = [2, 1, 128], strides = [1, 1, 1]} : vector<2x16x128xf32> to vector<2x1x128xf32>
    %375 = vector.shape_cast %374 : vector<2x1x128xf32> to vector<2x128xf32>
    %cst_68 = arith.constant dense<0.000000e+00> : vector<2x128xf32>
    %376 = tpu.matmul %357, %55, %cst_68 {dimension_numbers = #tpu.dot_dimension_numbers<[1], [0], [0], [1], [0, 0, 1, 1], [], []>} : vector<2x32xf32>, vector<32x128xf32>, vector<2x128xf32> -> vector<2x128xf32>
    %377 = arith.addf %375, %376 : vector<2x128xf32>
    %378 = math.tanh %377 : vector<2x128xf32>
    %379 = arith.mulf %378, %49 : vector<2x128xf32>
    %380 = arith.addf %379, %52 : vector<2x128xf32>
    %381 = vector.extract_strided_slice %380 {offsets = [0, 0], sizes = [2, 32], strides = [1, 1]} : vector<2x128xf32> to vector<2x32xf32>
    %382 = vector.extract_strided_slice %380 {offsets = [0, 32], sizes = [2, 32], strides = [1, 1]} : vector<2x128xf32> to vector<2x32xf32>
    %383 = vector.extract_strided_slice %380 {offsets = [0, 64], sizes = [2, 32], strides = [1, 1]} : vector<2x128xf32> to vector<2x32xf32>
    %384 = vector.extract_strided_slice %380 {offsets = [0, 96], sizes = [2, 32], strides = [1, 1]} : vector<2x128xf32> to vector<2x32xf32>
    %385 = arith.mulf %382, %355 : vector<2x32xf32>
    %386 = arith.mulf %381, %383 : vector<2x32xf32>
    %387 = arith.addf %385, %386 : vector<2x32xf32>
    %388 = math.tanh %387 : vector<2x32xf32>
    %389 = arith.mulf %384, %388 : vector<2x32xf32>
    %cst_69 = arith.constant dense<0.000000e+00> : vector<2x128xf32>
    %390 = tpu.matmul %357, %54, %cst_69 {dimension_numbers = #tpu.dot_dimension_numbers<[1], [0], [0], [1], [0, 0, 1, 1], [], []>} : vector<2x32xf32>, vector<32x128xf32>, vector<2x128xf32> -> vector<2x128xf32>
    %cst_70 = arith.constant dense<0.000000e+00> : vector<2x128xf32>
    %391 = tpu.matmul %373, %56, %cst_70 {dimension_numbers = #tpu.dot_dimension_numbers<[1], [0], [0], [1], [0, 0, 1, 1], [], []>} : vector<2x32xf32>, vector<32x128xf32>, vector<2x128xf32> -> vector<2x128xf32>
    %392 = arith.addf %390, %391 : vector<2x128xf32>
    %393 = arith.addf %392, %59 : vector<2x128xf32>
    %394 = math.tanh %393 : vector<2x128xf32>
    %395 = arith.mulf %394, %49 : vector<2x128xf32>
    %396 = arith.addf %395, %52 : vector<2x128xf32>
    %397 = vector.extract_strided_slice %396 {offsets = [0, 0], sizes = [2, 32], strides = [1, 1]} : vector<2x128xf32> to vector<2x32xf32>
    %398 = vector.extract_strided_slice %396 {offsets = [0, 32], sizes = [2, 32], strides = [1, 1]} : vector<2x128xf32> to vector<2x32xf32>
    %399 = vector.extract_strided_slice %396 {offsets = [0, 64], sizes = [2, 32], strides = [1, 1]} : vector<2x128xf32> to vector<2x32xf32>
    %400 = vector.extract_strided_slice %396 {offsets = [0, 96], sizes = [2, 32], strides = [1, 1]} : vector<2x128xf32> to vector<2x32xf32>
    %401 = arith.mulf %398, %371 : vector<2x32xf32>
    %402 = arith.mulf %397, %399 : vector<2x32xf32>
    %403 = arith.addf %401, %402 : vector<2x32xf32>
    %404 = math.tanh %403 : vector<2x32xf32>
    %405 = arith.mulf %400, %404 : vector<2x32xf32>
    %406 = vector.extract_strided_slice %65 {offsets = [0, 11, 0], sizes = [2, 1, 128], strides = [1, 1, 1]} : vector<2x16x128xf32> to vector<2x1x128xf32>
    %407 = vector.shape_cast %406 : vector<2x1x128xf32> to vector<2x128xf32>
    %cst_71 = arith.constant dense<0.000000e+00> : vector<2x128xf32>
    %408 = tpu.matmul %389, %55, %cst_71 {dimension_numbers = #tpu.dot_dimension_numbers<[1], [0], [0], [1], [0, 0, 1, 1], [], []>} : vector<2x32xf32>, vector<32x128xf32>, vector<2x128xf32> -> vector<2x128xf32>
    %409 = arith.addf %407, %408 : vector<2x128xf32>
    %410 = math.tanh %409 : vector<2x128xf32>
    %411 = arith.mulf %410, %49 : vector<2x128xf32>
    %412 = arith.addf %411, %52 : vector<2x128xf32>
    %413 = vector.extract_strided_slice %412 {offsets = [0, 0], sizes = [2, 32], strides = [1, 1]} : vector<2x128xf32> to vector<2x32xf32>
    %414 = vector.extract_strided_slice %412 {offsets = [0, 32], sizes = [2, 32], strides = [1, 1]} : vector<2x128xf32> to vector<2x32xf32>
    %415 = vector.extract_strided_slice %412 {offsets = [0, 64], sizes = [2, 32], strides = [1, 1]} : vector<2x128xf32> to vector<2x32xf32>
    %416 = vector.extract_strided_slice %412 {offsets = [0, 96], sizes = [2, 32], strides = [1, 1]} : vector<2x128xf32> to vector<2x32xf32>
    %417 = arith.mulf %414, %387 : vector<2x32xf32>
    %418 = arith.mulf %413, %415 : vector<2x32xf32>
    %419 = arith.addf %417, %418 : vector<2x32xf32>
    %420 = math.tanh %419 : vector<2x32xf32>
    %421 = arith.mulf %416, %420 : vector<2x32xf32>
    %cst_72 = arith.constant dense<0.000000e+00> : vector<2x128xf32>
    %422 = tpu.matmul %389, %54, %cst_72 {dimension_numbers = #tpu.dot_dimension_numbers<[1], [0], [0], [1], [0, 0, 1, 1], [], []>} : vector<2x32xf32>, vector<32x128xf32>, vector<2x128xf32> -> vector<2x128xf32>
    %cst_73 = arith.constant dense<0.000000e+00> : vector<2x128xf32>
    %423 = tpu.matmul %405, %56, %cst_73 {dimension_numbers = #tpu.dot_dimension_numbers<[1], [0], [0], [1], [0, 0, 1, 1], [], []>} : vector<2x32xf32>, vector<32x128xf32>, vector<2x128xf32> -> vector<2x128xf32>
    %424 = arith.addf %422, %423 : vector<2x128xf32>
    %425 = arith.addf %424, %59 : vector<2x128xf32>
    %426 = math.tanh %425 : vector<2x128xf32>
    %427 = arith.mulf %426, %49 : vector<2x128xf32>
    %428 = arith.addf %427, %52 : vector<2x128xf32>
    %429 = vector.extract_strided_slice %428 {offsets = [0, 0], sizes = [2, 32], strides = [1, 1]} : vector<2x128xf32> to vector<2x32xf32>
    %430 = vector.extract_strided_slice %428 {offsets = [0, 32], sizes = [2, 32], strides = [1, 1]} : vector<2x128xf32> to vector<2x32xf32>
    %431 = vector.extract_strided_slice %428 {offsets = [0, 64], sizes = [2, 32], strides = [1, 1]} : vector<2x128xf32> to vector<2x32xf32>
    %432 = vector.extract_strided_slice %428 {offsets = [0, 96], sizes = [2, 32], strides = [1, 1]} : vector<2x128xf32> to vector<2x32xf32>
    %433 = arith.mulf %430, %403 : vector<2x32xf32>
    %434 = arith.mulf %429, %431 : vector<2x32xf32>
    %435 = arith.addf %433, %434 : vector<2x32xf32>
    %436 = math.tanh %435 : vector<2x32xf32>
    %437 = arith.mulf %432, %436 : vector<2x32xf32>
    %438 = vector.extract_strided_slice %65 {offsets = [0, 12, 0], sizes = [2, 1, 128], strides = [1, 1, 1]} : vector<2x16x128xf32> to vector<2x1x128xf32>
    %439 = vector.shape_cast %438 : vector<2x1x128xf32> to vector<2x128xf32>
    %cst_74 = arith.constant dense<0.000000e+00> : vector<2x128xf32>
    %440 = tpu.matmul %421, %55, %cst_74 {dimension_numbers = #tpu.dot_dimension_numbers<[1], [0], [0], [1], [0, 0, 1, 1], [], []>} : vector<2x32xf32>, vector<32x128xf32>, vector<2x128xf32> -> vector<2x128xf32>
    %441 = arith.addf %439, %440 : vector<2x128xf32>
    %442 = math.tanh %441 : vector<2x128xf32>
    %443 = arith.mulf %442, %49 : vector<2x128xf32>
    %444 = arith.addf %443, %52 : vector<2x128xf32>
    %445 = vector.extract_strided_slice %444 {offsets = [0, 0], sizes = [2, 32], strides = [1, 1]} : vector<2x128xf32> to vector<2x32xf32>
    %446 = vector.extract_strided_slice %444 {offsets = [0, 32], sizes = [2, 32], strides = [1, 1]} : vector<2x128xf32> to vector<2x32xf32>
    %447 = vector.extract_strided_slice %444 {offsets = [0, 64], sizes = [2, 32], strides = [1, 1]} : vector<2x128xf32> to vector<2x32xf32>
    %448 = vector.extract_strided_slice %444 {offsets = [0, 96], sizes = [2, 32], strides = [1, 1]} : vector<2x128xf32> to vector<2x32xf32>
    %449 = arith.mulf %446, %419 : vector<2x32xf32>
    %450 = arith.mulf %445, %447 : vector<2x32xf32>
    %451 = arith.addf %449, %450 : vector<2x32xf32>
    %452 = math.tanh %451 : vector<2x32xf32>
    %453 = arith.mulf %448, %452 : vector<2x32xf32>
    %cst_75 = arith.constant dense<0.000000e+00> : vector<2x128xf32>
    %454 = tpu.matmul %421, %54, %cst_75 {dimension_numbers = #tpu.dot_dimension_numbers<[1], [0], [0], [1], [0, 0, 1, 1], [], []>} : vector<2x32xf32>, vector<32x128xf32>, vector<2x128xf32> -> vector<2x128xf32>
    %cst_76 = arith.constant dense<0.000000e+00> : vector<2x128xf32>
    %455 = tpu.matmul %437, %56, %cst_76 {dimension_numbers = #tpu.dot_dimension_numbers<[1], [0], [0], [1], [0, 0, 1, 1], [], []>} : vector<2x32xf32>, vector<32x128xf32>, vector<2x128xf32> -> vector<2x128xf32>
    %456 = arith.addf %454, %455 : vector<2x128xf32>
    %457 = arith.addf %456, %59 : vector<2x128xf32>
    %458 = math.tanh %457 : vector<2x128xf32>
    %459 = arith.mulf %458, %49 : vector<2x128xf32>
    %460 = arith.addf %459, %52 : vector<2x128xf32>
    %461 = vector.extract_strided_slice %460 {offsets = [0, 0], sizes = [2, 32], strides = [1, 1]} : vector<2x128xf32> to vector<2x32xf32>
    %462 = vector.extract_strided_slice %460 {offsets = [0, 32], sizes = [2, 32], strides = [1, 1]} : vector<2x128xf32> to vector<2x32xf32>
    %463 = vector.extract_strided_slice %460 {offsets = [0, 64], sizes = [2, 32], strides = [1, 1]} : vector<2x128xf32> to vector<2x32xf32>
    %464 = vector.extract_strided_slice %460 {offsets = [0, 96], sizes = [2, 32], strides = [1, 1]} : vector<2x128xf32> to vector<2x32xf32>
    %465 = arith.mulf %462, %435 : vector<2x32xf32>
    %466 = arith.mulf %461, %463 : vector<2x32xf32>
    %467 = arith.addf %465, %466 : vector<2x32xf32>
    %468 = math.tanh %467 : vector<2x32xf32>
    %469 = arith.mulf %464, %468 : vector<2x32xf32>
    %470 = vector.extract_strided_slice %65 {offsets = [0, 13, 0], sizes = [2, 1, 128], strides = [1, 1, 1]} : vector<2x16x128xf32> to vector<2x1x128xf32>
    %471 = vector.shape_cast %470 : vector<2x1x128xf32> to vector<2x128xf32>
    %cst_77 = arith.constant dense<0.000000e+00> : vector<2x128xf32>
    %472 = tpu.matmul %453, %55, %cst_77 {dimension_numbers = #tpu.dot_dimension_numbers<[1], [0], [0], [1], [0, 0, 1, 1], [], []>} : vector<2x32xf32>, vector<32x128xf32>, vector<2x128xf32> -> vector<2x128xf32>
    %473 = arith.addf %471, %472 : vector<2x128xf32>
    %474 = math.tanh %473 : vector<2x128xf32>
    %475 = arith.mulf %474, %49 : vector<2x128xf32>
    %476 = arith.addf %475, %52 : vector<2x128xf32>
    %477 = vector.extract_strided_slice %476 {offsets = [0, 0], sizes = [2, 32], strides = [1, 1]} : vector<2x128xf32> to vector<2x32xf32>
    %478 = vector.extract_strided_slice %476 {offsets = [0, 32], sizes = [2, 32], strides = [1, 1]} : vector<2x128xf32> to vector<2x32xf32>
    %479 = vector.extract_strided_slice %476 {offsets = [0, 64], sizes = [2, 32], strides = [1, 1]} : vector<2x128xf32> to vector<2x32xf32>
    %480 = vector.extract_strided_slice %476 {offsets = [0, 96], sizes = [2, 32], strides = [1, 1]} : vector<2x128xf32> to vector<2x32xf32>
    %481 = arith.mulf %478, %451 : vector<2x32xf32>
    %482 = arith.mulf %477, %479 : vector<2x32xf32>
    %483 = arith.addf %481, %482 : vector<2x32xf32>
    %484 = math.tanh %483 : vector<2x32xf32>
    %485 = arith.mulf %480, %484 : vector<2x32xf32>
    %cst_78 = arith.constant dense<0.000000e+00> : vector<2x128xf32>
    %486 = tpu.matmul %453, %54, %cst_78 {dimension_numbers = #tpu.dot_dimension_numbers<[1], [0], [0], [1], [0, 0, 1, 1], [], []>} : vector<2x32xf32>, vector<32x128xf32>, vector<2x128xf32> -> vector<2x128xf32>
    %cst_79 = arith.constant dense<0.000000e+00> : vector<2x128xf32>
    %487 = tpu.matmul %469, %56, %cst_79 {dimension_numbers = #tpu.dot_dimension_numbers<[1], [0], [0], [1], [0, 0, 1, 1], [], []>} : vector<2x32xf32>, vector<32x128xf32>, vector<2x128xf32> -> vector<2x128xf32>
    %488 = arith.addf %486, %487 : vector<2x128xf32>
    %489 = arith.addf %488, %59 : vector<2x128xf32>
    %490 = math.tanh %489 : vector<2x128xf32>
    %491 = arith.mulf %490, %49 : vector<2x128xf32>
    %492 = arith.addf %491, %52 : vector<2x128xf32>
    %493 = vector.extract_strided_slice %492 {offsets = [0, 0], sizes = [2, 32], strides = [1, 1]} : vector<2x128xf32> to vector<2x32xf32>
    %494 = vector.extract_strided_slice %492 {offsets = [0, 32], sizes = [2, 32], strides = [1, 1]} : vector<2x128xf32> to vector<2x32xf32>
    %495 = vector.extract_strided_slice %492 {offsets = [0, 64], sizes = [2, 32], strides = [1, 1]} : vector<2x128xf32> to vector<2x32xf32>
    %496 = vector.extract_strided_slice %492 {offsets = [0, 96], sizes = [2, 32], strides = [1, 1]} : vector<2x128xf32> to vector<2x32xf32>
    %497 = arith.mulf %494, %467 : vector<2x32xf32>
    %498 = arith.mulf %493, %495 : vector<2x32xf32>
    %499 = arith.addf %497, %498 : vector<2x32xf32>
    %500 = math.tanh %499 : vector<2x32xf32>
    %501 = arith.mulf %496, %500 : vector<2x32xf32>
    %502 = vector.extract_strided_slice %65 {offsets = [0, 14, 0], sizes = [2, 1, 128], strides = [1, 1, 1]} : vector<2x16x128xf32> to vector<2x1x128xf32>
    %503 = vector.shape_cast %502 : vector<2x1x128xf32> to vector<2x128xf32>
    %cst_80 = arith.constant dense<0.000000e+00> : vector<2x128xf32>
    %504 = tpu.matmul %485, %55, %cst_80 {dimension_numbers = #tpu.dot_dimension_numbers<[1], [0], [0], [1], [0, 0, 1, 1], [], []>} : vector<2x32xf32>, vector<32x128xf32>, vector<2x128xf32> -> vector<2x128xf32>
    %505 = arith.addf %503, %504 : vector<2x128xf32>
    %506 = math.tanh %505 : vector<2x128xf32>
    %507 = arith.mulf %506, %49 : vector<2x128xf32>
    %508 = arith.addf %507, %52 : vector<2x128xf32>
    %509 = vector.extract_strided_slice %508 {offsets = [0, 0], sizes = [2, 32], strides = [1, 1]} : vector<2x128xf32> to vector<2x32xf32>
    %510 = vector.extract_strided_slice %508 {offsets = [0, 32], sizes = [2, 32], strides = [1, 1]} : vector<2x128xf32> to vector<2x32xf32>
    %511 = vector.extract_strided_slice %508 {offsets = [0, 64], sizes = [2, 32], strides = [1, 1]} : vector<2x128xf32> to vector<2x32xf32>
    %512 = vector.extract_strided_slice %508 {offsets = [0, 96], sizes = [2, 32], strides = [1, 1]} : vector<2x128xf32> to vector<2x32xf32>
    %513 = arith.mulf %510, %483 : vector<2x32xf32>
    %514 = arith.mulf %509, %511 : vector<2x32xf32>
    %515 = arith.addf %513, %514 : vector<2x32xf32>
    %516 = math.tanh %515 : vector<2x32xf32>
    %517 = arith.mulf %512, %516 : vector<2x32xf32>
    %cst_81 = arith.constant dense<0.000000e+00> : vector<2x128xf32>
    %518 = tpu.matmul %485, %54, %cst_81 {dimension_numbers = #tpu.dot_dimension_numbers<[1], [0], [0], [1], [0, 0, 1, 1], [], []>} : vector<2x32xf32>, vector<32x128xf32>, vector<2x128xf32> -> vector<2x128xf32>
    %cst_82 = arith.constant dense<0.000000e+00> : vector<2x128xf32>
    %519 = tpu.matmul %501, %56, %cst_82 {dimension_numbers = #tpu.dot_dimension_numbers<[1], [0], [0], [1], [0, 0, 1, 1], [], []>} : vector<2x32xf32>, vector<32x128xf32>, vector<2x128xf32> -> vector<2x128xf32>
    %520 = arith.addf %518, %519 : vector<2x128xf32>
    %521 = arith.addf %520, %59 : vector<2x128xf32>
    %522 = math.tanh %521 : vector<2x128xf32>
    %523 = arith.mulf %522, %49 : vector<2x128xf32>
    %524 = arith.addf %523, %52 : vector<2x128xf32>
    %525 = vector.extract_strided_slice %524 {offsets = [0, 0], sizes = [2, 32], strides = [1, 1]} : vector<2x128xf32> to vector<2x32xf32>
    %526 = vector.extract_strided_slice %524 {offsets = [0, 32], sizes = [2, 32], strides = [1, 1]} : vector<2x128xf32> to vector<2x32xf32>
    %527 = vector.extract_strided_slice %524 {offsets = [0, 64], sizes = [2, 32], strides = [1, 1]} : vector<2x128xf32> to vector<2x32xf32>
    %528 = vector.extract_strided_slice %524 {offsets = [0, 96], sizes = [2, 32], strides = [1, 1]} : vector<2x128xf32> to vector<2x32xf32>
    %529 = arith.mulf %526, %499 : vector<2x32xf32>
    %530 = arith.mulf %525, %527 : vector<2x32xf32>
    %531 = arith.addf %529, %530 : vector<2x32xf32>
    %532 = math.tanh %531 : vector<2x32xf32>
    %533 = arith.mulf %528, %532 : vector<2x32xf32>
    %534 = vector.extract_strided_slice %65 {offsets = [0, 15, 0], sizes = [2, 1, 128], strides = [1, 1, 1]} : vector<2x16x128xf32> to vector<2x1x128xf32>
    %535 = vector.shape_cast %534 : vector<2x1x128xf32> to vector<2x128xf32>
    %cst_83 = arith.constant dense<0.000000e+00> : vector<2x128xf32>
    %536 = tpu.matmul %517, %55, %cst_83 {dimension_numbers = #tpu.dot_dimension_numbers<[1], [0], [0], [1], [0, 0, 1, 1], [], []>} : vector<2x32xf32>, vector<32x128xf32>, vector<2x128xf32> -> vector<2x128xf32>
    %537 = arith.addf %535, %536 : vector<2x128xf32>
    %538 = math.tanh %537 : vector<2x128xf32>
    %539 = arith.mulf %538, %49 : vector<2x128xf32>
    %540 = arith.addf %539, %52 : vector<2x128xf32>
    %541 = vector.extract_strided_slice %540 {offsets = [0, 0], sizes = [2, 32], strides = [1, 1]} : vector<2x128xf32> to vector<2x32xf32>
    %542 = vector.extract_strided_slice %540 {offsets = [0, 32], sizes = [2, 32], strides = [1, 1]} : vector<2x128xf32> to vector<2x32xf32>
    %543 = vector.extract_strided_slice %540 {offsets = [0, 64], sizes = [2, 32], strides = [1, 1]} : vector<2x128xf32> to vector<2x32xf32>
    %544 = vector.extract_strided_slice %540 {offsets = [0, 96], sizes = [2, 32], strides = [1, 1]} : vector<2x128xf32> to vector<2x32xf32>
    %545 = arith.mulf %542, %515 : vector<2x32xf32>
    %546 = arith.mulf %541, %543 : vector<2x32xf32>
    %547 = arith.addf %545, %546 : vector<2x32xf32>
    %548 = math.tanh %547 : vector<2x32xf32>
    %549 = arith.mulf %544, %548 : vector<2x32xf32>
    %cst_84 = arith.constant dense<0.000000e+00> : vector<2x128xf32>
    %550 = tpu.matmul %517, %54, %cst_84 {dimension_numbers = #tpu.dot_dimension_numbers<[1], [0], [0], [1], [0, 0, 1, 1], [], []>} : vector<2x32xf32>, vector<32x128xf32>, vector<2x128xf32> -> vector<2x128xf32>
    %cst_85 = arith.constant dense<0.000000e+00> : vector<2x128xf32>
    %551 = tpu.matmul %533, %56, %cst_85 {dimension_numbers = #tpu.dot_dimension_numbers<[1], [0], [0], [1], [0, 0, 1, 1], [], []>} : vector<2x32xf32>, vector<32x128xf32>, vector<2x128xf32> -> vector<2x128xf32>
    %552 = arith.addf %550, %551 : vector<2x128xf32>
    %553 = arith.addf %552, %59 : vector<2x128xf32>
    %554 = math.tanh %553 : vector<2x128xf32>
    %555 = arith.mulf %554, %49 : vector<2x128xf32>
    %556 = arith.addf %555, %52 : vector<2x128xf32>
    %557 = vector.extract_strided_slice %556 {offsets = [0, 0], sizes = [2, 32], strides = [1, 1]} : vector<2x128xf32> to vector<2x32xf32>
    %558 = vector.extract_strided_slice %556 {offsets = [0, 32], sizes = [2, 32], strides = [1, 1]} : vector<2x128xf32> to vector<2x32xf32>
    %559 = vector.extract_strided_slice %556 {offsets = [0, 64], sizes = [2, 32], strides = [1, 1]} : vector<2x128xf32> to vector<2x32xf32>
    %560 = vector.extract_strided_slice %556 {offsets = [0, 96], sizes = [2, 32], strides = [1, 1]} : vector<2x128xf32> to vector<2x32xf32>
    %561 = arith.mulf %558, %531 : vector<2x32xf32>
    %562 = arith.mulf %557, %559 : vector<2x32xf32>
    %563 = arith.addf %561, %562 : vector<2x32xf32>
    %564 = math.tanh %563 : vector<2x32xf32>
    %565 = arith.mulf %560, %564 : vector<2x32xf32>
    %cst_86 = arith.constant dense<0.000000e+00> : vector<2x128xf32>
    %566 = tpu.matmul %549, %54, %cst_86 {dimension_numbers = #tpu.dot_dimension_numbers<[1], [0], [0], [1], [0, 0, 1, 1], [], []>} : vector<2x32xf32>, vector<32x128xf32>, vector<2x128xf32> -> vector<2x128xf32>
    %cst_87 = arith.constant dense<0.000000e+00> : vector<2x128xf32>
    %567 = tpu.matmul %565, %56, %cst_87 {dimension_numbers = #tpu.dot_dimension_numbers<[1], [0], [0], [1], [0, 0, 1, 1], [], []>} : vector<2x32xf32>, vector<32x128xf32>, vector<2x128xf32> -> vector<2x128xf32>
    %568 = arith.addf %566, %567 : vector<2x128xf32>
    %569 = arith.addf %568, %59 : vector<2x128xf32>
    %570 = math.tanh %569 : vector<2x128xf32>
    %571 = arith.mulf %570, %49 : vector<2x128xf32>
    %572 = arith.addf %571, %52 : vector<2x128xf32>
    %573 = vector.extract_strided_slice %572 {offsets = [0, 0], sizes = [2, 32], strides = [1, 1]} : vector<2x128xf32> to vector<2x32xf32>
    %574 = vector.extract_strided_slice %572 {offsets = [0, 32], sizes = [2, 32], strides = [1, 1]} : vector<2x128xf32> to vector<2x32xf32>
    %575 = vector.extract_strided_slice %572 {offsets = [0, 64], sizes = [2, 32], strides = [1, 1]} : vector<2x128xf32> to vector<2x32xf32>
    %576 = vector.extract_strided_slice %572 {offsets = [0, 96], sizes = [2, 32], strides = [1, 1]} : vector<2x128xf32> to vector<2x32xf32>
    %577 = arith.mulf %574, %563 : vector<2x32xf32>
    %578 = arith.mulf %573, %575 : vector<2x32xf32>
    %579 = arith.addf %577, %578 : vector<2x32xf32>
    %580 = math.tanh %579 : vector<2x32xf32>
    %581 = arith.mulf %576, %580 : vector<2x32xf32>
    %582 = vector.shape_cast %117 : vector<2x32xf32> to vector<2x1x32xf32>
    %583 = vector.shape_cast %149 : vector<2x32xf32> to vector<2x1x32xf32>
    %584 = vector.shape_cast %181 : vector<2x32xf32> to vector<2x1x32xf32>
    %585 = vector.shape_cast %213 : vector<2x32xf32> to vector<2x1x32xf32>
    %586 = vector.shape_cast %245 : vector<2x32xf32> to vector<2x1x32xf32>
    %587 = vector.shape_cast %277 : vector<2x32xf32> to vector<2x1x32xf32>
    %588 = vector.shape_cast %309 : vector<2x32xf32> to vector<2x1x32xf32>
    %589 = vector.shape_cast %341 : vector<2x32xf32> to vector<2x1x32xf32>
    %590 = vector.shape_cast %373 : vector<2x32xf32> to vector<2x1x32xf32>
    %591 = vector.shape_cast %405 : vector<2x32xf32> to vector<2x1x32xf32>
    %592 = vector.shape_cast %437 : vector<2x32xf32> to vector<2x1x32xf32>
    %593 = vector.shape_cast %469 : vector<2x32xf32> to vector<2x1x32xf32>
    %594 = vector.shape_cast %501 : vector<2x32xf32> to vector<2x1x32xf32>
    %595 = vector.shape_cast %533 : vector<2x32xf32> to vector<2x1x32xf32>
    %596 = vector.shape_cast %565 : vector<2x32xf32> to vector<2x1x32xf32>
    %597 = vector.shape_cast %581 : vector<2x32xf32> to vector<2x1x32xf32>
    %598 = tpu.concatenate %582, %583, %584, %585, %586, %587, %588, %589, %590, %591, %592, %593, %594, %595, %596, %597 in 1 : vector<2x1x32xf32>, vector<2x1x32xf32>, vector<2x1x32xf32>, vector<2x1x32xf32>, vector<2x1x32xf32>, vector<2x1x32xf32>, vector<2x1x32xf32>, vector<2x1x32xf32>, vector<2x1x32xf32>, vector<2x1x32xf32>, vector<2x1x32xf32>, vector<2x1x32xf32>, vector<2x1x32xf32>, vector<2x1x32xf32>, vector<2x1x32xf32>, vector<2x1x32xf32> -> vector<2x16x32xf32>
    %599 = vector.shape_cast %598 : vector<2x16x32xf32> to vector<32x32xf32>
    %c0_88 = arith.constant 0 : index
    %c0_89 = arith.constant 0 : index
    %600 = vector.load %arg14[%c0_88, %c0_89] : memref<32x96xf32, #tpu.memory_space<vmem>>, vector<32x96xf32>
    %cst_90 = arith.constant dense<0.000000e+00> : vector<32x96xf32>
    %601 = tpu.matmul %599, %600, %cst_90 {dimension_numbers = #tpu.dot_dimension_numbers<[1], [0], [0], [1], [0, 0, 1, 1], [], []>} : vector<32x32xf32>, vector<32x96xf32>, vector<32x96xf32> -> vector<32x96xf32>
    %c0_91 = arith.constant 0 : index
    %c0_92 = arith.constant 0 : index
    %602 = vector.load %arg15[%c0_91, %c0_92] : memref<1x96xf32, #tpu.memory_space<vmem>>, vector<1x96xf32>
    %603 = vector.broadcast %602 : vector<1x96xf32> to vector<32x96xf32>
    %604 = arith.addf %601, %603 : vector<32x96xf32>
    %605 = vector.shape_cast %604 : vector<32x96xf32> to vector<2x16x96xf32>
    %606 = vector.extract_strided_slice %605 {offsets = [0, 0, 0], sizes = [2, 16, 16], strides = [1, 1, 1]} : vector<2x16x96xf32> to vector<2x16x16xf32>
    %cst_93 = arith.constant 2.500000e-01 : f32
    %607 = vector.broadcast %cst_93 : f32 to vector<2x16x16xf32>
    %608 = arith.mulf %606, %607 : vector<2x16x16xf32>
    %609 = vector.extract_strided_slice %605 {offsets = [0, 0, 32], sizes = [2, 16, 16], strides = [1, 1, 1]} : vector<2x16x96xf32> to vector<2x16x16xf32>
    %610 = vector.extract_strided_slice %605 {offsets = [0, 0, 64], sizes = [2, 16, 16], strides = [1, 1, 1]} : vector<2x16x96xf32> to vector<2x16x16xf32>
    "tpu.trace_start"() <{level = 10 : i32, message = "bqd,bkd->bqk"}> : () -> ()
    %cst_94 = arith.constant dense<0.000000e+00> : vector<2x16x16xf32>
    %611 = tpu.matmul %608, %609, %cst_94 {dimension_numbers = #tpu.dot_dimension_numbers<[2], [2], [1], [1], [0, 0, 0, 1, 1, 1], [0], [0]>} : vector<2x16x16xf32>, vector<2x16x16xf32>, vector<2x16x16xf32> -> vector<2x16x16xf32>
    "tpu.trace_stop"() : () -> ()
    %cst_95 = arith.constant dense<0xFF800000> : vector<2x16xf32>
    %612 = vector.multi_reduction <maximumf>, %611, %cst_95 [2] : vector<2x16x16xf32> to vector<2x16xf32>
    %613 = vector.shape_cast %612 : vector<2x16xf32> to vector<2x16x1xf32>
    %614 = vector.broadcast %613 : vector<2x16x1xf32> to vector<2x16x16xf32>
    %615 = arith.subf %611, %614 : vector<2x16x16xf32>
    %616 = math.exp %615 : vector<2x16x16xf32>
    %cst_96 = arith.constant dense<0.000000e+00> : vector<2x16xf32>
    %617 = vector.multi_reduction <add>, %616, %cst_96 [2] : vector<2x16x16xf32> to vector<2x16xf32>
    %618 = vector.shape_cast %617 : vector<2x16xf32> to vector<2x16x1xf32>
    %619 = tpu.reciprocal %618 {approx = true} : vector<2x16x1xf32> -> vector<2x16x1xf32>
    %620 = vector.broadcast %619 : vector<2x16x1xf32> to vector<2x16x16xf32>
    %621 = arith.mulf %616, %620 : vector<2x16x16xf32>
    "tpu.trace_start"() <{level = 10 : i32, message = "bqk,bkd->bqd"}> : () -> ()
    %cst_97 = arith.constant dense<0.000000e+00> : vector<2x16x16xf32>
    %622 = tpu.matmul %621, %610, %cst_97 {dimension_numbers = #tpu.dot_dimension_numbers<[2], [1], [1], [2], [0, 0, 0, 1, 1, 2], [0], [0]>} : vector<2x16x16xf32>, vector<2x16x16xf32>, vector<2x16x16xf32> -> vector<2x16x16xf32>
    "tpu.trace_stop"() : () -> ()
    %623 = vector.extract_strided_slice %605 {offsets = [0, 0, 16], sizes = [2, 16, 16], strides = [1, 1, 1]} : vector<2x16x96xf32> to vector<2x16x16xf32>
    %cst_98 = arith.constant 2.500000e-01 : f32
    %624 = vector.broadcast %cst_98 : f32 to vector<2x16x16xf32>
    %625 = arith.mulf %623, %624 : vector<2x16x16xf32>
    %626 = vector.extract_strided_slice %605 {offsets = [0, 0, 48], sizes = [2, 16, 16], strides = [1, 1, 1]} : vector<2x16x96xf32> to vector<2x16x16xf32>
    %627 = vector.extract_strided_slice %605 {offsets = [0, 0, 80], sizes = [2, 16, 16], strides = [1, 1, 1]} : vector<2x16x96xf32> to vector<2x16x16xf32>
    "tpu.trace_start"() <{level = 10 : i32, message = "bqd,bkd->bqk"}> : () -> ()
    %cst_99 = arith.constant dense<0.000000e+00> : vector<2x16x16xf32>
    %628 = tpu.matmul %625, %626, %cst_99 {dimension_numbers = #tpu.dot_dimension_numbers<[2], [2], [1], [1], [0, 0, 0, 1, 1, 1], [0], [0]>} : vector<2x16x16xf32>, vector<2x16x16xf32>, vector<2x16x16xf32> -> vector<2x16x16xf32>
    "tpu.trace_stop"() : () -> ()
    %cst_100 = arith.constant dense<0xFF800000> : vector<2x16xf32>
    %629 = vector.multi_reduction <maximumf>, %628, %cst_100 [2] : vector<2x16x16xf32> to vector<2x16xf32>
    %630 = vector.shape_cast %629 : vector<2x16xf32> to vector<2x16x1xf32>
    %631 = vector.broadcast %630 : vector<2x16x1xf32> to vector<2x16x16xf32>
    %632 = arith.subf %628, %631 : vector<2x16x16xf32>
    %633 = math.exp %632 : vector<2x16x16xf32>
    %cst_101 = arith.constant dense<0.000000e+00> : vector<2x16xf32>
    %634 = vector.multi_reduction <add>, %633, %cst_101 [2] : vector<2x16x16xf32> to vector<2x16xf32>
    %635 = vector.shape_cast %634 : vector<2x16xf32> to vector<2x16x1xf32>
    %636 = tpu.reciprocal %635 {approx = true} : vector<2x16x1xf32> -> vector<2x16x1xf32>
    %637 = vector.broadcast %636 : vector<2x16x1xf32> to vector<2x16x16xf32>
    %638 = arith.mulf %633, %637 : vector<2x16x16xf32>
    "tpu.trace_start"() <{level = 10 : i32, message = "bqk,bkd->bqd"}> : () -> ()
    %cst_102 = arith.constant dense<0.000000e+00> : vector<2x16x16xf32>
    %639 = tpu.matmul %638, %627, %cst_102 {dimension_numbers = #tpu.dot_dimension_numbers<[2], [1], [1], [2], [0, 0, 0, 1, 1, 2], [0], [0]>} : vector<2x16x16xf32>, vector<2x16x16xf32>, vector<2x16x16xf32> -> vector<2x16x16xf32>
    "tpu.trace_stop"() : () -> ()
    %640 = tpu.concatenate %622, %639 in 2 : vector<2x16x16xf32>, vector<2x16x16xf32> -> vector<2x16x32xf32>
    %641 = vector.shape_cast %640 : vector<2x16x32xf32> to vector<32x32xf32>
    %c0_103 = arith.constant 0 : index
    %c0_104 = arith.constant 0 : index
    %642 = vector.load %arg16[%c0_103, %c0_104] : memref<32x32xf32, #tpu.memory_space<vmem>>, vector<32x32xf32>
    %cst_105 = arith.constant dense<0.000000e+00> : vector<32x32xf32>
    %643 = tpu.matmul %641, %642, %cst_105 {dimension_numbers = #tpu.dot_dimension_numbers<[1], [0], [0], [1], [0, 0, 1, 1], [], []>} : vector<32x32xf32>, vector<32x32xf32>, vector<32x32xf32> -> vector<32x32xf32>
    %c0_106 = arith.constant 0 : index
    %c0_107 = arith.constant 0 : index
    %644 = vector.load %arg17[%c0_106, %c0_107] : memref<1x32xf32, #tpu.memory_space<vmem>>, vector<1x32xf32>
    %645 = vector.broadcast %644 : vector<1x32xf32> to vector<32x32xf32>
    %646 = arith.addf %643, %645 : vector<32x32xf32>
    %647 = vector.shape_cast %646 : vector<32x32xf32> to vector<2x16x32xf32>
    %c0_108 = arith.constant 0 : index
    %c0_109 = arith.constant 0 : index
    %c0_110 = arith.constant 0 : index
    %648 = vector.load %arg21[%c0_108, %c0_109, %c0_110] : memref<2x16x32xf32, #tpu.memory_space<vmem>>, vector<2x16x32xf32>
    tpu.vector_store %arg21[%c0_108, %c0_109, %c0_110], %647 {strides = array<i32>} : memref<2x16x32xf32, #tpu.memory_space<vmem>>, vector<2x16x32xf32>,
    %c0_111 = arith.constant 0 : index
    %c0_112 = arith.constant 0 : index
    %649 = vector.load %arg18[%c0_111, %c0_112] : memref<32x128xf32, #tpu.memory_space<vmem>>, vector<32x128xf32>
    %cst_113 = arith.constant dense<0.000000e+00> : vector<32x128xf32>
    %650 = tpu.matmul %646, %649, %cst_113 {dimension_numbers = #tpu.dot_dimension_numbers<[1], [0], [0], [1], [0, 0, 1, 1], [], []>} : vector<32x32xf32>, vector<32x128xf32>, vector<32x128xf32> -> vector<32x128xf32>
    %c0_114 = arith.constant 0 : index
    %c0_115 = arith.constant 0 : index
    %651 = vector.load %arg19[%c0_114, %c0_115] : memref<1x128xf32, #tpu.memory_space<vmem>>, vector<1x128xf32>
    %652 = vector.broadcast %651 : vector<1x128xf32> to vector<32x128xf32>
    %653 = arith.addf %650, %652 : vector<32x128xf32>
    %654 = vector.shape_cast %653 : vector<32x128xf32> to vector<2x16x128xf32>
    %c0_116 = arith.constant 0 : index
    %c0_117 = arith.constant 0 : index
    %c0_118 = arith.constant 0 : index
    %655 = vector.load %arg20[%c0_116, %c0_117, %c0_118] : memref<2x16x128xf32, #tpu.memory_space<vmem>>, vector<2x16x128xf32>
    tpu.vector_store %arg20[%c0_116, %c0_117, %c0_118], %654 {strides = array<i32>} : memref<2x16x128xf32, #tpu.memory_space<vmem>>, vector<2x16x128xf32>,
    return
  }
  func.func @transform_0(%arg0: i32) -> (i32, i32, i32) {
    %c0_i32 = arith.constant 0 : i32
    %c0_i32_0 = arith.constant 0 : i32
    %c0_i32_1 = arith.constant 0 : i32
    return %arg0, %c0_i32, %c0_i32_0 : i32, i32, i32
  }
  func.func @transform_1(%arg0: i32) -> (i32, i32) {
    %c0_i32 = arith.constant 0 : i32
    %c0_i32_0 = arith.constant 0 : i32
    %c0_i32_1 = arith.constant 0 : i32
    return %c0_i32, %c0_i32_0 : i32, i32
  }
  func.func @transform_2(%arg0: i32) -> (i32, i32) {
    %c0_i32 = arith.constant 0 : i32
    %c0_i32_0 = arith.constant 0 : i32
    %c0_i32_1 = arith.constant 0 : i32
    return %c0_i32, %c0_i32_0 : i32, i32
  }
  func.func @transform_3(%arg0: i32) -> (i32, i32) {
    %c0_i32 = arith.constant 0 : i32
    %c0_i32_0 = arith.constant 0 : i32
    %c0_i32_1 = arith.constant 0 : i32
    return %c0_i32, %c0_i32_0 : i32, i32
  }
  func.func @transform_4(%arg0: i32) -> (i32, i32) {
    %c0_i32 = arith.constant 0 : i32
    %c0_i32_0 = arith.constant 0 : i32
    %c0_i32_1 = arith.constant 0 : i32
    return %c0_i32, %c0_i32_0 : i32, i32
  }
  func.func @transform_5(%arg0: i32) -> (i32, i32) {
    %c0_i32 = arith.constant 0 : i32
    %c0_i32_0 = arith.constant 0 : i32
    %c0_i32_1 = arith.constant 0 : i32
    return %c0_i32, %c0_i32_0 : i32, i32
  }
  func.func @transform_6(%arg0: i32) -> (i32, i32) {
    %c0_i32 = arith.constant 0 : i32
    %c0_i32_0 = arith.constant 0 : i32
    %c0_i32_1 = arith.constant 0 : i32
    return %c0_i32, %c0_i32_0 : i32, i32
  }
  func.func @transform_7(%arg0: i32) -> (i32, i32) {
    %c0_i32 = arith.constant 0 : i32
    %c0_i32_0 = arith.constant 0 : i32
    %c0_i32_1 = arith.constant 0 : i32
    return %c0_i32, %c0_i32_0 : i32, i32
  }
  func.func @transform_8(%arg0: i32) -> (i32, i32) {
    %c0_i32 = arith.constant 0 : i32
    %c0_i32_0 = arith.constant 0 : i32
    %c0_i32_1 = arith.constant 0 : i32
    return %c0_i32, %c0_i32_0 : i32, i32
  }
  func.func @transform_9(%arg0: i32) -> (i32, i32) {
    %c0_i32 = arith.constant 0 : i32
    %c0_i32_0 = arith.constant 0 : i32
    %c0_i32_1 = arith.constant 0 : i32
    return %c0_i32, %c0_i32_0 : i32, i32
  }
  func.func @transform_10(%arg0: i32) -> (i32, i32) {
    %c0_i32 = arith.constant 0 : i32
    %c0_i32_0 = arith.constant 0 : i32
    %c0_i32_1 = arith.constant 0 : i32
    return %c0_i32, %c0_i32_0 : i32, i32
  }
  func.func @transform_11(%arg0: i32) -> (i32, i32) {
    %c0_i32 = arith.constant 0 : i32
    %c0_i32_0 = arith.constant 0 : i32
    %c0_i32_1 = arith.constant 0 : i32
    return %c0_i32, %c0_i32_0 : i32, i32
  }
  func.func @transform_12(%arg0: i32) -> (i32, i32) {
    %c0_i32 = arith.constant 0 : i32
    %c0_i32_0 = arith.constant 0 : i32
    %c0_i32_1 = arith.constant 0 : i32
    return %c0_i32, %c0_i32_0 : i32, i32
  }
  func.func @transform_13(%arg0: i32) -> (i32, i32) {
    %c0_i32 = arith.constant 0 : i32
    %c0_i32_0 = arith.constant 0 : i32
    %c0_i32_1 = arith.constant 0 : i32
    return %c0_i32, %c0_i32_0 : i32, i32
  }
  func.func @transform_14(%arg0: i32) -> (i32, i32) {
    %c0_i32 = arith.constant 0 : i32
    %c0_i32_0 = arith.constant 0 : i32
    %c0_i32_1 = arith.constant 0 : i32
    return %c0_i32, %c0_i32_0 : i32, i32
  }
  func.func @transform_15(%arg0: i32) -> (i32, i32) {
    %c0_i32 = arith.constant 0 : i32
    %c0_i32_0 = arith.constant 0 : i32
    %c0_i32_1 = arith.constant 0 : i32
    return %c0_i32, %c0_i32_0 : i32, i32
  }
  func.func @transform_16(%arg0: i32) -> (i32, i32) {
    %c0_i32 = arith.constant 0 : i32
    %c0_i32_0 = arith.constant 0 : i32
    %c0_i32_1 = arith.constant 0 : i32
    return %c0_i32, %c0_i32_0 : i32, i32
  }
  func.func @transform_17(%arg0: i32) -> (i32, i32) {
    %c0_i32 = arith.constant 0 : i32
    %c0_i32_0 = arith.constant 0 : i32
    %c0_i32_1 = arith.constant 0 : i32
    return %c0_i32, %c0_i32_0 : i32, i32
  }
  func.func @transform_18(%arg0: i32) -> (i32, i32) {
    %c0_i32 = arith.constant 0 : i32
    %c0_i32_0 = arith.constant 0 : i32
    %c0_i32_1 = arith.constant 0 : i32
    return %c0_i32, %c0_i32_0 : i32, i32
  }
  func.func @transform_19(%arg0: i32) -> (i32, i32, i32) {
    %c0_i32 = arith.constant 0 : i32
    %c0_i32_0 = arith.constant 0 : i32
    %c0_i32_1 = arith.constant 0 : i32
    return %arg0, %c0_i32, %c0_i32_0 : i32, i32, i32
  }
  func.func @transform_20(%arg0: i32) -> (i32, i32, i32) {
    %c0_i32 = arith.constant 0 : i32
    %c0_i32_0 = arith.constant 0 : i32
    %c0_i32_1 = arith.constant 0 : i32
    return %arg0, %c0_i32, %c0_i32_0 : i32, i32, i32
  }
}

</mosaic_0001>

<bundles_post_ra>
// kernel: _lambda_.1
= control target key start
LH: loop header
LB: loop body
LE: loop exit
PB: predicated region body
PF: predicated region fallthrough
CT: control target
= control target key end

     0   :  { %s5618_s0 = inlined_call_operand.vmem [shape: f32[2,16,4], index: 0, kind: input, shape index: {}]   ;;  %s5619_s1 = inlined_call_operand.vmem [shape: f32[20,32], index: 1, kind: input, shape index: {}]   ;;  %s5620_s2 = inlined_call_operand.vmem [shape: f32[1,32], index: 2, kind: input, shape index: {}]   ;;  %s5621_s3 = inlined_call_operand.vmem [shape: f32[1,32], index: 3, kind: input, shape index: {}]   ;;  %s5622_s4 = inlined_call_operand.vmem [shape: f32[160,32], index: 4, kind: input, shape index: {}]   ;;  %s5623_s5 = inlined_call_operand.vmem [shape: f32[1,32], index: 5, kind: input, shape index: {}]   ;;  %s5624_s6 = inlined_call_operand.vmem [shape: f32[1,32], index: 6, kind: input, shape index: {}]   ;;  %s5625_s7 = inlined_call_operand.vmem [shape: f32[32,128], index: 7, kind: input, shape index: {}]   ;;  %s5626_s8 = inlined_call_operand.vmem [shape: f32[32,128], index: 8, kind: input, shape index: {}]   ;;  %s5627_s9 = inlined_call_operand.vmem [shape: f32[1,128], index: 9, kind: input, shape index: {}]   ;;  %s5628_s10 = inlined_call_operand.vmem [shape: f32[32,128], index: 10, kind: input, shape index: {}]   ;;  %s5629_s11 = inlined_call_operand.vmem [shape: f32[32,128], index: 11, kind: input, shape index: {}]   ;;  %s5630_s12 = inlined_call_operand.vmem [shape: f32[1,128], index: 12, kind: input, shape index: {}]   ;;  %s5631_s13 = inlined_call_operand.vmem [shape: f32[32,96], index: 13, kind: input, shape index: {}]   ;;  %s5632_s14 = inlined_call_operand.vmem [shape: f32[1,96], index: 14, kind: input, shape index: {}]   ;;  %s5633_s15 = inlined_call_operand.vmem [shape: f32[32,32], index: 15, kind: input, shape index: {}]   ;;  %s5634_s16 = inlined_call_operand.vmem [shape: f32[1,32], index: 16, kind: input, shape index: {}]   ;;  %s5635_s17 = inlined_call_operand.vmem [shape: f32[32,128], index: 17, kind: input, shape index: {}]   ;;  %s5636_s18 = inlined_call_operand.vmem [shape: f32[1,128], index: 18, kind: input, shape index: {}]   ;;  %s5637_s19 = inlined_call_operand.vmem [shape: f32[2,16,128], index: 19, kind: output, shape index: {0}]   ;;  %s5638_s20 = inlined_call_operand.hbm [shape: f32[2,16,32], index: 20, kind: output, shape index: {1}]  }
   0x1   :  { %5643 = sst [smem:[#allocation5_spill]] %s5618_s0 }
   0x2   :  { %5644 = sst [smem:[#allocation6_spill]] %s5619_s1 }
   0x3   :  { %5645 = sst [smem:[#allocation7_spill]] %s5620_s2 }
   0x4   :  { %5646 = sst [smem:[#allocation8_spill]] %s5621_s3 }
   0x5   :  { %5647 = sst [smem:[#allocation9_spill]] %s5622_s4 }
   0x6   :  { %s5648_s23 = sld [smem:[#allocation5_spill]]  ;;  %vm73_vm0 = vcmask 1041408   ;;  %vm94_vm1 = vcmask 1046528   ;;  %vm140_vm2 = vcmask 1044480   ;;  %s4025_s25 = smov 4  }
   0x7   :  { %s4026_s3 = smov 12  }
   0xc   :  { %v65_v0 = vld [vmem:[%s5648_s23] sm:$0xff]  ;;  %v66_v1 = vld [vmem:[%s5648_s23 + $0x8] sm:$0xff] }
   0xd   :  { %v74_v2 = vrot.slane %v65_v0, 6  ;;  %v75_v3 = vrot.slane %v66_v1, 6 }
   0xf   :  { %v4151_v4 = vsel %vm73_vm0, %v74_v2, %v75_v3  ;;  %v4154_v5 = vsel %vm73_vm0, 0.0, %v74_v2  ;;  %v88_v13 = vsel %vm73_vm0, %v75_v3, 0.0 }
  0x10   :  { %v95_v6 = vrot.slane %v4154_v5, 1  ;;  %v96_v7 = vrot.slane %v4151_v4, 1  ;;  %v141_v8 = vrot.slane %v4154_v5, 3  ;;  %v142_v9 = vrot.slane %v4151_v4, 3 }
  0x11   :  { %v118_v12 = vrot.slane %v4154_v5, 2  ;;  %v119_v14 = vrot.slane %v4151_v4, 2  ;;  %v98_v15 = vrot.slane %v88_v13, 1  ;;  %v164_v16 = vrot.slane %v4154_v5, 4 }
  0x12   :  { %v97_v10 = vsel %vm94_vm1, %v95_v6, %v96_v7  ;;  %v143_v11 = vsel %vm140_vm2, %v141_v8, %v142_v9  ;;  %v165_v17 = vrot.slane %v4151_v4, 4 }
  0x13   :  { %105 = vrot.lane.b32.xlu0 %v97_v10, %s4025_s25  ;;  %151 = vrot.lane.b32.xlu1 %v143_v11, %s4026_s3 }
  0x14   :  { %26 = vsyncpa [#allocation3], 0  ;;  %vm117_vm3 = vcmask 1045504   ;;  %vm163_vm4 = vcmask 1043456   ;;  %v99_v18 = vsel %vm94_vm1, %v96_v7, %v98_v15  ;;  %v67_v19 = vld [vmem:[%s5648_s23 + $0x10] sm:$0xff]  ;;  %v121_v20 = vrot.slane %v88_v13, 2 }
  0x15   :  { %107 = vrot.lane.b32.xlu2 %v99_v18, %s4025_s25  ;;  %v120_v21 = vsel %vm117_vm3, %v118_v12, %v119_v14  ;;  %v166_v22 = vsel %vm163_vm4, %v164_v16, %v165_v17  ;;  %v68_v23 = vld [vmem:[%s5648_s23 + $0x18] sm:$0xff]  ;;  %v77_v24 = vrot.slane %v67_v19, 6  ;;  %s5642_s29 = smov 8   ;;  %s4028_s30 = smov 16   ;;  %v144_v26 = vrot.slane %v88_v13, 3 }
  0x16   :  { %v122_v25 = vsel %vm117_vm3, %v119_v14, %v121_v20  ;;  %v167_v27 = vrot.slane %v88_v13, 4  ;;  %v78_v28 = vrot.slane %v68_v23, 6  ;;  %s5649_s1 = sld [smem:[#allocation6_spill]]  ;;  %vm186_vm5 = vcmask 31744   ;;  %s4029_s21 = smov 96  }
  0x17   :  { %v4183_v29 = vsel %vm73_vm0, 0.0, %v77_v24  ;;  %v145_v31 = vsel %vm140_vm2, %v142_v9, %v144_v26  ;;  %vm191_vm6 = vcmask 64512   ;;  %vm196_vm7 = vcmask 97280   ;;  %s5650_s26 = sld [smem:[#allocation9_spill]]  ;;  %s4031_s22 = smov 32  }
  0x18   :  { %v100_v30 = vrot.slane %v4183_v29, 1  ;;  %v168_v32 = vsel %vm163_vm4, %v165_v17, %v167_v27  ;;  %v4190_v33 = vsel %vm73_vm0, %v77_v24, %v78_v28  ;;  %v123_v36 = vrot.slane %v4183_v29, 2  ;;  %s5651_s24 = sld [smem:[#allocation7_spill]]  ;;  %s3604_s23 = sshll.u32 %s5638_s20, 4  ;;  %s3605_s23 = int_to_ptr.hbm [resolvable:$true] %s3604_s23 }
  0x19   :  { %v101_v34 = vrot.slane %v4190_v33, 1  ;;  %v124_v37 = vrot.slane %v4190_v33, 2  ;;  %v146_v38 = vrot.slane %v4183_v29, 3  ;;  %v147_v39 = vrot.slane %v4190_v33, 3  ;;  %s5653_s2 = smov 8  }
  0x1a   :  { %v169_v40 = vrot.slane %v4183_v29, 4  ;;  %v89_v43 = vsel %vm73_vm0, %v78_v28, 0.0  ;;  %v170_v44 = vrot.slane %v4190_v33, 4  ;;  %vm201_vm8 = vcmask 130048  }
  0x1b   :  { %128 = vrot.lane.b32.xlu0 %v120_v21, %s5642_s29  ;;  %174 = vrot.lane.b32.xlu1 %v166_v22, %s4028_s30  ;;  %v102_v35 = vsel %vm94_vm1, %v100_v30, %v101_v34  ;;  %v125_v41 = vsel %vm117_vm3, %v123_v36, %v124_v37  ;;  %v148_v42 = vsel %vm140_vm2, %v146_v38, %v147_v39  ;;  %v103_v46 = vrot.slane %v89_v43, 1 }
  0x1c   :  { %v171_v45 = vsel %vm163_vm4, %v169_v40, %v170_v44  ;;  %v126_v47 = vrot.slane %v89_v43, 2  ;;  %v149_v48 = vrot.slane %v89_v43, 3  ;;  %v172_v52 = vrot.slane %v89_v43, 4  ;;  %v208_v54 = vld [vmem:[%s5649_s1 + $0x10] sm:$0xf]  ;;  %v207_v55 = vld [vmem:[%s5649_s1 + $0x8] sm:$0xff] }
  0x1d   :  { %130 = vrot.lane.b32.xlu2 %v122_v25, %s5642_s29  ;;  %v104_v49 = vsel %vm94_vm1, %v101_v34, %v103_v46  ;;  %3618 = vmatpush.msk.msra.mxu0 %vm163_vm4, %v208_v54  ;;  %v206_v56 = vld [vmem:[%s5649_s1] sm:$0xff]  ;;  %vm209_vm9 = vcmask 162816   ;;  %v408_v25 = vld [vmem:[%s5650_s26 + $0x98] sm:$0xff]  ;;  %v407_v26 = vld [vmem:[%s5650_s26 + $0x90] sm:$0xff]  ;;  %vm374_vm10 = vcmask 261120   ;;  %s4030_s1 = smov 64  }
  0x1e   :  { %v127_v50 = vsel %vm117_vm3, %v124_v37, %v126_v47  ;;  %v150_v51 = vsel %vm140_vm2, %v147_v39, %v149_v48  ;;  %v173_v53 = vsel %vm163_vm4, %v170_v44, %v172_v52  ;;  %3713 = vmatpush.msra.mxu2 %v408_v25  ;;  %v406_v27 = vld [vmem:[%s5650_s26 + $0x88] sm:$0xff]  ;;  %v405_v28 = vld [vmem:[%s5650_s26 + $0x80] sm:$0xff]  ;;  %vm379_vm11 = vcmask 523264  }
  0x1f   :  { %239 = vmatpush.msra.mxu0 %v207_v55  ;;  %v404_v55 = vld [vmem:[%s5650_s26 + $0x78] sm:$0xff]  ;;  %vm384_vm12 = vcmask 785408  }
  0x20   :  { %3714 = vmatpush.msra.mxu2 %v407_v26  ;;  %417 = vmatpush.msra.mxu1 %v404_v55 }
  0x21   :  { %240 = vmatpush.msra.mxu0 %v206_v56 }
  0x22   :  { %3715 = vmatpush.msra.mxu2 %v406_v27 }
  0x23   :  { %153 = vrot.lane.b32.xlu0 %v145_v31, %s4026_s3  ;;  %176 = vrot.lane.b32.xlu1 %v168_v32, %s4028_s30 }
  0x24   :  { %458 = vmatpush.msrb.mxu0 %v408_v25  ;;  %3716 = vmatpush.msra.mxu2 %v405_v28 }
  0x25   :  { %109 = vrot.lane.b32.xlu2 %v102_v35, %s4025_s25 }
  0x26   :  { %459 = vmatpush.msrb.mxu0 %v407_v26 }
  0x28   :  { %460 = vmatpush.msrb.mxu0 %v406_v27 }
  0x2a   :  { %461 = vmatpush.msrb.mxu0 %v405_v28 }
  0x2b   :  { %132 = vrot.lane.b32.xlu0 %v125_v41, %s5642_s29  ;;  %155 = vrot.lane.b32.xlu1 %v148_v42, %s4026_s3 }
  0x2d   :  { %178 = vrot.lane.b32.xlu2 %v171_v45, %s4028_s30 }
  0x33   :  { %111 = vrot.lane.b32.xlu0 %v104_v49, %s4025_s25  ;;  %134 = vrot.lane.b32.xlu1 %v127_v50, %s5642_s29 }
  0x35   :  { %157 = vrot.lane.b32.xlu2 %v150_v51, %s4026_s3  ;;  %s5652_s3 = sld [smem:[#allocation8_spill]] }
  0x3b   :  { %180 = vrot.lane.b32.xlu0 %v173_v53, %s4028_s30  ;;  %v3752_v30 = vld [vmem:[%s5652_s3] ss:$0 sm:$0xff] }
  0x6f   :  { %v108_v57 = vpop.permute.xlu2 %107 }
  0x70   :  { %v188_v3 = vsel %vm186_vm5, %v4151_v4, %v108_v57 }
  0x77   :  { %v131_v60 = vpop.permute.xlu2 %130 }
  0x78   :  { %v193_v7 = vsel %vm191_vm6, %v188_v3, %v131_v60  ;;  %v403_v60 = vld [vmem:[%s5650_s26 + $0x70] sm:$0xff] }
  0x79   :  { %418 = vmatpush.msra.mxu1 %v403_v60 }
  0x7f   :  { %v110_v6 = vpop.permute.xlu2 %109 }
  0x80   :  { %v189_v11 = vsel %vm186_vm5, %v4183_v29, %v110_v6  ;;  %v3751_v29 = vld [vmem:[%s5651_s24] ss:$0 sm:$0xff]  ;;  %s4038_s24 = smov 128  }
  0x85   :  { %v106_v58 = vpop.permute.xlu0 %105  ;;  %v152_v59 = vpop.permute.xlu1 %151 }
  0x86   :  { %v187_v61 = vsel %vm186_vm5, %v4154_v5, %v106_v58 }
  0x87   :  { %v179_v12 = vpop.permute.xlu2 %178 }
  0x8d   :  { %v129_v62 = vpop.permute.xlu0 %128  ;;  %v175_v63 = vpop.permute.xlu1 %174 }
  0x8e   :  { %v192_v0 = vsel %vm191_vm6, %v187_v61, %v129_v62 }
  0x8f   :  { %v197_v1 = vsel %vm196_vm7, %v192_v0, %v152_v59  ;;  %v158_v21 = vpop.permute.xlu2 %157 }
  0x90   :  { %v202_v2 = vsel %vm201_vm8, %v197_v1, %v175_v63 }
  0x91   :  { %3619 = vmatmul.msk.f32.vlgmr.msra.gmra.mxu0 %vm209_vm9, %v202_v2 }
  0x95   :  { %v154_v8 = vpop.permute.xlu0 %153  ;;  %v177_v5 = vpop.permute.xlu1 %176 }
  0x96   :  { %v198_v9 = vsel %vm196_vm7, %v193_v7, %v154_v8 }
  0x97   :  { %v203_v10 = vsel %vm201_vm8, %v198_v9, %v177_v5 }
  0x99   :  { %3620 = vmatmul.msk.f32.gmra.mxu0 %vm209_vm9, %v203_v10 }
  0x9d   :  { %v133_v13 = vpop.permute.xlu0 %132  ;;  %v156_v14 = vpop.permute.xlu1 %155 }
  0x9e   :  { %v194_v15 = vsel %vm191_vm6, %v189_v11, %v133_v13 }
  0x9f   :  { %v199_v4 = vsel %vm196_vm7, %v194_v15, %v156_v14 }
  0xa0   :  { %v204_v16 = vsel %vm201_vm8, %v199_v4, %v179_v12 }
  0xa1   :  { %3621 = vmatmul.msk.f32.gmra.mxu0 %vm209_vm9, %v204_v16 }
  0xa5   :  { %v112_v17 = vpop.permute.xlu0 %111  ;;  %v135_v19 = vpop.permute.xlu1 %134 }
  0xa6   :  { %v190_v18 = vsel %vm186_vm5, %v4190_v33, %v112_v17  ;;  %vm639_vm5 = vcmask 1041409  }
  0xa7   :  { %v195_v20 = vsel %vm191_vm6, %v190_v18, %v135_v19  ;;  %vm2995_vm6 = vcmask 1040384  }
  0xa8   :  { %v200_v22 = vsel %vm196_vm7, %v195_v20, %v158_v21  ;;  %vm3000_vm7 = vcmask 1042432  }
  0xad   :  { %v181_v23 = vpop.permute.xlu0 %180 }
  0xae   :  { %v205_v24 = vsel %vm201_vm8, %v200_v22, %v181_v23 }
  0xaf   :  { %3622 = vmatmul.msk.f32.gmra.mxu0 %vm209_vm9, %v205_v24 }
 0x10e   :  { %v242_v31 = vpop.f32.mrf.mxu0 }
 0x10f   :  { %v258_v32 = vmul.f32 %v3751_v29, %v242_v31 }
 0x111   :  { %v266_v33 = vadd.f32 %v3752_v30, %v258_v32 }
 0x113   :  { %v270_v34 = vmax.f32 %v266_v33, 0.0 }
 0x115   :  { %v278_v36 = vrot.slane %v270_v34, 6 }
 0x116   :  { %v245_v35 = vpop.f32.mrf.mxu0 }
 0x117   :  { %v259_v37 = vmul.f32 %v3751_v29, %v245_v35  ;;  %v4271_v39 = vsel %vm73_vm0, 0.0, %v278_v36  ;;  %v402_v35 = vld [vmem:[%s5650_s26 + $0x68] sm:$0xff] }
 0x118   :  { %v342_v43 = vrot.slane %v4271_v39, 3  ;;  %v320_v46 = vrot.slane %v4271_v39, 2  ;;  %v364_v47 = vrot.slane %v4271_v39, 4  ;;  %v298_v53 = vrot.slane %v4271_v39, 1  ;;  %419 = vmatpush.msra.mxu1 %v402_v35 }
 0x119   :  { %v267_v38 = vadd.f32 %v3752_v30, %v259_v37  ;;  %v400_v37 = vld [vmem:[%s5650_s26 + $0x58] sm:$0xff] }
 0x11b   :  { %v271_v40 = vmax.f32 %v267_v38, 0.0  ;;  %v399_v38 = vld [vmem:[%s5650_s26 + $0x50] sm:$0xff] }
 0x11d   :  { %v279_v41 = vrot.slane %v271_v40, 6  ;;  %v398_v40 = vld [vmem:[%s5650_s26 + $0x48] sm:$0xff] }
 0x11e   :  { %v248_v42 = vpop.f32.mrf.mxu0 }
 0x11f   :  { %v4275_v44 = vsel %vm73_vm0, %v278_v36, %v279_v41  ;;  %v292_v45 = vsel %vm73_vm0, %v279_v41, 0.0  ;;  %v260_v52 = vmul.f32 %v3751_v29, %v248_v42  ;;  %v401_v36 = vld [vmem:[%s5650_s26 + $0x60] sm:$0xff]  ;;  %v396_v42 = vld [vmem:[%s5650_s26 + $0x38] sm:$0xff] }
 0x120   :  { %v365_v48 = vrot.slane %v4275_v44, 4  ;;  %v367_v49 = vrot.slane %v292_v45, 4  ;;  %v343_v50 = vrot.slane %v4275_v44, 3  ;;  %v321_v51 = vrot.slane %v4275_v44, 2  ;;  %420 = vmatpush.msra.mxu1 %v401_v36  ;;  %v397_v41 = vld [vmem:[%s5650_s26 + $0x40] sm:$0xff] }
 0x121   :  { %v299_v54 = vrot.slane %v4275_v44, 1  ;;  %v268_v62 = vadd.f32 %v3752_v30, %v260_v52  ;;  %v345_v63 = vrot.slane %v292_v45, 3  ;;  %v323_v0 = vrot.slane %v292_v45, 2 }
 0x122   :  { %v368_v56 = vsel %vm163_vm4, %v365_v48, %v367_v49  ;;  %v344_v57 = vsel %vm140_vm2, %v342_v43, %v343_v50  ;;  %v322_v58 = vsel %vm117_vm3, %v320_v46, %v321_v51  ;;  %v366_v59 = vsel %vm163_vm4, %v364_v47, %v365_v48  ;;  %421 = vmatpush.msra.mxu1 %v400_v37  ;;  %v395_v43 = vld [vmem:[%s5650_s26 + $0x30] sm:$0xff]  ;;  %v393_v46 = vld [vmem:[%s5650_s26 + $0x20] sm:$0xff]  ;;  %v392_v47 = vld [vmem:[%s5650_s26 + $0x18] sm:$0xff] }
 0x123   :  { %3624 = vmatmul.msk.f32.vlgmr.msra.gmra.mxu2 %vm374_vm10, %v368_v56  ;;  %352 = vrot.lane.b32.xlu0 %v344_v57, %s4029_s21  ;;  %v300_v61 = vsel %vm94_vm1, %v298_v53, %v299_v54  ;;  %v301_v1 = vrot.slane %v292_v45, 1  ;;  %v272_v2 = vmax.f32 %v268_v62, 0.0  ;;  %v346_v3 = vsel %vm140_vm2, %v343_v50, %v345_v63  ;;  %v394_v45 = vld [vmem:[%s5650_s26 + $0x28] sm:$0xff]  ;;  %v391_v48 = vld [vmem:[%s5650_s26 + $0x10] sm:$0xff]  ;;  %v389_v50 = vld [vmem:[%s5650_s26] sm:$0xff] }
 0x124   :  { %330 = vrot.lane.b32.xlu2 %v322_v58, %s4030_s1  ;;  %308 = vrot.lane.b32.xlu1 %v300_v61, %s4031_s22  ;;  %v324_v6 = vsel %vm117_vm3, %v321_v51, %v323_v0  ;;  %v390_v49 = vld [vmem:[%s5650_s26 + $0x8] sm:$0xff]  ;;  %v495_v36 = vlaneseq  ;;  %v3755_v37 = vld [vmem:[%s5627_s9] ss:$0 sm:$0xff] }
 0x125   :  { %3623 = vmatmul.msk.f32.vlgmr.msrb.gmra.mxu0 %vm374_vm10, %v366_v59  ;;  %v302_v7 = vsel %vm94_vm1, %v299_v54, %v301_v1  ;;  %v281_v5 = vrot.slane %v272_v2, 6  ;;  %422 = vmatpush.msra.mxu1 %v399_v38 }
 0x126   :  { %v496_v38 = vand.u32 127, %v495_v36 }
 0x127   :  { %v4308_v11 = vsel %vm73_vm0, 0.0, %v281_v5  ;;  %423 = vmatpush.msra.mxu1 %v398_v40 }
 0x128   :  { %v369_v14 = vrot.slane %v4308_v11, 4  ;;  %v347_v15 = vrot.slane %v4308_v11, 3  ;;  %v325_v17 = vrot.slane %v4308_v11, 2  ;;  %v303_v18 = vrot.slane %v4308_v11, 1 }
 0x129   :  { %424 = vmatpush.msra.mxu1 %v397_v41  ;;  %vm497_vm13 = vcmp.ge.s32.totalorder %v496_v38, 64  ;;  %vm498_vm14 = vcmp.lt.s32.totalorder %v496_v38, 96 }
 0x12a   :  { %vm499_vm15 = vmand %vm497_vm13, %vm498_vm14 }
 0x12b   :  { %354 = vrot.lane.b32.xlu0 %v346_v3, %s4029_s21  ;;  %425 = vmatpush.msra.mxu1 %v396_v42 }
 0x12c   :  { %332 = vrot.lane.b32.xlu2 %v324_v6, %s4030_s1  ;;  %310 = vrot.lane.b32.xlu1 %v302_v7, %s4031_s22  ;;  %v251_v8 = vpop.f32.mrf.mxu0  ;;  %v504_v6 = vld [vmem:[%s5625_s7 + $0x10] sm:$0xff]  ;;  %v503_v7 = vld [vmem:[%s5625_s7 + $0x8] sm:$0xff] }
 0x12d   :  { %v261_v9 = vmul.f32 %v3751_v29, %v251_v8  ;;  %426 = vmatpush.msra.mxu1 %v395_v43  ;;  %v502_v8 = vld [vmem:[%s5625_s7] sm:$0xff] }
 0x12f   :  { %v269_v10 = vadd.f32 %v3752_v30, %v261_v9  ;;  %427 = vmatpush.msra.mxu1 %v394_v45  ;;  %v4415_v9 = vld [vmem:[%s5626_s8 + $0x10] sm:$0xff]  ;;  %v4033_v45 = vmov 0.5  }
 0x131   :  { %v273_v12 = vmax.f32 %v269_v10, 0.0  ;;  %428 = vmatpush.msra.mxu1 %v393_v46  ;;  %v4422_v10 = vld [vmem:[%s5626_s8 + $0x8] sm:$0xff]  ;;  %v4465_v46 = vsel %vm499_vm15, 1.0, %v4033_v45 }
 0x133   :  { %v282_v13 = vrot.slane %v273_v12, 6  ;;  %429 = vmatpush.msra.mxu1 %v392_v47  ;;  %v4032_v12 = vmov 0.0  }
 0x135   :  { %v4313_v4 = vsel %vm73_vm0, %v281_v5, %v282_v13  ;;  %v293_v16 = vsel %vm73_vm0, %v282_v13, 0.0  ;;  %430 = vmatpush.msra.mxu1 %v391_v48  ;;  %v4410_v5 = vld [vmem:[%s5626_s8 + $0x18] sm:$0xff]  ;;  %v4443_v13 = vld [vmem:[%s5623_s5] ss:$0 sm:$0xff]  ;;  %v4467_v48 = vsel %vm499_vm15, 0.0, %v4033_v45 }
 0x136   :  { %v370_v19 = vrot.slane %v4313_v4, 4  ;;  %v348_v20 = vrot.slane %v4313_v4, 3  ;;  %v326_v21 = vrot.slane %v4313_v4, 2  ;;  %v304_v22 = vrot.slane %v4313_v4, 1  ;;  %582 = vmatpush.msra.mxu0 %v4410_v5  ;;  %657 = vmatpush.msrb.mxu2 %v4410_v5 }
 0x137   :  { %v306_v23 = vrot.slane %v293_v16, 1  ;;  %v350_v24 = vrot.slane %v293_v16, 3  ;;  %v328_v25 = vrot.slane %v293_v16, 2  ;;  %v372_v33 = vrot.slane %v293_v16, 4  ;;  %431 = vmatpush.msra.mxu1 %v390_v49 }
 0x138   :  { %v371_v26 = vsel %vm163_vm4, %v369_v14, %v370_v19  ;;  %v349_v27 = vsel %vm140_vm2, %v347_v15, %v348_v20  ;;  %v327_v28 = vsel %vm117_vm3, %v325_v17, %v326_v21  ;;  %v305_v29 = vsel %vm94_vm1, %v303_v18, %v304_v22  ;;  %583 = vmatpush.msra.mxu0 %v4415_v9  ;;  %v4448_v17 = vld [vmem:[%s5624_s6] ss:$0 sm:$0xff] }
 0x139   :  { %3625 = vmatmul.msk.f32.gmra.mxu2 %vm374_vm10, %v371_v26  ;;  %356 = vrot.lane.b32.xlu0 %v349_v27, %s4029_s21  ;;  %v4329_v30 = vsel %vm94_vm1, %v304_v22, %v306_v23  ;;  %v4332_v31 = vsel %vm140_vm2, %v348_v20, %v350_v24  ;;  %v4337_v32 = vsel %vm117_vm3, %v326_v21, %v328_v25 }
 0x13a   :  { %334 = vrot.lane.b32.xlu2 %v327_v28, %s4030_s1  ;;  %312 = vrot.lane.b32.xlu1 %v305_v29, %s4031_s22  ;;  %v373_v34 = vsel %vm163_vm4, %v370_v19, %v372_v33 }
 0x13b   :  { %432 = vmatpush.msra.mxu1 %v389_v50  ;;  %658 = vmatpush.msrb.mxu2 %v4415_v9 }
 0x13c   :  { %584 = vmatpush.msra.mxu0 %v4422_v10 }
 0x13d   :  { %659 = vmatpush.msrb.mxu2 %v4422_v10 }
 0x141   :  { %3626 = vmatmul.msk.f32.gmra.mxu2 %vm374_vm10, %v373_v34 }
 0x17e   :  { %v331_v51 = vpop.permute.xlu2 %330 }
 0x186   :  { %v333_v58 = vpop.permute.xlu2 %332 }
 0x194   :  { %v335_v0 = vpop.permute.xlu2 %334 }
 0x195   :  { %v353_v53 = vpop.permute.xlu0 %352 }
 0x196   :  { %v309_v52 = vpop.permute.xlu1 %308 }
 0x197   :  { %v375_v54 = vsel %vm374_vm10, %v4271_v39, %v309_v52 }
 0x198   :  { %v380_v55 = vsel %vm379_vm11, %v375_v54, %v331_v51 }
 0x199   :  { %v385_v56 = vsel %vm384_vm12, %v380_v55, %v353_v53 }
 0x19a   :  { %433 = vmatmul.f32.vlgmr.msra.gmra.mxu1 %v385_v56 }
 0x19d   :  { %v355_v60 = vpop.permute.xlu0 %354 }
 0x19e   :  { %v311_v57 = vpop.permute.xlu1 %310 }
 0x19f   :  { %v376_v59 = vsel %vm374_vm10, %v4275_v44, %v311_v57  ;;  %v505_v44 = vld [vmem:[%s5625_s7 + $0x18] sm:$0xff] }
 0x1a0   :  { %v381_v61 = vsel %vm379_vm11, %v376_v59, %v333_v58  ;;  %550 = vmatpush.msra.mxu3 %v505_v44 }
 0x1a1   :  { %v386_v62 = vsel %vm384_vm12, %v381_v61, %v355_v60 }
 0x1a2   :  { %436 = vmatmul.f32.gmra.mxu1 %v386_v62  ;;  %551 = vmatpush.msra.mxu3 %v504_v6  ;;  %v463_v14 = vpop.f32.mrf.mxu0 }
 0x1a4   :  { %552 = vmatpush.msra.mxu3 %v503_v7 }
 0x1a6   :  { %553 = vmatpush.msra.mxu3 %v502_v8  ;;  %v466_v21 = vpop.f32.mrf.mxu2 }
 0x1ab   :  { %v357_v1 = vpop.permute.xlu0 %356 }
 0x1ac   :  { %v313_v63 = vpop.permute.xlu1 %312 }
 0x1ad   :  { %v377_v39 = vsel %vm374_vm10, %v4308_v11, %v313_v63  ;;  %v4429_v11 = vld [vmem:[%s5626_s8] sm:$0xff] }
 0x1ae   :  { %v382_v2 = vsel %vm379_vm11, %v377_v39, %v335_v0  ;;  %585 = vmatpush.msra.mxu0 %v4429_v11  ;;  %660 = vmatpush.msrb.mxu2 %v4429_v11 }
 0x1af   :  { %v387_v3 = vsel %vm384_vm12, %v382_v2, %v357_v1  ;;  %586 = vmatmul.f32.vlgmr.msra.gmra.mxu0 %v4032_v12 }
 0x1b0   :  { %439 = vmatmul.f32.gmra.mxu1 %v387_v3  ;;  %798 = vmatpush.msra.mxu2 %v4410_v5 }
 0x1b2   :  { %799 = vmatpush.msra.mxu2 %v4415_v9 }
 0x1b4   :  { %800 = vmatpush.msra.mxu2 %v4422_v10 }
 0x1b6   :  { %801 = vmatpush.msra.mxu2 %v4429_v11 }
 0x1bc   :  { %v469_v27 = vpop.f32.mrf.mxu2 }
 0x217   :  { %v434_v15 = vpop.f32.mrf.mxu1 }
 0x218   :  { %v464_v16 = vadd.f32 %v463_v14, %v434_v15 }
 0x21a   :  { %v479_v18 = vmul.f32 %v4443_v13, %v464_v16 }
 0x21c   :  { %v487_v19 = vadd.f32 %v4448_v17, %v479_v18 }
 0x21e   :  { %v491_v20 = vmax.f32 %v487_v19, 0.0 }
 0x21f   :  { %v437_v22 = vpop.f32.mrf.mxu1 }
 0x220   :  { %v467_v23 = vadd.f32 %v466_v21, %v437_v22  ;;  %3627 = vmatmul.msk.f32.vlgmr.msra.gmra.mxu3 %vm374_vm10, %v491_v20  ;;  %v4510_v22 = vld [vmem:[%s5629_s11 + $0x10] sm:$0xff] }
 0x222   :  { %v480_v24 = vmul.f32 %v4443_v13, %v467_v23  ;;  %v4516_v23 = vld [vmem:[%s5628_s10 + $0x18] sm:$0xff] }
 0x223   :  { %749 = vmatpush.msrb.mxu0 %v4516_v23 }
 0x224   :  { %v488_v25 = vadd.f32 %v4448_v17, %v480_v24  ;;  %v4522_v24 = vld [vmem:[%s5629_s11 + $0x8] sm:$0xff] }
 0x226   :  { %v492_v26 = vmax.f32 %v488_v25, 0.0  ;;  %v4530_v25 = vld [vmem:[%s5629_s11] sm:$0xff] }
 0x228   :  { %3628 = vmatmul.msk.f32.gmra.mxu3 %vm374_vm10, %v492_v26  ;;  %v4539_v26 = vld [vmem:[%s5628_s10 + $0x10] sm:$0xff] }
 0x229   :  { %750 = vmatpush.msrb.mxu0 %v4539_v26 }
 0x22c   :  { %v587_v41 = vpop.f32.mrf.mxu0 }
 0x22d   :  { %v440_v28 = vpop.f32.mrf.mxu1  ;;  %v591_v52 = vrot.slane %v587_v41, 1 }
 0x22e   :  { %v470_v29 = vadd.f32 %v469_v27, %v440_v28  ;;  %v4544_v27 = vld [vmem:[%s5628_s10 + $0x8] sm:$0xff]  ;;  %v4552_v28 = vld [vmem:[%s5628_s10] sm:$0xff] }
 0x22f   :  { %751 = vmatpush.msrb.mxu0 %v4544_v27 }
 0x230   :  { %v481_v33 = vmul.f32 %v4443_v13, %v470_v29  ;;  %v472_v29 = vpop.f32.mrf.mxu2 }
 0x231   :  { %752 = vmatpush.msrb.mxu0 %v4552_v28 }
 0x232   :  { %v489_v34 = vadd.f32 %v4448_v17, %v481_v33 }
 0x233   :  { %896 = vmatpush.msra.mxu0 %v4516_v23 }
 0x234   :  { %v493_v35 = vmax.f32 %v489_v34, 0.0 }
 0x235   :  { %897 = vmatpush.msra.mxu0 %v4539_v26 }
 0x236   :  { %3629 = vmatmul.msk.f32.gmra.mxu3 %vm374_vm10, %v493_v35 }
 0x237   :  { %898 = vmatpush.msra.mxu0 %v4544_v27 }
 0x239   :  { %899 = vmatpush.msra.mxu0 %v4552_v28 }
 0x2a3   :  { %v555_v40 = vpop.f32.mrf.mxu3 }
 0x2a4   :  { %v4462_v42 = vadd.f32 %v3755_v37, %v555_v40  ;;  %v4589_v40 = vld [vmem:[%s5630_s12] ss:$0 sm:$0xff] }
 0x2a6   :  { %v594_v43 = vadd.f32 %v587_v41, %v4462_v42 }
 0x2a8   :  { %3760 = vtanh.f32 %v594_v43 }
 0x2ab   :  { %v4470_v50 = vpop.f32.mrf.mxu3 }
 0x2ae   :  { %v3761_v47 = vpop.eup %3760 }
 0x2af   :  { %v598_v49 = vmul.f32 %v3761_v47, %v4465_v46 }
 0x2b1   :  { %v600_v51 = vadd.f32 %v598_v49, %v4467_v48 }
 0x2b3   :  { %606 = vrot.lane.b32.xlu2 %v600_v51, %s4030_s1 }
 0x2b9   :  { %v561_v53 = vpop.f32.mrf.mxu3 }
 0x2ba   :  { %v4474_v54 = vadd.f32 %v3755_v37, %v561_v53 }
 0x2bb   :  { %314 = vrot.lane.b32.xlu2 %v4329_v30, %s4031_s22  ;;  %v602_v30 = vmul.f32 0.0, %v600_v51 }
 0x2bc   :  { %v595_v55 = vadd.f32 %v591_v52, %v4474_v54 }
 0x2be   :  { %3762 = vtanh.f32 %v595_v55 }
 0x2c4   :  { %v3763_v56 = vpop.eup %3762 }
 0x2c5   :  { %v599_v57 = vmul.f32 %v3763_v56, %v4465_v46 }
 0x2c7   :  { %v601_v58 = vadd.f32 %v599_v57, %v4467_v48 }
 0x2c9   :  { %608 = vrot.lane.b32.xlu1 %v601_v58, %s4030_s1  ;;  %v603_v1 = vmul.f32 0.0, %v601_v58 }
 0x30d   :  { %v607_v59 = vpop.permute.xlu2 %606 }
 0x30e   :  { %v612_v60 = vmul.f32 %v607_v59, %v600_v51 }
 0x310   :  { %616 = vrot.lane.b32.xlu1 %v612_v60, %s4031_s22 }
 0x318   :  { %358 = vrot.lane.b32.xlu1 %v4332_v31, %s4029_s21  ;;  %v315_v31 = vpop.permute.xlu2 %314 }
 0x319   :  { %v378_v44 = vsel %vm374_vm10, %v4313_v4, %v315_v31  ;;  %v4505_v4 = vld [vmem:[%s5629_s11 + $0x18] sm:$0xff] }
 0x31a   :  { %729 = vmatpush.msrb.mxu3 %v4505_v4  ;;  %1320 = vmatpush.msrb.mxu1 %v4505_v4 }
 0x31c   :  { %730 = vmatpush.msrb.mxu3 %v4510_v22  ;;  %1321 = vmatpush.msrb.mxu1 %v4510_v22 }
 0x31e   :  { %731 = vmatpush.msrb.mxu3 %v4522_v24  ;;  %1322 = vmatpush.msrb.mxu1 %v4522_v24 }
 0x320   :  { %732 = vmatpush.msrb.mxu3 %v4530_v25  ;;  %1323 = vmatpush.msrb.mxu1 %v4530_v25 }
 0x322   :  { %876 = vmatpush.msra.mxu3 %v4505_v4  ;;  %1488 = vmatpush.msra.mxu1 %v4516_v23 }
 0x324   :  { %877 = vmatpush.msra.mxu3 %v4510_v22  ;;  %1489 = vmatpush.msra.mxu1 %v4539_v26 }
 0x326   :  { %878 = vmatpush.msra.mxu3 %v4522_v24  ;;  %1490 = vmatpush.msra.mxu1 %v4544_v27 }
 0x328   :  { %879 = vmatpush.msra.mxu3 %v4530_v25  ;;  %1491 = vmatpush.msra.mxu1 %v4552_v28 }
 0x33b   :  { %v609_v61 = vpop.permute.xlu1 %608 }
 0x33c   :  { %v613_v62 = vmul.f32 %v609_v61, %v601_v58 }
 0x33e   :  { %618 = vrot.lane.b32.xlu0 %v613_v62, %s4031_s22 }
 0x346   :  { %336 = vrot.lane.b32.xlu0 %v4337_v32, %s4030_s1 }
 0x382   :  { %v617_v63 = vpop.permute.xlu1 %616 }
 0x383   :  { %v4488_v0 = vadd.f32 %v617_v63, %v602_v30 }
 0x385   :  { %3764 = vtanh.f32 %v4488_v0 }
 0x38a   :  { %v359_v7 = vpop.permute.xlu1 %358 }
 0x38b   :  { %v3765_v39 = vpop.eup %3764 }
 0x38c   :  { %628 = vrot.lane.b32.xlu0 %v3765_v39, %s4030_s1 }
 0x3b0   :  { %v619_v2 = vpop.permute.xlu0 %618 }
 0x3b1   :  { %v4492_v3 = vadd.f32 %v619_v2, %v603_v1 }
 0x3b3   :  { %3766 = vtanh.f32 %v4492_v3  ;;  %v680_v31 = vrot.slane %v4492_v3, 7 }
 0x3b8   :  { %v337_v32 = vpop.permute.xlu0 %336 }
 0x3b9   :  { %v3767_v6 = vpop.eup %3766  ;;  %v383_v8 = vsel %vm379_vm11, %v378_v44, %v337_v32  ;;  %v679_v44 = vrot.slane %v4488_v0, 7 }
 0x3ba   :  { %630 = vrot.lane.b32.xlu2 %v3767_v6, %s4030_s1  ;;  %v388_v14 = vsel %vm384_vm12, %v383_v8, %v359_v7 }
 0x3bb   :  { %442 = vmatmul.f32.gmra.mxu1 %v388_v14 }
 0x3fe   :  { %v629_v15 = vpop.permute.xlu0 %628 }
 0x3ff   :  { %v634_v19 = vmul.f32 %v629_v15, %v600_v51 }
 0x414   :  { %v631_v16 = vpop.permute.xlu2 %630 }
 0x415   :  { %v635_v18 = vmul.f32 %v631_v16, %v601_v58 }
 0x417   :  { %v638_v20 = vrot.slane %v635_v18, 7 }
 0x419   :  { %v640_v21 = vsel %vm639_vm5, %v638_v20, %v634_v19 }
 0x41a   :  { %641 = vrot.lane.b32.xlu1 %v640_v21, %s4031_s22 }
 0x438   :  { %v443_v33 = vpop.f32.mrf.mxu1 }
 0x439   :  { %v473_v34 = vadd.f32 %v472_v29, %v443_v33 }
 0x43b   :  { %v482_v35 = vmul.f32 %v4443_v13, %v473_v34 }
 0x43d   :  { %v490_v36 = vadd.f32 %v4448_v17, %v482_v35 }
 0x43f   :  { %v494_v37 = vmax.f32 %v490_v36, 0.0 }
 0x441   :  { %3630 = vmatmul.msk.f32.gmra.mxu3 %vm374_vm10, %v494_v37 }
 0x449   :  { %733 = vmatmul.f32.vlgmr.msrb.gmra.mxu3 %v4032_v12 }
 0x44a   :  { %1024 = vmatpush.msrb.mxu3 %v4505_v4 }
 0x44c   :  { %1025 = vmatpush.msrb.mxu3 %v4510_v22 }
 0x44e   :  { %1026 = vmatpush.msrb.mxu3 %v4522_v24 }
 0x450   :  { %1027 = vmatpush.msrb.mxu3 %v4530_v25 }
 0x48c   :  { %v642_v38 = vpop.permute.xlu1 %641 }
 0x48d   :  { %3631 = vmatmul.msk.f32.vlgmr.msrb.gmra.mxu2 %vm374_vm10, %v642_v38  ;;  %3632 = vmatmul.msk.f32.vlgmr.msrb.gmra.mxu0 %vm374_vm10, %v642_v38 }
 0x48e   :  { %946 = vmatpush.msrb.mxu2 %v4410_v5  ;;  %1044 = vmatpush.msrb.mxu0 %v4516_v23 }
 0x490   :  { %947 = vmatpush.msrb.mxu2 %v4415_v9  ;;  %1045 = vmatpush.msrb.mxu0 %v4539_v26 }
 0x492   :  { %948 = vmatpush.msrb.mxu2 %v4422_v10  ;;  %1046 = vmatpush.msrb.mxu0 %v4544_v27 }
 0x494   :  { %949 = vmatpush.msrb.mxu2 %v4429_v11  ;;  %1047 = vmatpush.msrb.mxu0 %v4552_v28 }
 0x4c4   :  { %v4584_v12 = vpop.f32.mrf.mxu3 }
 0x4cc   :  { %v734_v13 = vpop.f32.mrf.mxu3 }
 0x50a   :  { %v754_v17 = vpop.f32.mrf.mxu0 }
 0x50b   :  { %v755_v41 = vadd.f32 %v754_v17, %v734_v13 }
 0x50d   :  { %v757_v49 = vadd.f32 %v4589_v40, %v755_v41 }
 0x510   :  { %v662_v43 = vpop.f32.mrf.mxu2 }
 0x511   :  { %v666_v45 = vrot.slane %v662_v43, 7  ;;  %v670_v47 = vadd.f32 %v662_v43, %v4474_v54 }
 0x513   :  { %v669_v51 = vadd.f32 %v666_v45, %v4462_v42  ;;  %3768 = vtanh.f32 %v670_v47 }
 0x515   :  { %3770 = vtanh.f32 %v669_v51 }
 0x516   :  { %3772 = vtanh.f32 %v757_v49 }
 0x519   :  { %v3769_v52 = vpop.eup %3768 }
 0x51a   :  { %v674_v53 = vmul.f32 %v3769_v52, %v4465_v46 }
 0x51b   :  { %v3771_v55 = vpop.eup %3770 }
 0x51c   :  { %v676_v56 = vadd.f32 %v674_v53, %v4467_v48  ;;  %v673_v57 = vmul.f32 %v3771_v55, %v4465_v46  ;;  %v3773_v58 = vpop.eup %3772 }
 0x51d   :  { %v759_v60 = vmul.f32 %v3773_v58, %v4465_v46 }
 0x51e   :  { %689 = vrot.lane.b32.xlu0 %v676_v56, %s4030_s1  ;;  %v675_v59 = vadd.f32 %v673_v57, %v4467_v48  ;;  %v684_v32 = vmul.f32 %v680_v31, %v676_v56 }
 0x51f   :  { %v760_v61 = vadd.f32 %v759_v60, %v4467_v48 }
 0x520   :  { %687 = vrot.lane.b32.xlu2 %v675_v59, %s4030_s1  ;;  %v683_v8 = vmul.f32 %v679_v44, %v675_v59 }
 0x521   :  { %v761_v3 = vmul.f32 0.0, %v760_v61 }
 0x526   :  { %763 = vrot.lane.b32.xlu0 %v760_v61, %s4030_s1 }
 0x57a   :  { %v688_v62 = vpop.permute.xlu2 %687 }
 0x57b   :  { %v693_v30 = vmul.f32 %v688_v62, %v675_v59 }
 0x57d   :  { %697 = vrot.lane.b32.xlu1 %v693_v30, %s4031_s22 }
 0x590   :  { %v690_v63 = vpop.permute.xlu0 %689 }
 0x591   :  { %v694_v39 = vmul.f32 %v690_v63, %v676_v56 }
 0x593   :  { %699 = vrot.lane.b32.xlu2 %v694_v39, %s4031_s22 }
 0x598   :  { %v764_v1 = vpop.permute.xlu0 %763 }
 0x599   :  { %v766_v2 = vmul.f32 %v764_v1, %v760_v61 }
 0x59b   :  { %768 = vrot.lane.b32.xlu0 %v766_v2, %s4031_s22 }
 0x5ed   :  { %v700_v6 = vpop.permute.xlu2 %699 }
 0x5ee   :  { %v4608_v7 = vadd.f32 %v700_v6, %v684_v32 }
 0x5ef   :  { %v698_v14 = vpop.permute.xlu1 %697 }
 0x5f0   :  { %3774 = vtanh.f32 %v4608_v7  ;;  %v4611_v15 = vadd.f32 %v698_v14, %v683_v8  ;;  %v822_v6 = vrot.slane %v4608_v7, 7 }
 0x5f2   :  { %3776 = vtanh.f32 %v4611_v15  ;;  %v821_v7 = vrot.slane %v4611_v15, 7 }
 0x5f6   :  { %v3775_v16 = vpop.eup %3774 }
 0x5f7   :  { %711 = vrot.lane.b32.xlu2 %v3775_v16, %s4030_s1 }
 0x5f8   :  { %v3777_v18 = vpop.eup %3776 }
 0x5f9   :  { %709 = vrot.lane.b32.xlu1 %v3777_v18, %s4030_s1 }
 0x60d   :  { %v769_v0 = vpop.permute.xlu0 %768 }
 0x60e   :  { %v4616_v19 = vadd.f32 %v769_v0, %v761_v3 }
 0x610   :  { %3778 = vtanh.f32 %v4616_v19 }
 0x616   :  { %v3779_v20 = vpop.eup %3778 }
 0x617   :  { %774 = vrot.lane.b32.xlu2 %v3779_v20, %s4030_s1 }
 0x651   :  { %v712_v21 = vpop.permute.xlu2 %711 }
 0x652   :  { %v716_v34 = vmul.f32 %v712_v21, %v676_v56 }
 0x66b   :  { %v710_v29 = vpop.permute.xlu1 %709 }
 0x66c   :  { %v715_v33 = vmul.f32 %v710_v29, %v675_v59 }
 0x66e   :  { %v780_v35 = vrot.slane %v715_v33, 1 }
 0x670   :  { %v781_v36 = vsel %vm639_vm5, %v716_v34, %v780_v35 }
 0x671   :  { %v775_v37 = vpop.permute.xlu2 %774  ;;  %782 = vrot.lane.b32.xlu1 %v781_v36, %s4031_s22 }
 0x672   :  { %v4622_v38 = vmul.f32 %v775_v37, %v760_v61 }
 0x674   :  { %860 = vrot.lane.b32.xlu0 %v4622_v38, %s4031_s22 }
 0x6e3   :  { %v783_v13 = vpop.permute.xlu1 %782 }
 0x6e4   :  { %3633 = vmatmul.msk.f32.vlgmr.msra.gmra.mxu2 %vm374_vm10, %v783_v13  ;;  %3635 = vmatmul.msk.f32.vlgmr.msra.gmra.mxu0 %vm374_vm10, %v783_v13 }
 0x6e5   :  { %1172 = vmatpush.msra.mxu2 %v4505_v4  ;;  %1242 = vmatpush.msra.mxu0 %v4410_v5 }
 0x6e6   :  { %v861_v17 = vpop.permute.xlu0 %860 }
 0x6e7   :  { %3634 = vmatmul.msk.f32.vlgmr.msra.gmra.mxu3 %vm374_vm10, %v861_v17  ;;  %1173 = vmatpush.msra.mxu2 %v4510_v22 }
 0x6e8   :  { %1094 = vmatpush.msra.mxu3 %v4410_v5  ;;  %1243 = vmatpush.msra.mxu0 %v4415_v9 }
 0x6e9   :  { %1174 = vmatpush.msra.mxu2 %v4522_v24 }
 0x6ea   :  { %1095 = vmatpush.msra.mxu3 %v4415_v9  ;;  %1244 = vmatpush.msra.mxu0 %v4422_v10 }
 0x6eb   :  { %1175 = vmatpush.msra.mxu2 %v4530_v25 }
 0x6ec   :  { %1096 = vmatpush.msra.mxu3 %v4422_v10  ;;  %1245 = vmatpush.msra.mxu0 %v4429_v11 }
 0x6ee   :  { %1097 = vmatpush.msra.mxu3 %v4429_v11 }
 0x761   :  { %v901_v47 = vpop.f32.mrf.mxu0 }
 0x767   :  { %v803_v41 = vpop.f32.mrf.mxu2 }
 0x768   :  { %v807_v43 = vrot.slane %v803_v41, 6  ;;  %v808_v45 = vrot.slane %v803_v41, 7 }
 0x76a   :  { %v811_v49 = vadd.f32 %v807_v43, %v4462_v42  ;;  %v812_v51 = vadd.f32 %v808_v45, %v4474_v54  ;;  %v881_v52 = vpop.f32.mrf.mxu3 }
 0x76b   :  { %v902_v53 = vadd.f32 %v901_v47, %v881_v52 }
 0x76c   :  { %3780 = vtanh.f32 %v811_v49 }
 0x76d   :  { %3782 = vtanh.f32 %v812_v51  ;;  %v904_v55 = vadd.f32 %v4589_v40, %v902_v53 }
 0x76f   :  { %3784 = vtanh.f32 %v904_v55 }
 0x772   :  { %v3781_v56 = vpop.eup %3780 }
 0x773   :  { %v3783_v57 = vpop.eup %3782  ;;  %v815_v58 = vmul.f32 %v3781_v56, %v4465_v46 }
 0x774   :  { %v816_v59 = vmul.f32 %v3783_v57, %v4465_v46 }
 0x775   :  { %v817_v60 = vadd.f32 %v815_v58, %v4467_v48  ;;  %v3785_v62 = vpop.eup %3784 }
 0x776   :  { %v818_v61 = vadd.f32 %v816_v59, %v4467_v48  ;;  %v906_v30 = vmul.f32 %v3785_v62, %v4465_v46 }
 0x777   :  { %829 = vrot.lane.b32.xlu1 %v817_v60, %s4030_s1  ;;  %v825_v29 = vmul.f32 %v821_v7, %v817_v60 }
 0x778   :  { %831 = vrot.lane.b32.xlu2 %v818_v61, %s4030_s1  ;;  %v907_v63 = vadd.f32 %v906_v30, %v4467_v48  ;;  %v826_v8 = vmul.f32 %v822_v6, %v818_v61 }
 0x77a   :  { %v908_v3 = vmul.f32 %v907_v63, %v4616_v19 }
 0x780   :  { %910 = vrot.lane.b32.xlu2 %v907_v63, %s4030_s1 }
 0x7d2   :  { %v832_v39 = vpop.permute.xlu2 %831 }
 0x7d3   :  { %v836_v1 = vmul.f32 %v832_v39, %v818_v61 }
 0x7d5   :  { %841 = vrot.lane.b32.xlu1 %v836_v1, %s4031_s22 }
 0x7da   :  { %v911_v2 = vpop.permute.xlu2 %910 }
 0x7db   :  { %v913_v31 = vmul.f32 %v911_v2, %v907_v63 }
 0x7dd   :  { %915 = vrot.lane.b32.xlu2 %v913_v31, %s4031_s22 }
 0x7e9   :  { %v830_v44 = vpop.permute.xlu1 %829 }
 0x7ea   :  { %v835_v32 = vmul.f32 %v830_v44, %v817_v60 }
 0x7ec   :  { %839 = vrot.lane.b32.xlu0 %v835_v32, %s4031_s22 }
 0x837   :  { %v916_v18 = vpop.permute.xlu2 %915 }
 0x838   :  { %v4661_v0 = vadd.f32 %v916_v18, %v908_v3 }
 0x847   :  { %v842_v14 = vpop.permute.xlu1 %841 }
 0x848   :  { %v4657_v16 = vadd.f32 %v842_v14, %v826_v8 }
 0x84a   :  { %3786 = vtanh.f32 %v4657_v16 }
 0x84b   :  { %3788 = vtanh.f32 %v4661_v0 }
 0x850   :  { %v3787_v20 = vpop.eup %3786 }
 0x851   :  { %853 = vrot.lane.b32.xlu1 %v3787_v20, %s4030_s1  ;;  %v3789_v21 = vpop.eup %3788 }
 0x859   :  { %921 = vrot.lane.b32.xlu1 %v3789_v21, %s4030_s1 }
 0x85e   :  { %v840_v33 = vpop.permute.xlu0 %839 }
 0x85f   :  { %v4667_v34 = vadd.f32 %v840_v33, %v825_v29 }
 0x861   :  { %3790 = vtanh.f32 %v4667_v34  ;;  %v969_v20 = vrot.slane %v4667_v34, 7 }
 0x867   :  { %v3791_v35 = vpop.eup %3790 }
 0x868   :  { %851 = vrot.lane.b32.xlu0 %v3791_v35, %s4030_s1  ;;  %v970_v35 = vrot.slane %v4657_v16, 7 }
 0x8c3   :  { %v854_v19 = vpop.permute.xlu1 %853 }
 0x8c4   :  { %v858_v13 = vmul.f32 %v854_v19, %v818_v61 }
 0x8c6   :  { %v928_v15 = vrot.slane %v858_v13, 1 }
 0x8cb   :  { %v922_v36 = vpop.permute.xlu1 %921 }
 0x8cc   :  { %v4671_v37 = vmul.f32 %v922_v36, %v907_v63 }
 0x8ce   :  { %1008 = vrot.lane.b32.xlu2 %v4671_v37, %s4031_s22 }
 0x8da   :  { %v852_v17 = vpop.permute.xlu0 %851 }
 0x8db   :  { %v857_v41 = vmul.f32 %v852_v17, %v817_v60 }
 0x8dd   :  { %v927_v43 = vrot.slane %v857_v41, 2 }
 0x8df   :  { %v929_v45 = vsel %vm639_vm5, %v928_v15, %v927_v43 }
 0x8e0   :  { %930 = vrot.lane.b32.xlu0 %v929_v45, %s4031_s22 }
 0x928   :  { %v1009_v47 = vpop.permute.xlu2 %1008 }
 0x929   :  { %3637 = vmatmul.msk.f32.vlgmr.msrb.gmra.mxu3 %vm374_vm10, %v1009_v47 }
 0x92a   :  { %1192 = vmatpush.msrb.mxu3 %v4516_v23 }
 0x92c   :  { %1193 = vmatpush.msrb.mxu3 %v4539_v26 }
 0x92e   :  { %1194 = vmatpush.msrb.mxu3 %v4544_v27 }
 0x930   :  { %1195 = vmatpush.msrb.mxu3 %v4552_v28 }
 0x952   :  { %v931_v49 = vpop.permute.xlu0 %930 }
 0x953   :  { %3636 = vmatmul.msk.f32.vlgmr.msrb.gmra.mxu2 %vm374_vm10, %v931_v49  ;;  %3638 = vmatmul.msk.f32.vlgmr.msrb.gmra.mxu0 %vm374_vm10, %v931_v49 }
 0x954   :  { %1340 = vmatpush.msrb.mxu2 %v4516_v23  ;;  %1468 = vmatpush.msrb.mxu0 %v4505_v4 }
 0x956   :  { %1341 = vmatpush.msrb.mxu2 %v4539_v26  ;;  %1469 = vmatpush.msrb.mxu0 %v4510_v22 }
 0x958   :  { %1342 = vmatpush.msrb.mxu2 %v4544_v27  ;;  %1470 = vmatpush.msrb.mxu0 %v4522_v24 }
 0x95a   :  { %1343 = vmatpush.msrb.mxu2 %v4552_v28  ;;  %1471 = vmatpush.msrb.mxu0 %v4530_v25 }
 0x9ac   :  { %v1029_v53 = vpop.f32.mrf.mxu3 }
 0x9d0   :  { %v1049_v51 = vpop.f32.mrf.mxu0 }
 0x9d1   :  { %v1050_v57 = vadd.f32 %v1049_v51, %v1029_v53 }
 0x9d3   :  { %v1052_v60 = vadd.f32 %v4589_v40, %v1050_v57 }
 0x9d6   :  { %v951_v52 = vpop.f32.mrf.mxu2 }
 0x9d7   :  { %v955_v55 = vrot.slane %v951_v52, 5  ;;  %v956_v56 = vrot.slane %v951_v52, 6 }
 0x9d9   :  { %v959_v58 = vadd.f32 %v955_v55, %v4462_v42  ;;  %v960_v59 = vadd.f32 %v956_v56, %v4474_v54  ;;  %v2939_v55 = vperm.slane %v4671_v37, 0 }
 0x9db   :  { %3792 = vtanh.f32 %v959_v58 }
 0x9dc   :  { %3794 = vtanh.f32 %v960_v59 }
 0x9dd   :  { %3796 = vtanh.f32 %v1052_v60 }
 0x9e1   :  { %v3793_v61 = vpop.eup %3792 }
 0x9e2   :  { %v3795_v62 = vpop.eup %3794  ;;  %v963_v30 = vmul.f32 %v3793_v61, %v4465_v46  ;;  %v2920_v61 = vrot.slane %v4622_v38, 1 }
 0x9e3   :  { %v964_v63 = vmul.f32 %v3795_v62, %v4465_v46  ;;  %v3797_v2 = vpop.eup %3796  ;;  %v2996_v62 = vsel %vm2995_vm6, %v4622_v38, %v2939_v55 }
 0x9e4   :  { %v965_v39 = vadd.f32 %v963_v30, %v4467_v48  ;;  %v1054_v31 = vmul.f32 %v3797_v2, %v4465_v46 }
 0x9e5   :  { %v966_v1 = vadd.f32 %v964_v63, %v4467_v48 }
 0x9e6   :  { %977 = vrot.lane.b32.xlu0 %v965_v39, %s4030_s1  ;;  %v1055_v44 = vadd.f32 %v1054_v31, %v4467_v48  ;;  %v973_v21 = vmul.f32 %v969_v20, %v965_v39 }
 0x9e7   :  { %979 = vrot.lane.b32.xlu1 %v966_v1, %s4030_s1  ;;  %v974_v19 = vmul.f32 %v970_v35, %v966_v1 }
 0x9e8   :  { %v1056_v17 = vmul.f32 %v1055_v44, %v4661_v0  ;;  %v2922_v0 = vrot.slane %v4671_v37, 1 }
 0x9ea   :  { %v2940_v58 = vperm.slane %v2922_v0, 0 }
 0x9ef   :  { %1058 = vrot.lane.b32.xlu1 %v1055_v44, %s4030_s1 }
 0xa58   :  { %v978_v32 = vpop.permute.xlu0 %977 }
 0xa59   :  { %v980_v6 = vpop.permute.xlu1 %979  ;;  %v983_v8 = vmul.f32 %v978_v32, %v965_v39 }
 0xa5a   :  { %v984_v14 = vmul.f32 %v980_v6, %v966_v1 }
 0xa5b   :  { %987 = vrot.lane.b32.xlu2 %v983_v8, %s4031_s22 }
 0xa5c   :  { %989 = vrot.lane.b32.xlu0 %v984_v14, %s4031_s22 }
 0xa61   :  { %v1059_v18 = vpop.permute.xlu1 %1058 }
 0xa62   :  { %v1061_v3 = vmul.f32 %v1059_v18, %v1055_v44 }
 0xa64   :  { %1063 = vrot.lane.b32.xlu1 %v1061_v3, %s4031_s22 }
 0xab5   :  { %v988_v7 = vpop.permute.xlu2 %987 }
 0xab6   :  { %v4708_v29 = vadd.f32 %v988_v7, %v973_v21 }
 0xab8   :  { %3798 = vtanh.f32 %v4708_v29 }
 0xabe   :  { %v3799_v33 = vpop.eup %3798 }
 0xabf   :  { %999 = vrot.lane.b32.xlu2 %v3799_v33, %s4030_s1 }
 0xace   :  { %v990_v36 = vpop.permute.xlu0 %989 }
 0xacf   :  { %v4713_v13 = vadd.f32 %v990_v36, %v974_v19 }
 0xad1   :  { %3800 = vtanh.f32 %v4713_v13 }
 0xad6   :  { %v1064_v34 = vpop.permute.xlu1 %1063 }
 0xad7   :  { %v3801_v41 = vpop.eup %3800  ;;  %v4717_v15 = vadd.f32 %v1064_v34, %v1056_v17 }
 0xad8   :  { %1001 = vrot.lane.b32.xlu0 %v3801_v41, %s4030_s1 }
 0xad9   :  { %3802 = vtanh.f32 %v4717_v15 }
 0xadf   :  { %v3803_v43 = vpop.eup %3802 }
 0xae0   :  { %1069 = vrot.lane.b32.xlu0 %v3803_v43, %s4030_s1 }
 0xb19   :  { %v1000_v16 = vpop.permute.xlu2 %999 }
 0xb1a   :  { %v1005_v45 = vmul.f32 %v1000_v16, %v965_v39  ;;  %v2997_v39 = vsel %vm2995_vm6, %v2920_v61, %v2940_v58 }
 0xb1c   :  { %v1075_v51 = vrot.slane %v1005_v45, 3 }
 0xb4a   :  { %v1002_v47 = vpop.permute.xlu0 %1001 }
 0xb4b   :  { %v1006_v49 = vmul.f32 %v1002_v47, %v966_v1 }
 0xb4d   :  { %v1076_v52 = vrot.slane %v1006_v49, 2 }
 0xb4f   :  { %v1077_v53 = vsel %vm639_vm5, %v1076_v52, %v1075_v51  ;;  %v1117_v51 = vrot.slane %v4708_v29, 7  ;;  %v1118_v52 = vrot.slane %v4713_v13, 7 }
 0xb50   :  { %1078 = vrot.lane.b32.xlu2 %v1077_v53, %s4031_s22 }
 0xb52   :  { %v1070_v56 = vpop.permute.xlu0 %1069 }
 0xb53   :  { %v1072_v57 = vmul.f32 %v1070_v56, %v1055_v44 }
 0xb55   :  { %v2923_v59 = vrot.slane %v1072_v57, 1  ;;  %v2943_v60 = vperm.slane %v1072_v57, 0  ;;  %1156 = vrot.lane.b32.xlu1 %v1072_v57, %s4031_s22 }
 0xb57   :  { %v2944_v30 = vperm.slane %v2923_v59, 0  ;;  %v4731_v63 = vsel %vm73_vm0, %v2996_v62, %v2943_v60 }
 0xb59   :  { %v4735_v37 = vsel %vm73_vm0, %v2997_v39, %v2944_v30 }
 0xbaa   :  { %v1079_v1 = vpop.permute.xlu2 %1078 }
 0xbab   :  { %3639 = vmatmul.msk.f32.vlgmr.msra.gmra.mxu3 %vm374_vm10, %v1079_v1 }
 0xbac   :  { %1390 = vmatpush.msra.mxu3 %v4410_v5 }
 0xbae   :  { %1391 = vmatpush.msra.mxu3 %v4415_v9 }
 0xbb0   :  { %1392 = vmatpush.msra.mxu3 %v4422_v10 }
 0xbb2   :  { %1393 = vmatpush.msra.mxu3 %v4429_v11 }
 0xbb3   :  { %3641 = vmatmul.msk.f32.vlgmr.msrb.gmra.mxu3 %vm374_vm10, %v1079_v1 }
 0xbb4   :  { %1616 = vmatpush.msrb.mxu3 %v4505_v4 }
 0xbb6   :  { %1617 = vmatpush.msrb.mxu3 %v4510_v22 }
 0xbb8   :  { %1618 = vmatpush.msrb.mxu3 %v4522_v24 }
 0xbba   :  { %1619 = vmatpush.msrb.mxu3 %v4530_v25 }
 0xbc7   :  { %v1157_v38 = vpop.permute.xlu1 %1156 }
 0xbc8   :  { %3640 = vmatmul.msk.f32.vlgmr.msra.gmra.mxu2 %vm374_vm10, %v1157_v38 }
 0xbc9   :  { %1538 = vmatpush.msra.mxu2 %v4410_v5 }
 0xbcb   :  { %1539 = vmatpush.msra.mxu2 %v4415_v9 }
 0xbcd   :  { %1540 = vmatpush.msra.mxu2 %v4422_v10 }
 0xbcf   :  { %1541 = vmatpush.msra.mxu2 %v4429_v11 }
 0xc2e   :  { %v1099_v2 = vpop.f32.mrf.mxu3 }
 0xc2f   :  { %v1103_v31 = vrot.slane %v1099_v2, 4  ;;  %v1104_v44 = vrot.slane %v1099_v2, 5 }
 0xc31   :  { %v1107_v32 = vadd.f32 %v1103_v31, %v4462_v42  ;;  %v1108_v6 = vadd.f32 %v1104_v44, %v4474_v54 }
 0xc33   :  { %3804 = vtanh.f32 %v1107_v32 }
 0xc34   :  { %3806 = vtanh.f32 %v1108_v6 }
 0xc36   :  { %v1197_v7 = vpop.f32.mrf.mxu3 }
 0xc39   :  { %v3805_v8 = vpop.eup %3804 }
 0xc3a   :  { %v3807_v14 = vpop.eup %3806  ;;  %v1111_v18 = vmul.f32 %v3805_v8, %v4465_v46 }
 0xc3b   :  { %v1112_v3 = vmul.f32 %v3807_v14, %v4465_v46 }
 0xc3c   :  { %v1113_v20 = vadd.f32 %v1111_v18, %v4467_v48 }
 0xc3d   :  { %v1114_v21 = vadd.f32 %v1112_v3, %v4467_v48 }
 0xc3e   :  { %1125 = vrot.lane.b32.xlu2 %v1113_v20, %s4030_s1  ;;  %v1121_v53 = vmul.f32 %v1117_v51, %v1113_v20 }
 0xc3f   :  { %1127 = vrot.lane.b32.xlu0 %v1114_v21, %s4030_s1  ;;  %v1122_v55 = vmul.f32 %v1118_v52, %v1114_v21 }
 0xc4b   :  { %v1177_v33 = vpop.f32.mrf.mxu2 }
 0xc4c   :  { %v1198_v35 = vadd.f32 %v1197_v7, %v1177_v33 }
 0xc4e   :  { %v1200_v19 = vadd.f32 %v4589_v40, %v1198_v35 }
 0xc50   :  { %3808 = vtanh.f32 %v1200_v19 }
 0xc56   :  { %v3809_v36 = vpop.eup %3808 }
 0xc57   :  { %v1202_v17 = vmul.f32 %v3809_v36, %v4465_v46 }
 0xc59   :  { %v1203_v34 = vadd.f32 %v1202_v17, %v4467_v48 }
 0xc5b   :  { %1206 = vrot.lane.b32.xlu0 %v1203_v34, %s4030_s1  ;;  %v1204_v29 = vmul.f32 %v1203_v34, %v4717_v15 }
 0xc98   :  { %v1126_v41 = vpop.permute.xlu2 %1125 }
 0xc99   :  { %v1131_v43 = vmul.f32 %v1126_v41, %v1113_v20 }
 0xc9b   :  { %1135 = vrot.lane.b32.xlu1 %v1131_v43, %s4031_s22 }
 0xcb1   :  { %v1128_v16 = vpop.permute.xlu0 %1127 }
 0xcb2   :  { %v1132_v45 = vmul.f32 %v1128_v16, %v1114_v21 }
 0xcb4   :  { %1137 = vrot.lane.b32.xlu2 %v1132_v45, %s4031_s22 }
 0xccd   :  { %v1207_v47 = vpop.permute.xlu0 %1206 }
 0xcce   :  { %v1209_v49 = vmul.f32 %v1207_v47, %v1203_v34 }
 0xcd0   :  { %1211 = vrot.lane.b32.xlu0 %v1209_v49, %s4031_s22 }
 0xd0d   :  { %v1136_v0 = vpop.permute.xlu1 %1135 }
 0xd0e   :  { %v4769_v56 = vadd.f32 %v1136_v0, %v1121_v53  ;;  %v1138_v57 = vpop.permute.xlu2 %1137 }
 0xd0f   :  { %v4771_v58 = vadd.f32 %v1138_v57, %v1122_v55 }
 0xd10   :  { %3810 = vtanh.f32 %v4769_v56 }
 0xd11   :  { %3812 = vtanh.f32 %v4771_v58  ;;  %v1266_v57 = vrot.slane %v4771_v58, 7 }
 0xd16   :  { %v3811_v59 = vpop.eup %3810 }
 0xd17   :  { %v3813_v60 = vpop.eup %3812  ;;  %1147 = vrot.lane.b32.xlu1 %v3811_v59, %s4030_s1 }
 0xd18   :  { %1149 = vrot.lane.b32.xlu2 %v3813_v60, %s4030_s1 }
 0xd42   :  { %v1212_v13 = vpop.permute.xlu0 %1211 }
 0xd43   :  { %v4778_v61 = vadd.f32 %v1212_v13, %v1204_v29 }
 0xd45   :  { %3814 = vtanh.f32 %v4778_v61 }
 0xd4b   :  { %v3815_v62 = vpop.eup %3814 }
 0xd4c   :  { %1217 = vrot.lane.b32.xlu2 %v3815_v62, %s4030_s1  ;;  %v1265_v62 = vrot.slane %v4769_v56, 7 }
 0xd72   :  { %v1150_v30 = vpop.permute.xlu2 %1149 }
 0xd73   :  { %v1154_v39 = vmul.f32 %v1150_v30, %v1114_v21 }
 0xd75   :  { %v1224_v2 = vrot.slane %v1154_v39, 3 }
 0xd89   :  { %v1148_v1 = vpop.permute.xlu1 %1147 }
 0xd8a   :  { %v1153_v38 = vmul.f32 %v1148_v1, %v1113_v20 }
 0xd8c   :  { %v1223_v31 = vrot.slane %v1153_v38, 4 }
 0xd8e   :  { %v1225_v44 = vsel %vm639_vm5, %v1224_v2, %v1223_v31 }
 0xd8f   :  { %1226 = vrot.lane.b32.xlu1 %v1225_v44, %s4031_s22 }
 0xda6   :  { %v1218_v32 = vpop.permute.xlu2 %1217 }
 0xda7   :  { %v1220_v15 = vmul.f32 %v1218_v32, %v1203_v34 }
 0xda9   :  { %v2924_v6 = vrot.slane %v1220_v15, 1  ;;  %v2947_v8 = vperm.slane %v1220_v15, 0  ;;  %1304 = vrot.lane.b32.xlu0 %v1220_v15, %s4031_s22 }
 0xdab   :  { %v2948_v14 = vperm.slane %v2924_v6, 0  ;;  %v4787_v18 = vsel %vm3000_vm7, %v4731_v63, %v2947_v8 }
 0xdad   :  { %v4791_v3 = vsel %vm3000_vm7, %v4735_v37, %v2948_v14 }
 0xe01   :  { %v1227_v20 = vpop.permute.xlu1 %1226 }
 0xe02   :  { %3642 = vmatmul.msk.f32.vlgmr.msra.gmra.mxu0 %vm374_vm10, %v1227_v20  ;;  %3644 = vmatmul.msk.f32.vlgmr.msrb.gmra.mxu2 %vm374_vm10, %v1227_v20 }
 0xe03   :  { %1636 = vmatpush.msra.mxu0 %v4516_v23  ;;  %1763 = vmatpush.msrb.mxu2 %v4505_v4 }
 0xe05   :  { %1637 = vmatpush.msra.mxu0 %v4539_v26  ;;  %1764 = vmatpush.msrb.mxu2 %v4510_v22 }
 0xe07   :  { %1638 = vmatpush.msra.mxu0 %v4544_v27  ;;  %1765 = vmatpush.msrb.mxu2 %v4522_v24 }
 0xe09   :  { %1639 = vmatpush.msra.mxu0 %v4552_v28  ;;  %1766 = vmatpush.msrb.mxu2 %v4530_v25 }
 0xe1b   :  { %v1305_v63 = vpop.permute.xlu0 %1304 }
 0xe1c   :  { %3643 = vmatmul.msk.f32.vlgmr.msrb.gmra.mxu1 %vm374_vm10, %v1305_v63 }
 0xe1d   :  { %1686 = vmatpush.msrb.mxu1 %v4410_v5 }
 0xe1f   :  { %1687 = vmatpush.msrb.mxu1 %v4415_v9 }
 0xe21   :  { %1688 = vmatpush.msrb.mxu1 %v4422_v10 }
 0xe23   :  { %1689 = vmatpush.msrb.mxu1 %v4429_v11 }
 0xe7f   :  { %v1247_v37 = vpop.f32.mrf.mxu0 }
 0xe80   :  { %v1251_v21 = vrot.slane %v1247_v37, 3  ;;  %v1252_v7 = vrot.slane %v1247_v37, 4 }
 0xe82   :  { %v1255_v33 = vadd.f32 %v1251_v21, %v4462_v42  ;;  %v1256_v35 = vadd.f32 %v1252_v7, %v4474_v54 }
 0xe84   :  { %3816 = vtanh.f32 %v1255_v33 }
 0xe85   :  { %3818 = vtanh.f32 %v1256_v35  ;;  %v1345_v11 = vpop.f32.mrf.mxu2 }
 0xe8a   :  { %v3817_v19 = vpop.eup %3816 }
 0xe8b   :  { %v3819_v36 = vpop.eup %3818  ;;  %v1259_v17 = vmul.f32 %v3817_v19, %v4465_v46 }
 0xe8c   :  { %v1260_v5 = vmul.f32 %v3819_v36, %v4465_v46  ;;  %v4853_v36 = vld [vmem:[%s5626_s8 + $0x18] sm:$0xff] }
 0xe8d   :  { %v1261_v9 = vadd.f32 %v1259_v17, %v4467_v48  ;;  %v4859_v17 = vld [vmem:[%s5626_s8 + $0x10] sm:$0xff] }
 0xe8e   :  { %v1262_v10 = vadd.f32 %v1260_v5, %v4467_v48 }
 0xe8f   :  { %1273 = vrot.lane.b32.xlu1 %v1261_v9, %s4030_s1  ;;  %v1269_v30 = vmul.f32 %v1265_v62, %v1261_v9 }
 0xe90   :  { %1275 = vrot.lane.b32.xlu2 %v1262_v10, %s4030_s1  ;;  %v1270_v59 = vmul.f32 %v1266_v57, %v1262_v10 }
 0xe99   :  { %v1325_v34 = vpop.f32.mrf.mxu1 }
 0xe9a   :  { %v1346_v41 = vadd.f32 %v1345_v11, %v1325_v34 }
 0xe9c   :  { %v1348_v43 = vadd.f32 %v4589_v40, %v1346_v41 }
 0xe9e   :  { %3820 = vtanh.f32 %v1348_v43 }
 0xea4   :  { %v3821_v16 = vpop.eup %3820 }
 0xea5   :  { %v1350_v45 = vmul.f32 %v3821_v16, %v4465_v46 }
 0xea7   :  { %v1351_v47 = vadd.f32 %v1350_v45, %v4467_v48 }
 0xea9   :  { %1354 = vrot.lane.b32.xlu2 %v1351_v47, %s4030_s1  ;;  %v1352_v38 = vmul.f32 %v1351_v47, %v4778_v61 }
 0xeea   :  { %v1276_v49 = vpop.permute.xlu2 %1275 }
 0xeeb   :  { %v1280_v51 = vmul.f32 %v1276_v49, %v1262_v10 }
 0xeed   :  { %1285 = vrot.lane.b32.xlu1 %v1280_v51, %s4031_s22 }
 0xf01   :  { %v1274_v52 = vpop.permute.xlu1 %1273 }
 0xf02   :  { %v1279_v53 = vmul.f32 %v1274_v52, %v1261_v9 }
 0xf03   :  { %v1355_v0 = vpop.permute.xlu2 %1354 }
 0xf04   :  { %1283 = vrot.lane.b32.xlu0 %v1279_v53, %s4031_s22  ;;  %v1357_v55 = vmul.f32 %v1355_v0, %v1351_v47 }
 0xf0c   :  { %1359 = vrot.lane.b32.xlu0 %v1357_v55, %s4031_s22 }
 0xf5f   :  { %v1286_v60 = vpop.permute.xlu1 %1285 }
 0xf60   :  { %v4824_v29 = vadd.f32 %v1286_v60, %v1270_v59 }
 0xf62   :  { %3822 = vtanh.f32 %v4824_v29 }
 0xf68   :  { %v3823_v13 = vpop.eup %3822 }
 0xf69   :  { %1297 = vrot.lane.b32.xlu2 %v3823_v13, %s4030_s1 }
 0xf76   :  { %v1284_v39 = vpop.permute.xlu0 %1283 }
 0xf77   :  { %v4829_v1 = vadd.f32 %v1284_v39, %v1269_v30  ;;  %v1414_v30 = vrot.slane %v4824_v29, 7 }
 0xf79   :  { %3824 = vtanh.f32 %v4829_v1  ;;  %v1413_v62 = vrot.slane %v4829_v1, 7 }
 0xf7e   :  { %v1360_v58 = vpop.permute.xlu0 %1359 }
 0xf7f   :  { %v3825_v2 = vpop.eup %3824  ;;  %v4833_v31 = vadd.f32 %v1360_v58, %v1352_v38 }
 0xf80   :  { %1295 = vrot.lane.b32.xlu1 %v3825_v2, %s4030_s1 }
 0xf81   :  { %3826 = vtanh.f32 %v4833_v31 }
 0xf87   :  { %v3827_v44 = vpop.eup %3826 }
 0xf88   :  { %1365 = vrot.lane.b32.xlu1 %v3827_v44, %s4030_s1 }
 0xfc3   :  { %v1298_v56 = vpop.permute.xlu2 %1297 }
 0xfc4   :  { %v1302_v32 = vmul.f32 %v1298_v56, %v1262_v10 }
 0xfc6   :  { %v1372_v8 = vrot.slane %v1302_v32, 4 }
 0xff2   :  { %v1296_v15 = vpop.permute.xlu1 %1295 }
 0xff3   :  { %v1301_v6 = vmul.f32 %v1296_v15, %v1261_v9 }
 0xff5   :  { %v1371_v14 = vrot.slane %v1301_v6, 5 }
 0xff7   :  { %v1373_v20 = vsel %vm639_vm5, %v1372_v8, %v1371_v14 }
 0xff8   :  { %1374 = vrot.lane.b32.xlu0 %v1373_v20, %s4031_s22 }
 0xffa   :  { %v1366_v61 = vpop.permute.xlu1 %1365 }
 0xffb   :  { %v1368_v63 = vmul.f32 %v1366_v61, %v1351_v47 }
 0xffd   :  { %v2925_v37 = vrot.slane %v1368_v63, 1  ;;  %v2951_v21 = vperm.slane %v1368_v63, 0  ;;  %1452 = vrot.lane.b32.xlu2 %v1368_v63, %s4031_s22 }
 0xfff   :  { %v2952_v7 = vperm.slane %v2925_v37, 0  ;;  %v4843_v33 = vsel %vm163_vm4, %v4787_v18, %v2951_v21  ;;  %v4865_v18 = vld [vmem:[%s5626_s8 + $0x8] sm:$0xff] }
0x1001   :  { %v4847_v35 = vsel %vm163_vm4, %v4791_v3, %v2952_v7  ;;  %v4871_v3 = vld [vmem:[%s5626_s8] sm:$0xff] }
0x1057   :  { %v1453_v19 = vpop.permute.xlu2 %1452 }
0x1058   :  { %3646 = vmatmul.msk.f32.vlgmr.msrb.gmra.mxu0 %vm374_vm10, %v1453_v19 }
0x1059   :  { %1832 = vmatpush.msrb.mxu0 %v4853_v36 }
0x105b   :  { %1833 = vmatpush.msrb.mxu0 %v4859_v17 }
0x105d   :  { %1834 = vmatpush.msrb.mxu0 %v4865_v18 }
0x105f   :  { %1835 = vmatpush.msrb.mxu0 %v4871_v3 }
0x106a   :  { %v1375_v5 = vpop.permute.xlu0 %1374 }
0x106b   :  { %3645 = vmatmul.msk.f32.vlgmr.msra.gmra.mxu3 %vm374_vm10, %v1375_v5  ;;  %3647 = vmatmul.msk.f32.vlgmr.msra.gmra.mxu1 %vm374_vm10, %v1375_v5 }
0x106c   :  { %1783 = vmatpush.msra.mxu3 %v4516_v23  ;;  %1909 = vmatpush.msra.mxu1 %v4505_v4 }
0x106e   :  { %1784 = vmatpush.msra.mxu3 %v4539_v26  ;;  %1910 = vmatpush.msra.mxu1 %v4510_v22 }
0x1070   :  { %1785 = vmatpush.msra.mxu3 %v4544_v27  ;;  %1911 = vmatpush.msra.mxu1 %v4522_v24 }
0x1072   :  { %1786 = vmatpush.msra.mxu3 %v4552_v28  ;;  %1912 = vmatpush.msra.mxu1 %v4530_v25 }
0x10d5   :  { %v1473_v9 = vpop.f32.mrf.mxu0 }
0x10e8   :  { %v1493_v10 = vpop.f32.mrf.mxu1 }
0x10e9   :  { %v1494_v11 = vadd.f32 %v1493_v10, %v1473_v9  ;;  %v4941_v10 = vld [vmem:[%s5629_s11 + $0x18] sm:$0xff] }
0x10eb   :  { %v1496_v34 = vadd.f32 %v4589_v40, %v1494_v11  ;;  %v4947_v11 = vld [vmem:[%s5628_s10 + $0x10] sm:$0xff] }
0x10ed   :  { %3828 = vtanh.f32 %v1496_v34  ;;  %v4953_v34 = vld [vmem:[%s5629_s11 + $0x10] sm:$0xff] }
0x10ee   :  { %v1395_v23 = vpop.f32.mrf.mxu3 }
0x10ef   :  { %v1399_v4 = vrot.slane %v1395_v23, 2  ;;  %v1400_v41 = vrot.slane %v1395_v23, 3  ;;  %v4959_v23 = vld [vmem:[%s5628_s10 + $0x8] sm:$0xff] }
0x10f1   :  { %v1403_v26 = vadd.f32 %v1399_v4, %v4462_v42  ;;  %v1404_v22 = vadd.f32 %v1400_v41, %v4474_v54  ;;  %v4965_v4 = vld [vmem:[%s5629_s11 + $0x8] sm:$0xff]  ;;  %v4971_v41 = vld [vmem:[%s5628_s10] sm:$0xff] }
0x10f3   :  { %v3829_v27 = vpop.eup %3828  ;;  %3830 = vtanh.f32 %v1403_v26  ;;  %v4977_v26 = vld [vmem:[%s5629_s11] sm:$0xff] }
0x10f4   :  { %3832 = vtanh.f32 %v1404_v22  ;;  %v1498_v24 = vmul.f32 %v3829_v27, %v4465_v46 }
0x10f6   :  { %v1499_v25 = vadd.f32 %v1498_v24, %v4467_v48 }
0x10f8   :  { %1502 = vrot.lane.b32.xlu2 %v1499_v25, %s4030_s1  ;;  %v1500_v57 = vmul.f32 %v1499_v25, %v4833_v31 }
0x10f9   :  { %v3831_v28 = vpop.eup %3830 }
0x10fa   :  { %v3833_v43 = vpop.eup %3832  ;;  %v1407_v40 = vmul.f32 %v3831_v28, %v4465_v46 }
0x10fb   :  { %v1408_v16 = vmul.f32 %v3833_v43, %v4465_v46 }
0x10fc   :  { %v1409_v45 = vadd.f32 %v1407_v40, %v4467_v48 }
0x10fd   :  { %v1410_v47 = vadd.f32 %v1408_v16, %v4467_v48 }
0x10fe   :  { %1421 = vrot.lane.b32.xlu0 %v1409_v45, %s4030_s1  ;;  %v1417_v39 = vmul.f32 %v1413_v62, %v1409_v45 }
0x10ff   :  { %1423 = vrot.lane.b32.xlu1 %v1410_v47, %s4030_s1  ;;  %v1418_v58 = vmul.f32 %v1414_v30, %v1410_v47 }
0x1152   :  { %v1503_v49 = vpop.permute.xlu2 %1502 }
0x1153   :  { %v1505_v51 = vmul.f32 %v1503_v49, %v1499_v25 }
0x1155   :  { %1507 = vrot.lane.b32.xlu2 %v1505_v51, %s4031_s22 }
0x1170   :  { %v1422_v52 = vpop.permute.xlu0 %1421 }
0x1171   :  { %v1427_v53 = vmul.f32 %v1422_v52, %v1409_v45  ;;  %v1424_v0 = vpop.permute.xlu1 %1423 }
0x1172   :  { %v1428_v55 = vmul.f32 %v1424_v0, %v1410_v47 }
0x1173   :  { %1431 = vrot.lane.b32.xlu0 %v1427_v53, %s4031_s22 }
0x1174   :  { %1433 = vrot.lane.b32.xlu1 %v1428_v55, %s4031_s22 }
0x11af   :  { %v1508_v59 = vpop.permute.xlu2 %1507 }
0x11b0   :  { %v4900_v60 = vadd.f32 %v1508_v59, %v1500_v57 }
0x11b2   :  { %3834 = vtanh.f32 %v4900_v60 }
0x11b8   :  { %v3835_v13 = vpop.eup %3834 }
0x11b9   :  { %1513 = vrot.lane.b32.xlu2 %v3835_v13, %s4030_s1 }
0x11e5   :  { %v1432_v38 = vpop.permute.xlu0 %1431 }
0x11e6   :  { %v4906_v2 = vadd.f32 %v1432_v38, %v1417_v39  ;;  %v1434_v44 = vpop.permute.xlu1 %1433 }
0x11e7   :  { %v4908_v56 = vadd.f32 %v1434_v44, %v1418_v58 }
0x11e8   :  { %3836 = vtanh.f32 %v4906_v2  ;;  %v1561_v58 = vrot.slane %v4906_v2, 7 }
0x11e9   :  { %3838 = vtanh.f32 %v4908_v56 }
0x11ee   :  { %v3837_v31 = vpop.eup %3836 }
0x11ef   :  { %v3839_v32 = vpop.eup %3838  ;;  %1443 = vrot.lane.b32.xlu0 %v3837_v31, %s4030_s1 }
0x11f0   :  { %1445 = vrot.lane.b32.xlu1 %v3839_v32, %s4030_s1 }
0x1213   :  { %v1514_v1 = vpop.permute.xlu2 %1513 }
0x1214   :  { %v1516_v29 = vmul.f32 %v1514_v1, %v1499_v25  ;;  %v4983_v25 = vld [vmem:[%s5630_s12] ss:$0 sm:$0xff] }
0x1216   :  { %v2926_v15 = vrot.slane %v1516_v29, 1  ;;  %v2955_v6 = vperm.slane %v1516_v29, 0  ;;  %1600 = vrot.lane.b32.xlu1 %v1516_v29, %s4031_s22 }
0x1218   :  { %v2956_v8 = vperm.slane %v2926_v15, 0  ;;  %v4917_v14 = vsel %vm140_vm2, %v4843_v33, %v2955_v6 }
0x121a   :  { %v4921_v20 = vsel %vm140_vm2, %v4847_v35, %v2956_v8  ;;  %v4935_v35 = vld [vmem:[%s5628_s10 + $0x18] sm:$0xff]  ;;  %v1562_v8 = vrot.slane %v4908_v56, 7 }
0x1261   :  { %v1444_v61 = vpop.permute.xlu0 %1443 }
0x1262   :  { %v1449_v63 = vmul.f32 %v1444_v61, %v1409_v45  ;;  %v1446_v37 = vpop.permute.xlu1 %1445 }
0x1263   :  { %v1450_v21 = vmul.f32 %v1446_v37, %v1410_v47 }
0x1264   :  { %v1519_v7 = vrot.slane %v1449_v63, 6 }
0x1265   :  { %v1520_v19 = vrot.slane %v1450_v21, 5 }
0x1267   :  { %v1521_v5 = vsel %vm639_vm5, %v1520_v19, %v1519_v7 }
0x1268   :  { %1522 = vrot.lane.b32.xlu0 %v1521_v5, %s4031_s22 }
0x1288   :  { %v1601_v9 = vpop.permute.xlu1 %1600 }
0x1289   :  { %3649 = vmatmul.msk.f32.vlgmr.msrb.gmra.mxu3 %vm374_vm10, %v1601_v9 }
0x128a   :  { %1978 = vmatpush.msrb.mxu3 %v4853_v36 }
0x128c   :  { %1979 = vmatpush.msrb.mxu3 %v4859_v17 }
0x128e   :  { %1980 = vmatpush.msrb.mxu3 %v4865_v18 }
0x1290   :  { %1981 = vmatpush.msrb.mxu3 %v4871_v3 }
0x12da   :  { %v1523_v33 = vpop.permute.xlu0 %1522 }
0x12db   :  { %3648 = vmatmul.msk.f32.vlgmr.msra.gmra.mxu2 %vm374_vm10, %v1523_v33  ;;  %3650 = vmatmul.msk.f32.vlgmr.msra.gmra.mxu0 %vm374_vm10, %v1523_v33 }
0x12dc   :  { %1929 = vmatpush.msra.mxu2 %v4935_v35  ;;  %2056 = vmatpush.msra.mxu0 %v4941_v10 }
0x12de   :  { %1930 = vmatpush.msra.mxu2 %v4947_v11  ;;  %2057 = vmatpush.msra.mxu0 %v4953_v34 }
0x12e0   :  { %1931 = vmatpush.msra.mxu2 %v4959_v23  ;;  %2058 = vmatpush.msra.mxu0 %v4965_v4 }
0x12e2   :  { %1932 = vmatpush.msra.mxu2 %v4971_v41  ;;  %2059 = vmatpush.msra.mxu0 %v4977_v26 }
0x130c   :  { %v1621_v22 = vpop.f32.mrf.mxu3 }
0x1358   :  { %v1641_v27 = vpop.f32.mrf.mxu0 }
0x1359   :  { %v1642_v24 = vadd.f32 %v1641_v27, %v1621_v22 }
0x135b   :  { %v1644_v28 = vadd.f32 %v4983_v25, %v1642_v24 }
0x135d   :  { %3840 = vtanh.f32 %v1644_v28 }
0x135e   :  { %v1543_v43 = vpop.f32.mrf.mxu2 }
0x135f   :  { %v1547_v40 = vrot.slane %v1543_v43, 1  ;;  %v1548_v16 = vrot.slane %v1543_v43, 2 }
0x1361   :  { %v1551_v45 = vadd.f32 %v1547_v40, %v4462_v42  ;;  %v1552_v47 = vadd.f32 %v1548_v16, %v4474_v54 }
0x1363   :  { %v3841_v49 = vpop.eup %3840  ;;  %3842 = vtanh.f32 %v1551_v45 }
0x1364   :  { %3844 = vtanh.f32 %v1552_v47  ;;  %v1646_v51 = vmul.f32 %v3841_v49, %v4465_v46 }
0x1366   :  { %v1647_v52 = vadd.f32 %v1646_v51, %v4467_v48 }
0x1368   :  { %1650 = vrot.lane.b32.xlu1 %v1647_v52, %s4030_s1  ;;  %v1648_v29 = vmul.f32 %v1647_v52, %v4900_v60 }
0x1369   :  { %v3843_v53 = vpop.eup %3842 }
0x136a   :  { %v3845_v0 = vpop.eup %3844  ;;  %v1555_v55 = vmul.f32 %v3843_v53, %v4465_v46 }
0x136b   :  { %v1556_v57 = vmul.f32 %v3845_v0, %v4465_v46 }
0x136c   :  { %v1557_v59 = vadd.f32 %v1555_v55, %v4467_v48 }
0x136d   :  { %v1558_v42 = vadd.f32 %v1556_v57, %v4467_v48 }
0x136e   :  { %1569 = vrot.lane.b32.xlu2 %v1557_v59, %s4030_s1  ;;  %v1565_v44 = vmul.f32 %v1561_v58, %v1557_v59 }
0x136f   :  { %1571 = vrot.lane.b32.xlu0 %v1558_v42, %s4030_s1  ;;  %v1566_v61 = vmul.f32 %v1562_v8, %v1558_v42 }
0x13c8   :  { %v1570_v54 = vpop.permute.xlu2 %1569 }
0x13c9   :  { %v1575_v13 = vmul.f32 %v1570_v54, %v1557_v59 }
0x13cb   :  { %1579 = vrot.lane.b32.xlu2 %v1575_v13, %s4031_s22 }
0x13da   :  { %v1651_v62 = vpop.permute.xlu1 %1650 }
0x13db   :  { %v1653_v30 = vmul.f32 %v1651_v62, %v1647_v52 }
0x13dd   :  { %1655 = vrot.lane.b32.xlu1 %v1653_v30, %s4031_s22 }
0x13e1   :  { %v1572_v39 = vpop.permute.xlu0 %1571 }
0x13e2   :  { %v1576_v38 = vmul.f32 %v1572_v39, %v1558_v42 }
0x13e4   :  { %1581 = vrot.lane.b32.xlu0 %v1576_v38, %s4031_s22 }
0x1425   :  { %v1580_v31 = vpop.permute.xlu2 %1579 }
0x1426   :  { %v5001_v32 = vadd.f32 %v1580_v31, %v1565_v44 }
0x1428   :  { %3846 = vtanh.f32 %v5001_v32 }
0x142e   :  { %v3847_v1 = vpop.eup %3846 }
0x142f   :  { %1591 = vrot.lane.b32.xlu2 %v3847_v1, %s4030_s1 }
0x144f   :  { %v1656_v15 = vpop.permute.xlu1 %1655 }
0x1450   :  { %v5006_v6 = vadd.f32 %v1656_v15, %v1648_v29 }
0x1452   :  { %3848 = vtanh.f32 %v5006_v6 }
0x1456   :  { %v1582_v2 = vpop.permute.xlu0 %1581 }
0x1457   :  { %v5010_v63 = vadd.f32 %v1582_v2, %v1566_v61  ;;  %v1708_v61 = vrot.slane %v5001_v32, 7 }
0x1458   :  { %v3849_v37 = vpop.eup %3848 }
0x1459   :  { %3850 = vtanh.f32 %v5010_v63  ;;  %1661 = vrot.lane.b32.xlu1 %v3849_v37, %s4030_s1 }
0x145f   :  { %v3851_v21 = vpop.eup %3850 }
0x1460   :  { %1593 = vrot.lane.b32.xlu0 %v3851_v21, %s4030_s1 }
0x1489   :  { %v1592_v19 = vpop.permute.xlu2 %1591 }
0x148a   :  { %v1597_v22 = vmul.f32 %v1592_v19, %v1557_v59 }
0x148c   :  { %v1667_v43 = vrot.slane %v1597_v22, 7 }
0x14cb   :  { %v1662_v60 = vpop.permute.xlu1 %1661 }
0x14cc   :  { %v1664_v7 = vmul.f32 %v1662_v60, %v1647_v52 }
0x14ce   :  { %v2927_v5 = vrot.slane %v1664_v7, 1  ;;  %v2959_v9 = vperm.slane %v1664_v7, 0  ;;  %1747 = vrot.lane.b32.xlu0 %v1664_v7, %s4031_s22  ;;  %v1709_v7 = vrot.slane %v5010_v63, 7 }
0x14d0   :  { %v2960_v56 = vperm.slane %v2927_v5, 0  ;;  %v5018_v33 = vsel %vm117_vm3, %v4917_v14, %v2959_v9 }
0x14d2   :  { %v1594_v27 = vpop.permute.xlu0 %1593  ;;  %v5022_v24 = vsel %vm117_vm3, %v4921_v20, %v2960_v56  ;;  %v3997_v20 = vld [vmem:[%s5627_s9] ss:$0 sm:$0xff] }
0x14d3   :  { %v1598_v28 = vmul.f32 %v1594_v27, %v1558_v42  ;;  %v5045_v47 = vadd.f32 %v3997_v20, %v4470_v50  ;;  %v5048_v51 = vadd.f32 %v3997_v20, %v4584_v12 }
0x14d5   :  { %v1668_v40 = vrot.slane %v1598_v28, 6 }
0x14d7   :  { %v1669_v16 = vsel %vm639_vm5, %v1668_v40, %v1667_v43 }
0x14d8   :  { %1670 = vrot.lane.b32.xlu2 %v1669_v16, %s4031_s22 }
0x1532   :  { %v1671_v45 = vpop.permute.xlu2 %1670 }
0x1533   :  { %3651 = vmatmul.msk.f32.vlgmr.msrb.gmra.mxu1 %vm374_vm10, %v1671_v45  ;;  %3653 = vmatmul.msk.f32.vlgmr.msra.gmra.mxu3 %vm374_vm10, %v1671_v45 }
0x1534   :  { %2076 = vmatpush.msrb.mxu1 %v4935_v35  ;;  %2204 = vmatpush.msra.mxu3 %v4941_v10 }
0x1536   :  { %2077 = vmatpush.msrb.mxu1 %v4947_v11  ;;  %2205 = vmatpush.msra.mxu3 %v4953_v34 }
0x1538   :  { %2078 = vmatpush.msrb.mxu1 %v4959_v23  ;;  %2206 = vmatpush.msra.mxu3 %v4965_v4 }
0x153a   :  { %2079 = vmatpush.msrb.mxu1 %v4971_v41  ;;  %2207 = vmatpush.msra.mxu3 %v4977_v26 }
0x1540   :  { %v1748_v14 = vpop.permute.xlu0 %1747 }
0x1541   :  { %3652 = vmatmul.msk.f32.vlgmr.msrb.gmra.mxu2 %vm374_vm10, %v1748_v14 }
0x1542   :  { %2126 = vmatpush.msrb.mxu2 %v4853_v36 }
0x1544   :  { %2127 = vmatpush.msrb.mxu2 %v4859_v17 }
0x1546   :  { %2128 = vmatpush.msrb.mxu2 %v4865_v18 }
0x1548   :  { %2129 = vmatpush.msrb.mxu2 %v4871_v3 }
0x15b0   :  { %v1691_v49 = vpop.f32.mrf.mxu1 }
0x15b1   :  { %v1695_v52 = vrot.slane %v1691_v49, 1  ;;  %v1698_v53 = vadd.f32 %v1691_v49, %v5045_v47 }
0x15b3   :  { %v1699_v0 = vadd.f32 %v1695_v52, %v5048_v51  ;;  %3852 = vtanh.f32 %v1698_v53 }
0x15b5   :  { %3854 = vtanh.f32 %v1699_v0 }
0x15b6   :  { %v1788_v54 = vpop.f32.mrf.mxu3 }
0x15b9   :  { %v3853_v55 = vpop.eup %3852 }
0x15ba   :  { %v1702_v57 = vmul.f32 %v3853_v55, %v4465_v46 }
0x15bb   :  { %v3855_v59 = vpop.eup %3854 }
0x15bc   :  { %v1704_v42 = vadd.f32 %v1702_v57, %v4467_v48  ;;  %v1703_v50 = vmul.f32 %v3855_v59, %v4465_v46 }
0x15be   :  { %1716 = vrot.lane.b32.xlu2 %v1704_v42, %s4030_s1  ;;  %v1705_v12 = vadd.f32 %v1703_v50, %v4467_v48  ;;  %v1712_v2 = vmul.f32 %v1708_v61, %v1704_v42 }
0x15c0   :  { %1718 = vrot.lane.b32.xlu1 %v1705_v12, %s4030_s1  ;;  %v1713_v19 = vmul.f32 %v1709_v7, %v1705_v12 }
0x15c4   :  { %v1768_v13 = vpop.f32.mrf.mxu2 }
0x15c5   :  { %v1789_v62 = vadd.f32 %v1788_v54, %v1768_v13 }
0x15c7   :  { %v1791_v30 = vadd.f32 %v4983_v25, %v1789_v62 }
0x15c9   :  { %3856 = vtanh.f32 %v1791_v30 }
0x15cf   :  { %v3857_v39 = vpop.eup %3856 }
0x15d0   :  { %v1793_v38 = vmul.f32 %v3857_v39, %v4465_v46 }
0x15d2   :  { %v1794_v58 = vadd.f32 %v1793_v38, %v4467_v48 }
0x15d4   :  { %1797 = vrot.lane.b32.xlu0 %v1794_v58, %s4030_s1  ;;  %v1795_v32 = vmul.f32 %v1794_v58, %v5006_v6 }
0x1618   :  { %v1717_v44 = vpop.permute.xlu2 %1716 }
0x1619   :  { %v1722_v31 = vmul.f32 %v1717_v44, %v1704_v42 }
0x161b   :  { %1726 = vrot.lane.b32.xlu2 %v1722_v31, %s4031_s22 }
0x1632   :  { %v1719_v1 = vpop.permute.xlu1 %1718 }
0x1633   :  { %v1723_v29 = vmul.f32 %v1719_v1, %v1705_v12 }
0x1635   :  { %1728 = vrot.lane.b32.xlu1 %v1723_v29, %s4031_s22 }
0x1646   :  { %v1798_v15 = vpop.permute.xlu0 %1797 }
0x1647   :  { %v1800_v8 = vmul.f32 %v1798_v15, %v1794_v58 }
0x1649   :  { %1802 = vrot.lane.b32.xlu0 %v1800_v8, %s4031_s22 }
0x1675   :  { %v1727_v37 = vpop.permute.xlu2 %1726 }
0x1676   :  { %v5066_v21 = vadd.f32 %v1727_v37, %v1712_v2 }
0x1678   :  { %3858 = vtanh.f32 %v5066_v21 }
0x167e   :  { %v3859_v60 = vpop.eup %3858 }
0x167f   :  { %1738 = vrot.lane.b32.xlu2 %v3859_v60, %s4030_s1 }
0x16a7   :  { %v1729_v5 = vpop.permute.xlu1 %1728 }
0x16a8   :  { %v5071_v9 = vadd.f32 %v1729_v5, %v1713_v19 }
0x16aa   :  { %3860 = vtanh.f32 %v5071_v9 }
0x16b0   :  { %v3861_v56 = vpop.eup %3860 }
0x16b1   :  { %1740 = vrot.lane.b32.xlu1 %v3861_v56, %s4030_s1 }
0x16bb   :  { %v1803_v22 = vpop.permute.xlu0 %1802 }
0x16bc   :  { %v5076_v27 = vadd.f32 %v1803_v22, %v1795_v32  ;;  %v1855_v22 = vrot.slane %v5071_v9, 7 }
0x16be   :  { %3862 = vtanh.f32 %v5076_v27 }
0x16c4   :  { %v3863_v28 = vpop.eup %3862 }
0x16c5   :  { %1808 = vrot.lane.b32.xlu0 %v3863_v28, %s4030_s1  ;;  %v1854_v28 = vrot.slane %v5066_v21, 7 }
0x16d9   :  { %v1739_v63 = vpop.permute.xlu2 %1738 }
0x16da   :  { %v1744_v16 = vmul.f32 %v1739_v63, %v1704_v42 }
0x1723   :  { %v1741_v43 = vpop.permute.xlu1 %1740 }
0x1724   :  { %v1745_v40 = vmul.f32 %v1741_v43, %v1705_v12 }
0x1726   :  { %v1814_v45 = vrot.slane %v1745_v40, 7 }
0x1728   :  { %v1815_v14 = vsel %vm639_vm5, %v1814_v45, %v1744_v16 }
0x1729   :  { %1816 = vrot.lane.b32.xlu1 %v1815_v14, %s4031_s22 }
0x1737   :  { %v1809_v20 = vpop.permute.xlu0 %1808 }
0x1738   :  { %v1811_v49 = vmul.f32 %v1809_v20, %v1794_v58 }
0x173a   :  { %v2928_v6 = vrot.slane %v1811_v49, 1  ;;  %v2963_v52 = vperm.slane %v1811_v49, 0  ;;  %1893 = vrot.lane.b32.xlu2 %v1811_v49, %s4031_s22 }
0x173c   :  { %v2964_v53 = vperm.slane %v2928_v6, 0  ;;  %v5085_v0 = vsel %vm94_vm1, %v5018_v33, %v2963_v52 }
0x173e   :  { %v5089_v55 = vsel %vm94_vm1, %v5022_v24, %v2964_v53 }
0x1794   :  { %v1894_v57 = vpop.permute.xlu2 %1893 }
0x1795   :  { %3655 = vmatmul.msk.f32.vlgmr.msra.gmra.mxu1 %vm374_vm10, %v1894_v57 }
0x1796   :  { %2274 = vmatpush.msra.mxu1 %v4853_v36 }
0x1798   :  { %2275 = vmatpush.msra.mxu1 %v4859_v17 }
0x179a   :  { %2276 = vmatpush.msra.mxu1 %v4865_v18 }
0x179b   :  { %v1817_v59 = vpop.permute.xlu1 %1816 }
0x179c   :  { %3654 = vmatmul.msk.f32.vlgmr.msrb.gmra.mxu0 %vm374_vm10, %v1817_v59  ;;  %3656 = vmatmul.msk.f32.vlgmr.msra.gmra.mxu2 %vm374_vm10, %v1817_v59 }
0x179d   :  { %2224 = vmatpush.msrb.mxu0 %v4935_v35  ;;  %2352 = vmatpush.msra.mxu2 %v4941_v10 }
0x179e   :  { %2277 = vmatpush.msra.mxu1 %v4871_v3 }
0x179f   :  { %2225 = vmatpush.msrb.mxu0 %v4947_v11  ;;  %2353 = vmatpush.msra.mxu2 %v4953_v34 }
0x17a1   :  { %2226 = vmatpush.msrb.mxu0 %v4959_v23  ;;  %2354 = vmatpush.msra.mxu2 %v4965_v4 }
0x17a3   :  { %2227 = vmatpush.msrb.mxu0 %v4971_v41  ;;  %2355 = vmatpush.msra.mxu2 %v4977_v26 }
0x1812   :  { %v1914_v12 = vpop.f32.mrf.mxu1 }
0x1819   :  { %v1837_v33 = vpop.f32.mrf.mxu0 }
0x181a   :  { %v1841_v24 = vrot.slane %v1837_v33, 7  ;;  %v1845_v42 = vadd.f32 %v1837_v33, %v5048_v51 }
0x181c   :  { %v1844_v50 = vadd.f32 %v1841_v24, %v5045_v47  ;;  %3864 = vtanh.f32 %v1845_v42 }
0x181e   :  { %3866 = vtanh.f32 %v1844_v50 }
0x181f   :  { %v1934_v54 = vpop.f32.mrf.mxu2 }
0x1820   :  { %v1935_v13 = vadd.f32 %v1934_v54, %v1914_v12 }
0x1822   :  { %v3865_v62 = vpop.eup %3864  ;;  %v1937_v30 = vadd.f32 %v4983_v25, %v1935_v13 }
0x1823   :  { %v1849_v39 = vmul.f32 %v3865_v62, %v4465_v46 }
0x1824   :  { %v3867_v38 = vpop.eup %3866  ;;  %3868 = vtanh.f32 %v1937_v30 }
0x1825   :  { %v1851_v58 = vadd.f32 %v1849_v39, %v4467_v48  ;;  %v1848_v44 = vmul.f32 %v3867_v38, %v4465_v46 }
0x1827   :  { %1864 = vrot.lane.b32.xlu1 %v1851_v58, %s4030_s1  ;;  %v1850_v31 = vadd.f32 %v1848_v44, %v4467_v48  ;;  %v1859_v63 = vmul.f32 %v1855_v22, %v1851_v58 }
0x1829   :  { %1862 = vrot.lane.b32.xlu0 %v1850_v31, %s4030_s1  ;;  %v1858_v16 = vmul.f32 %v1854_v28, %v1850_v31 }
0x182a   :  { %v3869_v1 = vpop.eup %3868 }
0x182b   :  { %v1939_v29 = vmul.f32 %v3869_v1, %v4465_v46 }
0x182d   :  { %v1940_v15 = vadd.f32 %v1939_v29, %v4467_v48 }
0x182f   :  { %1943 = vrot.lane.b32.xlu2 %v1940_v15, %s4030_s1  ;;  %v1941_v19 = vmul.f32 %v1940_v15, %v5076_v27 }
0x1889   :  { %v1944_v8 = vpop.permute.xlu2 %1943 }
0x188a   :  { %v1946_v61 = vmul.f32 %v1944_v8, %v1940_v15 }
0x188c   :  { %1948 = vrot.lane.b32.xlu2 %v1946_v61, %s4031_s22 }
0x1899   :  { %v1865_v2 = vpop.permute.xlu1 %1864 }
0x189a   :  { %v1869_v37 = vmul.f32 %v1865_v2, %v1851_v58 }
0x189b   :  { %v1863_v60 = vpop.permute.xlu0 %1862 }
0x189c   :  { %v1868_v7 = vmul.f32 %v1863_v60, %v1850_v31  ;;  %1874 = vrot.lane.b32.xlu1 %v1869_v37, %s4031_s22 }
0x189e   :  { %1872 = vrot.lane.b32.xlu0 %v1868_v7, %s4031_s22 }
0x18e6   :  { %v1949_v5 = vpop.permute.xlu2 %1948 }
0x18e7   :  { %v5122_v56 = vadd.f32 %v1949_v5, %v1941_v19 }
0x18e9   :  { %3870 = vtanh.f32 %v5122_v56 }
0x18ef   :  { %v3871_v32 = vpop.eup %3870 }
0x18f0   :  { %1954 = vrot.lane.b32.xlu2 %v3871_v32, %s4030_s1 }
0x190e   :  { %v1875_v43 = vpop.permute.xlu1 %1874 }
0x190f   :  { %v5128_v40 = vadd.f32 %v1875_v43, %v1859_v63 }
0x1910   :  { %v1873_v45 = vpop.permute.xlu0 %1872 }
0x1911   :  { %3872 = vtanh.f32 %v5128_v40  ;;  %v5131_v27 = vadd.f32 %v1873_v45, %v1858_v16 }
0x1913   :  { %3874 = vtanh.f32 %v5131_v27  ;;  %v2001_v22 = vrot.slane %v5131_v27, 7 }
0x1917   :  { %v3873_v14 = vpop.eup %3872 }
0x1918   :  { %1886 = vrot.lane.b32.xlu1 %v3873_v14, %s4030_s1 }
0x1919   :  { %v3875_v20 = vpop.eup %3874 }
0x191a   :  { %1884 = vrot.lane.b32.xlu0 %v3875_v20, %s4030_s1 }
0x194a   :  { %v1955_v9 = vpop.permute.xlu2 %1954 }
0x194b   :  { %v5136_v21 = vmul.f32 %v1955_v9, %v1940_v15  ;;  %v2002_v9 = vrot.slane %v5128_v40, 7 }
0x194d   :  { %2040 = vrot.lane.b32.xlu1 %v5136_v21, %s4031_s22 }
0x198a   :  { %v1887_v49 = vpop.permute.xlu1 %1886 }
0x198b   :  { %v1891_v53 = vmul.f32 %v1887_v49, %v1851_v58 }
0x198c   :  { %v1885_v6 = vpop.permute.xlu0 %1884 }
0x198d   :  { %v1890_v52 = vmul.f32 %v1885_v6, %v1850_v31 }
0x198f   :  { %v1960_v57 = vrot.slane %v1890_v52, 1 }
0x1991   :  { %v1961_v59 = vsel %vm639_vm5, %v1891_v53, %v1960_v57 }
0x1992   :  { %1962 = vrot.lane.b32.xlu0 %v1961_v59, %s4031_s22 }
0x19bf   :  { %v2041_v33 = vpop.permute.xlu1 %2040 }
0x19c0   :  { %3658 = vmatmul.msk.f32.vlgmr.msra.gmra.mxu0 %vm374_vm10, %v2041_v33 }
0x19c1   :  { %2422 = vmatpush.msra.mxu0 %v4853_v36 }
0x19c3   :  { %2423 = vmatpush.msra.mxu0 %v4859_v17 }
0x19c5   :  { %2424 = vmatpush.msra.mxu0 %v4865_v18 }
0x19c7   :  { %2425 = vmatpush.msra.mxu0 %v4871_v3 }
0x1a04   :  { %v1963_v24 = vpop.permute.xlu0 %1962 }
0x1a05   :  { %3657 = vmatmul.msk.f32.vlgmr.msrb.gmra.mxu3 %vm374_vm10, %v1963_v24  ;;  %3659 = vmatmul.msk.f32.vlgmr.msrb.gmra.mxu1 %vm374_vm10, %v1963_v24 }
0x1a06   :  { %2372 = vmatpush.msrb.mxu3 %v4935_v35  ;;  %2500 = vmatpush.msrb.mxu1 %v4941_v10 }
0x1a08   :  { %2373 = vmatpush.msrb.mxu3 %v4947_v11  ;;  %2501 = vmatpush.msrb.mxu1 %v4953_v34 }
0x1a0a   :  { %2374 = vmatpush.msrb.mxu3 %v4959_v23  ;;  %2502 = vmatpush.msrb.mxu1 %v4965_v4 }
0x1a0c   :  { %2375 = vmatpush.msrb.mxu3 %v4971_v41  ;;  %2503 = vmatpush.msrb.mxu1 %v4977_v26 }
0x1a3d   :  { %v2061_v42 = vpop.f32.mrf.mxu0 }
0x1a82   :  { %v2081_v50 = vpop.f32.mrf.mxu1 }
0x1a83   :  { %v2082_v12 = vadd.f32 %v2081_v50, %v2061_v42 }
0x1a85   :  { %v2084_v54 = vadd.f32 %v4983_v25, %v2082_v12 }
0x1a87   :  { %3876 = vtanh.f32 %v2084_v54 }
0x1a88   :  { %v1983_v13 = vpop.f32.mrf.mxu3 }
0x1a89   :  { %v1987_v62 = vrot.slane %v1983_v13, 6  ;;  %v1988_v30 = vrot.slane %v1983_v13, 7 }
0x1a8b   :  { %v1991_v39 = vadd.f32 %v1987_v62, %v5045_v47  ;;  %v1992_v38 = vadd.f32 %v1988_v30, %v5048_v51 }
0x1a8d   :  { %v3877_v58 = vpop.eup %3876  ;;  %3878 = vtanh.f32 %v1991_v39 }
0x1a8e   :  { %3880 = vtanh.f32 %v1992_v38  ;;  %v2086_v44 = vmul.f32 %v3877_v58, %v4465_v46 }
0x1a90   :  { %v2087_v31 = vadd.f32 %v2086_v44, %v4467_v48 }
0x1a92   :  { %2090 = vrot.lane.b32.xlu1 %v2087_v31, %s4030_s1  ;;  %v2088_v45 = vmul.f32 %v2087_v31, %v5122_v56 }
0x1a93   :  { %v3879_v1 = vpop.eup %3878 }
0x1a94   :  { %v3881_v29 = vpop.eup %3880  ;;  %v1995_v15 = vmul.f32 %v3879_v1, %v4465_v46 }
0x1a95   :  { %v1996_v8 = vmul.f32 %v3881_v29, %v4465_v46 }
0x1a96   :  { %v1997_v61 = vadd.f32 %v1995_v15, %v4467_v48 }
0x1a97   :  { %v1998_v2 = vadd.f32 %v1996_v8, %v4467_v48 }
0x1a98   :  { %2009 = vrot.lane.b32.xlu2 %v1997_v61, %s4030_s1  ;;  %v2005_v28 = vmul.f32 %v2001_v22, %v1997_v61 }
0x1a99   :  { %2011 = vrot.lane.b32.xlu0 %v1998_v2, %s4030_s1  ;;  %v2006_v49 = vmul.f32 %v2002_v9, %v1998_v2 }
0x1af2   :  { %v2010_v37 = vpop.permute.xlu2 %2009 }
0x1af3   :  { %v2015_v60 = vmul.f32 %v2010_v37, %v1997_v61 }
0x1af5   :  { %2019 = vrot.lane.b32.xlu2 %v2015_v60, %s4031_s22 }
0x1b04   :  { %v2091_v7 = vpop.permute.xlu1 %2090 }
0x1b05   :  { %v2093_v19 = vmul.f32 %v2091_v7, %v2087_v31 }
0x1b07   :  { %2095 = vrot.lane.b32.xlu1 %v2093_v19, %s4031_s22 }
0x1b0b   :  { %v2012_v5 = vpop.permute.xlu0 %2011 }
0x1b0c   :  { %v2016_v32 = vmul.f32 %v2012_v5, %v1998_v2 }
0x1b0e   :  { %2021 = vrot.lane.b32.xlu0 %v2016_v32, %s4031_s22 }
0x1b4f   :  { %v2020_v63 = vpop.permute.xlu2 %2019 }
0x1b50   :  { %v5173_v43 = vadd.f32 %v2020_v63, %v2005_v28 }
0x1b52   :  { %3882 = vtanh.f32 %v5173_v43 }
0x1b58   :  { %v3883_v16 = vpop.eup %3882 }
0x1b59   :  { %2031 = vrot.lane.b32.xlu2 %v3883_v16, %s4030_s1 }
0x1b79   :  { %v2096_v14 = vpop.permute.xlu1 %2095 }
0x1b7a   :  { %v5178_v20 = vadd.f32 %v2096_v14, %v2088_v45 }
0x1b7c   :  { %3884 = vtanh.f32 %v5178_v20 }
0x1b80   :  { %v2022_v27 = vpop.permute.xlu0 %2021 }
0x1b81   :  { %v5182_v6 = vadd.f32 %v2022_v27, %v2006_v49 }
0x1b82   :  { %v3885_v52 = vpop.eup %3884 }
0x1b83   :  { %3886 = vtanh.f32 %v5182_v6  ;;  %2101 = vrot.lane.b32.xlu1 %v3885_v52, %s4030_s1  ;;  %v2150_v14 = vrot.slane %v5182_v6, 7 }
0x1b89   :  { %v3887_v53 = vpop.eup %3886 }
0x1b8a   :  { %2033 = vrot.lane.b32.xlu0 %v3887_v53, %s4030_s1  ;;  %v2149_v53 = vrot.slane %v5173_v43, 7 }
0x1bb3   :  { %v2032_v59 = vpop.permute.xlu2 %2031 }
0x1bb4   :  { %v2037_v40 = vmul.f32 %v2032_v59, %v1997_v61 }
0x1bb6   :  { %v2107_v42 = vrot.slane %v2037_v40, 2 }
0x1bf5   :  { %v2102_v56 = vpop.permute.xlu1 %2101 }
0x1bf6   :  { %v5187_v57 = vmul.f32 %v2102_v56, %v2087_v31 }
0x1bf8   :  { %2188 = vrot.lane.b32.xlu0 %v5187_v57, %s4031_s22 }
0x1bfc   :  { %v2034_v33 = vpop.permute.xlu0 %2033 }
0x1bfd   :  { %v2038_v24 = vmul.f32 %v2034_v33, %v1998_v2 }
0x1bff   :  { %v2108_v50 = vrot.slane %v2038_v24, 1 }
0x1c01   :  { %v2109_v12 = vsel %vm639_vm5, %v2108_v50, %v2107_v42 }
0x1c02   :  { %2110 = vrot.lane.b32.xlu2 %v2109_v12, %s4031_s22 }
0x1c5c   :  { %v2111_v54 = vpop.permute.xlu2 %2110 }
0x1c5d   :  { %3660 = vmatmul.msk.f32.vlgmr.msrb.gmra.mxu2 %vm374_vm10, %v2111_v54  ;;  %3662 = vmatmul.msk.f32.vlgmr.msrb.gmra.mxu0 %vm374_vm10, %v2111_v54 }
0x1c5e   :  { %2520 = vmatpush.msrb.mxu2 %v4935_v35  ;;  %2648 = vmatpush.msrb.mxu0 %v4941_v10 }
0x1c60   :  { %2521 = vmatpush.msrb.mxu2 %v4947_v11  ;;  %2649 = vmatpush.msrb.mxu0 %v4953_v34 }
0x1c62   :  { %2522 = vmatpush.msrb.mxu2 %v4959_v23  ;;  %2650 = vmatpush.msrb.mxu0 %v4965_v4 }
0x1c64   :  { %2523 = vmatpush.msrb.mxu2 %v4971_v41  ;;  %2651 = vmatpush.msrb.mxu0 %v4977_v26 }
0x1c6a   :  { %v2189_v13 = vpop.permute.xlu0 %2188 }
0x1c6b   :  { %3661 = vmatmul.msk.f32.vlgmr.msra.gmra.mxu3 %vm374_vm10, %v2189_v13 }
0x1c6c   :  { %2570 = vmatpush.msra.mxu3 %v4853_v36 }
0x1c6e   :  { %2571 = vmatpush.msra.mxu3 %v4859_v17 }
0x1c70   :  { %2572 = vmatpush.msra.mxu3 %v4865_v18 }
0x1c72   :  { %2573 = vmatpush.msra.mxu3 %v4871_v3 }
0x1cda   :  { %v2229_v15 = vpop.f32.mrf.mxu0 }
0x1ce0   :  { %v2131_v62 = vpop.f32.mrf.mxu2 }
0x1ce1   :  { %v2135_v30 = vrot.slane %v2131_v62, 5  ;;  %v2136_v39 = vrot.slane %v2131_v62, 6 }
0x1ce3   :  { %v2139_v38 = vadd.f32 %v2135_v30, %v5045_v47  ;;  %v2140_v58 = vadd.f32 %v2136_v39, %v5048_v51 }
0x1ce5   :  { %3888 = vtanh.f32 %v2139_v38  ;;  %v2967_v38 = vperm.slane %v5187_v57, 0 }
0x1ce6   :  { %3890 = vtanh.f32 %v2140_v58 }
0x1ceb   :  { %v3889_v44 = vpop.eup %3888 }
0x1cec   :  { %v3891_v31 = vpop.eup %3890  ;;  %v2143_v1 = vmul.f32 %v3889_v44, %v4465_v46 }
0x1ced   :  { %v2144_v29 = vmul.f32 %v3891_v31, %v4465_v46 }
0x1cee   :  { %v2209_v8 = vpop.f32.mrf.mxu3  ;;  %v2145_v61 = vadd.f32 %v2143_v1, %v4467_v48 }
0x1cef   :  { %v2230_v2 = vadd.f32 %v2229_v15, %v2209_v8  ;;  %v2146_v37 = vadd.f32 %v2144_v29, %v4467_v48  ;;  %v2929_v15 = vrot.slane %v5136_v21, 1  ;;  %v3011_v8 = vsel %vm2995_vm6, %v5136_v21, %v2967_v38 }
0x1cf0   :  { %2157 = vrot.lane.b32.xlu1 %v2145_v61, %s4030_s1  ;;  %v2153_v56 = vmul.f32 %v2149_v53, %v2145_v61 }
0x1cf1   :  { %v2232_v60 = vadd.f32 %v4983_v25, %v2230_v2  ;;  %2159 = vrot.lane.b32.xlu2 %v2146_v37, %s4030_s1  ;;  %v2154_v9 = vmul.f32 %v2150_v14, %v2146_v37 }
0x1cf3   :  { %3892 = vtanh.f32 %v2232_v60 }
0x1cf9   :  { %v3893_v7 = vpop.eup %3892 }
0x1cfa   :  { %v2234_v19 = vmul.f32 %v3893_v7, %v4465_v46 }
0x1cfc   :  { %v2235_v5 = vadd.f32 %v2234_v19, %v4467_v48 }
0x1cfe   :  { %2238 = vrot.lane.b32.xlu0 %v2235_v5, %s4030_s1  ;;  %v2236_v6 = vmul.f32 %v2235_v5, %v5178_v20  ;;  %v2931_v20 = vrot.slane %v5187_v57, 1 }
0x1d00   :  { %v2968_v31 = vperm.slane %v2931_v20, 0 }
0x1d4b   :  { %v2160_v32 = vpop.permute.xlu2 %2159 }
0x1d4c   :  { %v2164_v22 = vmul.f32 %v2160_v32, %v2146_v37 }
0x1d4e   :  { %2169 = vrot.lane.b32.xlu2 %v2164_v22, %s4031_s22 }
0x1d62   :  { %v2158_v28 = vpop.permute.xlu1 %2157 }
0x1d63   :  { %v2163_v63 = vmul.f32 %v2158_v28, %v2145_v61 }
0x1d65   :  { %2167 = vrot.lane.b32.xlu1 %v2163_v63, %s4031_s22 }
0x1d70   :  { %v2239_v16 = vpop.permute.xlu0 %2238 }
0x1d71   :  { %v2241_v45 = vmul.f32 %v2239_v16, %v2235_v5 }
0x1d73   :  { %2243 = vrot.lane.b32.xlu0 %v2241_v45, %s4031_s22 }
0x1da8   :  { %v2170_v49 = vpop.permute.xlu2 %2169 }
0x1da9   :  { %v5224_v27 = vadd.f32 %v2170_v49, %v2154_v9 }
0x1dab   :  { %3894 = vtanh.f32 %v5224_v27 }
0x1db1   :  { %v3895_v52 = vpop.eup %3894 }
0x1db2   :  { %2181 = vrot.lane.b32.xlu2 %v3895_v52, %s4030_s1 }
0x1dd7   :  { %v2168_v59 = vpop.permute.xlu1 %2167 }
0x1dd8   :  { %v5229_v40 = vadd.f32 %v2168_v59, %v2153_v56 }
0x1dda   :  { %3896 = vtanh.f32 %v5229_v40 }
0x1de0   :  { %v3897_v33 = vpop.eup %3896 }
0x1de1   :  { %2179 = vrot.lane.b32.xlu1 %v3897_v33, %s4030_s1 }
0x1de5   :  { %v2244_v24 = vpop.permute.xlu0 %2243 }
0x1de6   :  { %v5234_v42 = vadd.f32 %v2244_v24, %v2236_v6 }
0x1de8   :  { %3898 = vtanh.f32 %v5234_v42 }
0x1dee   :  { %v3899_v50 = vpop.eup %3898 }
0x1def   :  { %2249 = vrot.lane.b32.xlu0 %v3899_v50, %s4030_s1 }
0x1e0c   :  { %v2182_v43 = vpop.permute.xlu2 %2181 }
0x1e0d   :  { %v2186_v12 = vmul.f32 %v2182_v43, %v2146_v37  ;;  %v3012_v37 = vsel %vm2995_vm6, %v2929_v15, %v2968_v31 }
0x1e0f   :  { %v2256_v62 = vrot.slane %v2186_v12, 2 }
0x1e53   :  { %v2180_v54 = vpop.permute.xlu1 %2179 }
0x1e54   :  { %v2185_v13 = vmul.f32 %v2180_v54, %v2145_v61 }
0x1e56   :  { %v2255_v30 = vrot.slane %v2185_v13, 3  ;;  %v2297_v13 = vrot.slane %v5229_v40, 7 }
0x1e58   :  { %v2257_v39 = vsel %vm639_vm5, %v2256_v62, %v2255_v30  ;;  %v2298_v62 = vrot.slane %v5224_v27, 7 }
0x1e59   :  { %2258 = vrot.lane.b32.xlu1 %v2257_v39, %s4031_s22 }
0x1e61   :  { %v2250_v58 = vpop.permute.xlu0 %2249 }
0x1e62   :  { %v2252_v44 = vmul.f32 %v2250_v58, %v2235_v5 }
0x1e64   :  { %v2932_v1 = vrot.slane %v2252_v44, 1  ;;  %v2971_v29 = vperm.slane %v2252_v44, 0  ;;  %2336 = vrot.lane.b32.xlu2 %v2252_v44, %s4031_s22 }
0x1e66   :  { %v2972_v61 = vperm.slane %v2932_v1, 0  ;;  %v5247_v2 = vsel %vm73_vm0, %v3011_v8, %v2971_v29 }
0x1e68   :  { %v5251_v57 = vsel %vm73_vm0, %v3012_v37, %v2972_v61 }
0x1ebe   :  { %v2337_v60 = vpop.permute.xlu2 %2336 }
0x1ebf   :  { %3664 = vmatmul.msk.f32.vlgmr.msra.gmra.mxu2 %vm374_vm10, %v2337_v60 }
0x1ec0   :  { %2718 = vmatpush.msra.mxu2 %v4853_v36 }
0x1ec2   :  { %2719 = vmatpush.msra.mxu2 %v4859_v17 }
0x1ec4   :  { %2720 = vmatpush.msra.mxu2 %v4865_v18 }
0x1ec6   :  { %2721 = vmatpush.msra.mxu2 %v4871_v3 }
0x1ecb   :  { %v2259_v21 = vpop.permute.xlu1 %2258 }
0x1ecc   :  { %3663 = vmatmul.msk.f32.vlgmr.msra.gmra.mxu1 %vm374_vm10, %v2259_v21  ;;  %3665 = vmatmul.msk.f32.vlgmr.msrb.gmra.mxu3 %vm374_vm10, %v2259_v21 }
0x1ecd   :  { %2668 = vmatpush.msra.mxu1 %v4935_v35  ;;  %2796 = vmatpush.msrb.mxu3 %v4941_v10 }
0x1ecf   :  { %2669 = vmatpush.msra.mxu1 %v4947_v11  ;;  %2797 = vmatpush.msrb.mxu3 %v4953_v34 }
0x1ed1   :  { %2670 = vmatpush.msra.mxu1 %v4959_v23  ;;  %2798 = vmatpush.msrb.mxu3 %v4965_v4 }
0x1ed3   :  { %2671 = vmatpush.msra.mxu1 %v4971_v41  ;;  %2799 = vmatpush.msrb.mxu3 %v4977_v26 }
0x1f42   :  { %v2357_v19 = vpop.f32.mrf.mxu2 }
0x1f49   :  { %v2279_v36 = vpop.f32.mrf.mxu1 }
0x1f4a   :  { %v2283_v17 = vrot.slane %v2279_v36, 4  ;;  %v2284_v18 = vrot.slane %v2279_v36, 5 }
0x1f4c   :  { %v2287_v3 = vadd.f32 %v2283_v17, %v5045_v47  ;;  %v2288_v7 = vadd.f32 %v2284_v18, %v5048_v51 }
0x1f4e   :  { %3900 = vtanh.f32 %v2287_v3 }
0x1f4f   :  { %3902 = vtanh.f32 %v2288_v7  ;;  %v2377_v5 = vpop.f32.mrf.mxu3 }
0x1f50   :  { %v2378_v32 = vadd.f32 %v2377_v5, %v2357_v19 }
0x1f52   :  { %v2380_v22 = vadd.f32 %v4983_v25, %v2378_v32 }
0x1f54   :  { %v3901_v28 = vpop.eup %3900  ;;  %3904 = vtanh.f32 %v2380_v22 }
0x1f55   :  { %v3903_v63 = vpop.eup %3902  ;;  %v2291_v16 = vmul.f32 %v3901_v28, %v4465_v46 }
0x1f56   :  { %v2292_v45 = vmul.f32 %v3903_v63, %v4465_v46 }
0x1f57   :  { %v2293_v14 = vadd.f32 %v2291_v16, %v4467_v48 }
0x1f58   :  { %v2294_v9 = vadd.f32 %v2292_v45, %v4467_v48 }
0x1f59   :  { %2305 = vrot.lane.b32.xlu0 %v2293_v14, %s4030_s1  ;;  %v2301_v30 = vmul.f32 %v2297_v13, %v2293_v14 }
0x1f5a   :  { %v3905_v49 = vpop.eup %3904  ;;  %2307 = vrot.lane.b32.xlu1 %v2294_v9, %s4030_s1  ;;  %v2302_v39 = vmul.f32 %v2298_v62, %v2294_v9 }
0x1f5b   :  { %v2382_v52 = vmul.f32 %v3905_v49, %v4465_v46 }
0x1f5d   :  { %v2383_v25 = vadd.f32 %v2382_v52, %v4467_v48 }
0x1f5f   :  { %2386 = vrot.lane.b32.xlu2 %v2383_v25, %s4030_s1  ;;  %v2384_v50 = vmul.f32 %v2383_v25, %v5234_v42 }
0x1fb9   :  { %v2387_v53 = vpop.permute.xlu2 %2386 }
0x1fba   :  { %v2389_v56 = vmul.f32 %v2387_v53, %v2383_v25 }
0x1fbc   :  { %2391 = vrot.lane.b32.xlu2 %v2389_v56, %s4031_s22 }
0x1fcb   :  { %v2306_v59 = vpop.permute.xlu0 %2305 }
0x1fcc   :  { %v2308_v33 = vpop.permute.xlu1 %2307  ;;  %v2311_v6 = vmul.f32 %v2306_v59, %v2293_v14 }
0x1fcd   :  { %v2312_v24 = vmul.f32 %v2308_v33, %v2294_v9 }
0x1fce   :  { %2315 = vrot.lane.b32.xlu0 %v2311_v6, %s4031_s22 }
0x1fcf   :  { %2317 = vrot.lane.b32.xlu1 %v2312_v24, %s4031_s22 }
0x2016   :  { %v2392_v43 = vpop.permute.xlu2 %2391 }
0x2017   :  { %v5284_v12 = vadd.f32 %v2392_v43, %v2384_v50 }
0x2019   :  { %3906 = vtanh.f32 %v5284_v12 }
0x201f   :  { %v3907_v54 = vpop.eup %3906 }
0x2020   :  { %2397 = vrot.lane.b32.xlu2 %v3907_v54, %s4030_s1 }
0x2040   :  { %v2316_v20 = vpop.permute.xlu0 %2315 }
0x2041   :  { %v2318_v38 = vpop.permute.xlu1 %2317  ;;  %v5290_v58 = vadd.f32 %v2316_v20, %v2301_v30 }
0x2042   :  { %v5292_v44 = vadd.f32 %v2318_v38, %v2302_v39 }
0x2043   :  { %3908 = vtanh.f32 %v5290_v58  ;;  %v2445_v33 = vrot.slane %v5290_v58, 7 }
0x2044   :  { %3910 = vtanh.f32 %v5292_v44  ;;  %v2446_v54 = vrot.slane %v5292_v44, 7 }
0x2049   :  { %v3909_v42 = vpop.eup %3908 }
0x204a   :  { %v3911_v31 = vpop.eup %3910  ;;  %2327 = vrot.lane.b32.xlu0 %v3909_v42, %s4030_s1 }
0x204b   :  { %2329 = vrot.lane.b32.xlu1 %v3911_v31, %s4030_s1 }
0x207a   :  { %v2398_v40 = vpop.permute.xlu2 %2397 }
0x207b   :  { %v2400_v27 = vmul.f32 %v2398_v40, %v2383_v25 }
0x207d   :  { %v2933_v1 = vrot.slane %v2400_v27, 1  ;;  %v2975_v29 = vperm.slane %v2400_v27, 0  ;;  %2484 = vrot.lane.b32.xlu1 %v2400_v27, %s4031_s22 }
0x207f   :  { %v2976_v15 = vperm.slane %v2933_v1, 0  ;;  %v5301_v8 = vsel %vm3000_vm7, %v5247_v2, %v2975_v29 }
0x2081   :  { %v5305_v61 = vsel %vm3000_vm7, %v5251_v57, %v2976_v15 }
0x20bc   :  { %v2328_v37 = vpop.permute.xlu0 %2327 }
0x20bd   :  { %v2330_v60 = vpop.permute.xlu1 %2329  ;;  %v2333_v21 = vmul.f32 %v2328_v37, %v2293_v14 }
0x20be   :  { %v2334_v36 = vmul.f32 %v2330_v60, %v2294_v9 }
0x20bf   :  { %v2403_v17 = vrot.slane %v2333_v21, 4 }
0x20c0   :  { %v2404_v18 = vrot.slane %v2334_v36, 3 }
0x20c2   :  { %v2405_v3 = vsel %vm639_vm5, %v2404_v18, %v2403_v17 }
0x20c3   :  { %2406 = vrot.lane.b32.xlu0 %v2405_v3, %s4031_s22 }
0x20ef   :  { %v2485_v7 = vpop.permute.xlu1 %2484 }
0x20f0   :  { %3667 = vmatmul.msk.f32.vlgmr.msrb.gmra.mxu1 %vm374_vm10, %v2485_v7 }
0x20f1   :  { %2862 = vmatpush.msrb.mxu1 %v4941_v10 }
0x20f3   :  { %2863 = vmatpush.msrb.mxu1 %v4953_v34 }
0x20f5   :  { %2864 = vmatpush.msrb.mxu1 %v4965_v4 }
0x20f7   :  { %2865 = vmatpush.msrb.mxu1 %v4977_v26 }
0x2135   :  { %v2407_v2 = vpop.permute.xlu0 %2406 }
0x2136   :  { %3666 = vmatmul.msk.f32.vlgmr.msra.gmra.mxu0 %vm374_vm10, %v2407_v2  ;;  %3668 = vmatmul.msk.f32.vlgmr.msrb.gmra.mxu2 %vm374_vm10, %v2407_v2 }
0x2137   :  { %2816 = vmatpush.msra.mxu0 %v4935_v35  ;;  %2891 = vmatpush.msrb.mxu2 %v4935_v35 }
0x2139   :  { %2817 = vmatpush.msra.mxu0 %v4947_v11  ;;  %2892 = vmatpush.msrb.mxu2 %v4947_v11 }
0x213b   :  { %2818 = vmatpush.msra.mxu0 %v4959_v23  ;;  %2893 = vmatpush.msrb.mxu2 %v4959_v23  ;;  %v5329_v23 = vld [vmem:[%s5630_s12] ss:$0 sm:$0xff] }
0x213d   :  { %2819 = vmatpush.msra.mxu0 %v4971_v41  ;;  %2894 = vmatpush.msrb.mxu2 %v4971_v41 }
0x216d   :  { %v2505_v35 = vpop.f32.mrf.mxu1 }
0x21b3   :  { %v2427_v10 = vpop.f32.mrf.mxu0 }
0x21b4   :  { %v2431_v34 = vrot.slane %v2427_v10, 3  ;;  %v2432_v4 = vrot.slane %v2427_v10, 4 }
0x21b6   :  { %v2435_v26 = vadd.f32 %v2431_v34, %v5045_v47  ;;  %v2436_v57 = vadd.f32 %v2432_v4, %v5048_v51 }
0x21b8   :  { %3912 = vtanh.f32 %v2435_v26 }
0x21b9   :  { %3914 = vtanh.f32 %v2436_v57  ;;  %v2525_v19 = vpop.f32.mrf.mxu2 }
0x21ba   :  { %v2526_v11 = vadd.f32 %v2525_v19, %v2505_v35 }
0x21bc   :  { %v2528_v5 = vadd.f32 %v5329_v23, %v2526_v11 }
0x21be   :  { %v3913_v41 = vpop.eup %3912  ;;  %3916 = vtanh.f32 %v2528_v5 }
0x21bf   :  { %v3915_v32 = vpop.eup %3914  ;;  %v2439_v22 = vmul.f32 %v3913_v41, %v4465_v46 }
0x21c0   :  { %v2440_v28 = vmul.f32 %v3915_v32, %v4465_v46 }
0x21c1   :  { %v2441_v63 = vadd.f32 %v2439_v22, %v4467_v48 }
0x21c2   :  { %v2442_v16 = vadd.f32 %v2440_v28, %v4467_v48 }
0x21c3   :  { %2453 = vrot.lane.b32.xlu2 %v2441_v63, %s4030_s1  ;;  %v2449_v6 = vmul.f32 %v2445_v33, %v2441_v63 }
0x21c4   :  { %v3917_v45 = vpop.eup %3916  ;;  %2455 = vrot.lane.b32.xlu0 %v2442_v16, %s4030_s1  ;;  %v2450_v13 = vmul.f32 %v2446_v54, %v2442_v16 }
0x21c5   :  { %v2530_v14 = vmul.f32 %v3917_v45, %v4465_v46 }
0x21c7   :  { %v2531_v9 = vadd.f32 %v2530_v14, %v4467_v48 }
0x21c9   :  { %2534 = vrot.lane.b32.xlu1 %v2531_v9, %s4030_s1  ;;  %v2532_v39 = vmul.f32 %v2531_v9, %v5284_v12 }
0x221d   :  { %v2454_v49 = vpop.permute.xlu2 %2453 }
0x221e   :  { %v2459_v52 = vmul.f32 %v2454_v49, %v2441_v63 }
0x2220   :  { %2463 = vrot.lane.b32.xlu2 %v2459_v52, %s4031_s22 }
0x2236   :  { %v2456_v25 = vpop.permute.xlu0 %2455 }
0x2237   :  { %v2460_v53 = vmul.f32 %v2456_v25, %v2442_v16 }
0x2239   :  { %2465 = vrot.lane.b32.xlu0 %v2460_v53, %s4031_s22 }
0x223b   :  { %v2535_v56 = vpop.permute.xlu1 %2534 }
0x223c   :  { %v2537_v59 = vmul.f32 %v2535_v56, %v2531_v9 }
0x223e   :  { %2539 = vrot.lane.b32.xlu1 %v2537_v59, %s4031_s22 }
0x227a   :  { %v2464_v24 = vpop.permute.xlu2 %2463 }
0x227b   :  { %v5345_v50 = vadd.f32 %v2464_v24, %v2449_v6 }
0x227d   :  { %3918 = vtanh.f32 %v5345_v50  ;;  %v2593_v24 = vrot.slane %v5345_v50, 7 }
0x2283   :  { %v3919_v43 = vpop.eup %3918 }
0x2284   :  { %2475 = vrot.lane.b32.xlu2 %v3919_v43, %s4030_s1 }
0x22ab   :  { %v2466_v62 = vpop.permute.xlu0 %2465 }
0x22ac   :  { %v5350_v30 = vadd.f32 %v2466_v62, %v2450_v13 }
0x22ae   :  { %3920 = vtanh.f32 %v5350_v30  ;;  %v2594_v53 = vrot.slane %v5350_v30, 7 }
0x22b0   :  { %v2540_v20 = vpop.permute.xlu1 %2539 }
0x22b1   :  { %v5354_v38 = vadd.f32 %v2540_v20, %v2532_v39 }
0x22b3   :  { %3922 = vtanh.f32 %v5354_v38 }
0x22b4   :  { %v3921_v58 = vpop.eup %3920 }
0x22b5   :  { %2477 = vrot.lane.b32.xlu0 %v3921_v58, %s4030_s1 }
0x22b9   :  { %v3923_v42 = vpop.eup %3922 }
0x22ba   :  { %2545 = vrot.lane.b32.xlu1 %v3923_v42, %s4030_s1 }
0x22de   :  { %v2476_v44 = vpop.permute.xlu2 %2475 }
0x22df   :  { %v2481_v31 = vmul.f32 %v2476_v44, %v2441_v63 }
0x22e1   :  { %v2551_v1 = vrot.slane %v2481_v31, 5 }
0x2327   :  { %v2478_v40 = vpop.permute.xlu0 %2477 }
0x2328   :  { %v2482_v27 = vmul.f32 %v2478_v40, %v2442_v16 }
0x232a   :  { %v2552_v29 = vrot.slane %v2482_v27, 4 }
0x232c   :  { %v2546_v15 = vpop.permute.xlu1 %2545  ;;  %v2553_v12 = vsel %vm639_vm5, %v2552_v29, %v2551_v1 }
0x232d   :  { %v2548_v37 = vmul.f32 %v2546_v15, %v2531_v9  ;;  %2554 = vrot.lane.b32.xlu2 %v2553_v12, %s4031_s22 }
0x232f   :  { %v2934_v60 = vrot.slane %v2548_v37, 1  ;;  %v2979_v21 = vperm.slane %v2548_v37, 0  ;;  %2632 = vrot.lane.b32.xlu0 %v2548_v37, %s4031_s22 }
0x2331   :  { %v2980_v36 = vperm.slane %v2934_v60, 0  ;;  %v5364_v17 = vsel %vm163_vm4, %v5301_v8, %v2979_v21 }
0x2333   :  { %v5368_v18 = vsel %vm163_vm4, %v5305_v61, %v2980_v36 }
0x2387   :  { %v2555_v3 = vpop.permute.xlu2 %2554 }
0x2388   :  { %3669 = vmatmul.msk.f32.vlgmr.msra.gmra.mxu3 %vm374_vm10, %v2555_v3  ;;  %3671 = vmatmul.msk.f32.vlgmr.msra.gmra.mxu1 %vm374_vm10, %v2555_v3 }
0x23a1   :  { %v2633_v7 = vpop.permute.xlu0 %2632 }
0x23a2   :  { %3670 = vmatmul.msk.f32.vlgmr.msrb.gmra.mxu0 %vm374_vm10, %v2633_v7 }
0x2405   :  { %v2673_v5 = vpop.f32.mrf.mxu1 }
0x240b   :  { %v2575_v2 = vpop.f32.mrf.mxu3 }
0x240c   :  { %v2579_v10 = vrot.slane %v2575_v2, 2  ;;  %v2580_v34 = vrot.slane %v2575_v2, 3 }
0x240e   :  { %v2583_v4 = vadd.f32 %v2579_v10, %v5045_v47  ;;  %v2584_v8 = vadd.f32 %v2580_v34, %v5048_v51 }
0x2410   :  { %3924 = vtanh.f32 %v2583_v4 }
0x2411   :  { %3926 = vtanh.f32 %v2584_v8 }
0x2416   :  { %v3925_v26 = vpop.eup %3924 }
0x2417   :  { %v3927_v61 = vpop.eup %3926  ;;  %v2587_v57 = vmul.f32 %v3925_v26, %v4465_v46 }
0x2418   :  { %v2588_v35 = vmul.f32 %v3927_v61, %v4465_v46 }
0x2419   :  { %v2589_v19 = vadd.f32 %v2587_v57, %v4467_v48 }
0x241a   :  { %v2590_v11 = vadd.f32 %v2588_v35, %v4467_v48 }
0x241b   :  { %2601 = vrot.lane.b32.xlu1 %v2589_v19, %s4030_s1  ;;  %v2597_v43 = vmul.f32 %v2593_v24, %v2589_v19 }
0x241c   :  { %2603 = vrot.lane.b32.xlu2 %v2590_v11, %s4030_s1  ;;  %v2598_v56 = vmul.f32 %v2594_v53, %v2590_v11 }
0x241f   :  { %v2653_v41 = vpop.f32.mrf.mxu0 }
0x2420   :  { %v2674_v32 = vadd.f32 %v2673_v5, %v2653_v41 }
0x2422   :  { %v2676_v22 = vadd.f32 %v5329_v23, %v2674_v32 }
0x2424   :  { %3928 = vtanh.f32 %v2676_v22 }
0x242a   :  { %v3929_v28 = vpop.eup %3928 }
0x242b   :  { %v2678_v63 = vmul.f32 %v3929_v28, %v4465_v46 }
0x242d   :  { %v2679_v16 = vadd.f32 %v2678_v63, %v4467_v48 }
0x242f   :  { %2682 = vrot.lane.b32.xlu0 %v2679_v16, %s4030_s1  ;;  %v2680_v30 = vmul.f32 %v2679_v16, %v5354_v38 }
0x2476   :  { %v2604_v45 = vpop.permute.xlu2 %2603 }
0x2477   :  { %v2608_v14 = vmul.f32 %v2604_v45, %v2590_v11 }
0x2479   :  { %2613 = vrot.lane.b32.xlu2 %v2608_v14, %s4031_s22 }
0x248d   :  { %v2602_v9 = vpop.permute.xlu1 %2601 }
0x248e   :  { %v2607_v49 = vmul.f32 %v2602_v9, %v2589_v19 }
0x2490   :  { %2611 = vrot.lane.b32.xlu1 %v2607_v49, %s4031_s22 }
0x24a1   :  { %v2683_v52 = vpop.permute.xlu0 %2682 }
0x24a2   :  { %v2685_v25 = vmul.f32 %v2683_v52, %v2679_v16 }
0x24a4   :  { %2687 = vrot.lane.b32.xlu0 %v2685_v25, %s4031_s22 }
0x24d3   :  { %v2614_v59 = vpop.permute.xlu2 %2613 }
0x24d4   :  { %v5389_v33 = vadd.f32 %v2614_v59, %v2598_v56 }
0x24d6   :  { %3930 = vtanh.f32 %v5389_v33  ;;  %v2742_v53 = vrot.slane %v5389_v33, 7 }
0x24dc   :  { %v3931_v6 = vpop.eup %3930 }
0x24dd   :  { %2625 = vrot.lane.b32.xlu2 %v3931_v6, %s4030_s1 }
0x2502   :  { %v2612_v54 = vpop.permute.xlu1 %2611 }
0x2503   :  { %v5394_v13 = vadd.f32 %v2612_v54, %v2597_v43 }
0x2505   :  { %3932 = vtanh.f32 %v5394_v13  ;;  %v2741_v25 = vrot.slane %v5394_v13, 7 }
0x250b   :  { %v3933_v62 = vpop.eup %3932 }
0x250c   :  { %2623 = vrot.lane.b32.xlu1 %v3933_v62, %s4030_s1 }
0x2516   :  { %v2688_v39 = vpop.permute.xlu0 %2687 }
0x2517   :  { %v2690_v20 = vadd.f32 %v2688_v39, %v2680_v30 }
0x2519   :  { %3934 = vtanh.f32 %v2690_v20 }
0x251f   :  { %v3935_v58 = vpop.eup %3934 }
0x2520   :  { %2693 = vrot.lane.b32.xlu0 %v3935_v58, %s4030_s1 }
0x2537   :  { %v2626_v42 = vpop.permute.xlu2 %2625 }
0x2538   :  { %v2630_v44 = vmul.f32 %v2626_v42, %v2590_v11 }
0x253a   :  { %v2700_v40 = vrot.slane %v2630_v44, 5 }
0x257e   :  { %v2624_v50 = vpop.permute.xlu1 %2623 }
0x257f   :  { %v2629_v31 = vmul.f32 %v2624_v50, %v2589_v19 }
0x2581   :  { %v2699_v27 = vrot.slane %v2629_v31, 6 }
0x2583   :  { %v2701_v1 = vsel %vm639_vm5, %v2700_v40, %v2699_v27 }
0x2584   :  { %2702 = vrot.lane.b32.xlu1 %v2701_v1, %s4031_s22 }
0x2592   :  { %v2694_v29 = vpop.permute.xlu0 %2693 }
0x2593   :  { %v2696_v15 = vmul.f32 %v2694_v29, %v2679_v16 }
0x2595   :  { %v2935_v12 = vrot.slane %v2696_v15, 1  ;;  %v2983_v38 = vperm.slane %v2696_v15, 0  ;;  %2780 = vrot.lane.b32.xlu2 %v2696_v15, %s4031_s22 }
0x2597   :  { %v2984_v37 = vperm.slane %v2935_v12, 0  ;;  %v5405_v60 = vsel %vm140_vm2, %v5364_v17, %v2983_v38 }
0x2599   :  { %v5409_v21 = vsel %vm140_vm2, %v5368_v18, %v2984_v37 }
0x25ef   :  { %v2781_v36 = vpop.permute.xlu2 %2780 }
0x25f0   :  { %3673 = vmatmul.msk.f32.vlgmr.msrb.gmra.mxu3 %vm374_vm10, %v2781_v36 }
0x25f6   :  { %v2703_v3 = vpop.permute.xlu1 %2702 }
0x25f7   :  { %3672 = vmatmul.msk.f32.vlgmr.msra.gmra.mxu2 %vm374_vm10, %v2703_v3  ;;  %3674 = vmatmul.msk.f32.vlgmr.msra.gmra.mxu0 %vm374_vm10, %v2703_v3 }
0x2673   :  { %v2801_v7 = vpop.f32.mrf.mxu3 }
0x2674   :  { %v2821_v2 = vpop.f32.mrf.mxu0 }
0x2675   :  { %v2822_v10 = vadd.f32 %v2821_v2, %v2801_v7 }
0x2677   :  { %v2824_v34 = vadd.f32 %v5329_v23, %v2822_v10  ;;  %v3028_v10 = vld [vmem:[%s5631_s13 + $0x18] sm:$0xff] }
0x2678   :  { %3065 = vmatpush.msra.mxu3 %v3028_v10 }
0x2679   :  { %3936 = vtanh.f32 %v2824_v34 }
0x267a   :  { %v2723_v17 = vpop.f32.mrf.mxu2 }
0x267b   :  { %v2727_v4 = vrot.slane %v2723_v17, 1  ;;  %v2728_v8 = vrot.slane %v2723_v17, 2 }
0x267d   :  { %v2731_v18 = vadd.f32 %v2727_v4, %v5045_v47  ;;  %v2732_v26 = vadd.f32 %v2728_v8, %v5048_v51 }
0x267f   :  { %v3937_v61 = vpop.eup %3936  ;;  %3938 = vtanh.f32 %v2731_v18 }
0x2680   :  { %3940 = vtanh.f32 %v2732_v26  ;;  %v2826_v57 = vmul.f32 %v3937_v61, %v4465_v46  ;;  %v3757_v61 = vld [vmem:[%s5632_s14] ss:$0 sm:$0xff]  ;;  %s4035_s14 = smov 112  }
0x2682   :  { %v2827_v35 = vadd.f32 %v2826_v57, %v4467_v48 }
0x2684   :  { %2830 = vrot.lane.b32.xlu2 %v2827_v35, %s4030_s1  ;;  %v2828_v14 = vmul.f32 %v2827_v35, %v2690_v20 }
0x2685   :  { %v3939_v19 = vpop.eup %3938 }
0x2686   :  { %v3941_v11 = vpop.eup %3940  ;;  %v2735_v5 = vmul.f32 %v3939_v19, %v4465_v46 }
0x2687   :  { %v2736_v41 = vmul.f32 %v3941_v11, %v4465_v46 }
0x2688   :  { %v2737_v32 = vadd.f32 %v2735_v5, %v4467_v48 }
0x2689   :  { %v2738_v47 = vadd.f32 %v2736_v41, %v4467_v48 }
0x268a   :  { %2749 = vrot.lane.b32.xlu0 %v2737_v32, %s4030_s1  ;;  %v2745_v56 = vmul.f32 %v2741_v25, %v2737_v32 }
0x268b   :  { %2751 = vrot.lane.b32.xlu1 %v2738_v47, %s4030_s1  ;;  %v2746_v59 = vmul.f32 %v2742_v53, %v2738_v47 }
0x26de   :  { %v2831_v51 = vpop.permute.xlu2 %2830 }
0x26df   :  { %v2833_v22 = vmul.f32 %v2831_v51, %v2827_v35 }
0x26e1   :  { %2835 = vrot.lane.b32.xlu2 %v2833_v22, %s4031_s22 }
0x26fc   :  { %v2750_v28 = vpop.permute.xlu0 %2749 }
0x26fd   :  { %v2752_v63 = vpop.permute.xlu1 %2751  ;;  %v2755_v16 = vmul.f32 %v2750_v28, %v2737_v32 }
0x26fe   :  { %v2756_v45 = vmul.f32 %v2752_v63, %v2738_v47 }
0x26ff   :  { %2759 = vrot.lane.b32.xlu0 %v2755_v16, %s4031_s22 }
0x2700   :  { %2761 = vrot.lane.b32.xlu1 %v2756_v45, %s4031_s22 }
0x273b   :  { %v2836_v9 = vpop.permute.xlu2 %2835 }
0x273c   :  { %v2838_v49 = vadd.f32 %v2836_v9, %v2828_v14 }
0x273e   :  { %3942 = vtanh.f32 %v2838_v49 }
0x2744   :  { %v3943_v52 = vpop.eup %3942 }
0x2745   :  { %2841 = vrot.lane.b32.xlu2 %v3943_v52, %s4030_s1 }
0x2771   :  { %v2760_v6 = vpop.permute.xlu0 %2759 }
0x2772   :  { %v2762_v24 = vpop.permute.xlu1 %2761  ;;  %v2765_v43 = vadd.f32 %v2760_v6, %v2745_v56 }
0x2773   :  { %v2766_v54 = vadd.f32 %v2762_v24, %v2746_v59 }
0x2774   :  { %3944 = vtanh.f32 %v2765_v43 }
0x2775   :  { %3946 = vtanh.f32 %v2766_v54 }
0x277a   :  { %v3945_v62 = vpop.eup %3944 }
0x277b   :  { %v3947_v30 = vpop.eup %3946  ;;  %2771 = vrot.lane.b32.xlu0 %v3945_v62, %s4030_s1 }
0x277c   :  { %2773 = vrot.lane.b32.xlu1 %v3947_v30, %s4030_s1 }
0x279f   :  { %v2842_v39 = vpop.permute.xlu2 %2841 }
0x27a0   :  { %v2844_v20 = vmul.f32 %v2842_v39, %v2827_v35 }
0x27a2   :  { %v2936_v58 = vrot.slane %v2844_v20, 1  ;;  %v2987_v13 = vperm.slane %v2844_v20, 0  ;;  %2846 = vrot.lane.b32.xlu1 %v2844_v20, %s4031_s22 }
0x27a4   :  { %v2988_v33 = vperm.slane %v2936_v58, 0  ;;  %v3021_v42 = vsel %vm117_vm3, %v5405_v60, %v2987_v13 }
0x27a6   :  { %v3022_v44 = vsel %vm117_vm3, %v5409_v21, %v2988_v33 }
0x27ed   :  { %v2772_v50 = vpop.permute.xlu0 %2771 }
0x27ee   :  { %v2774_v31 = vpop.permute.xlu1 %2773  ;;  %v2777_v40 = vmul.f32 %v2772_v50, %v2737_v32 }
0x27ef   :  { %v2778_v27 = vmul.f32 %v2774_v31, %v2738_v47 }
0x27f0   :  { %v2872_v1 = vrot.slane %v2777_v40, 7 }
0x27f1   :  { %v2873_v29 = vrot.slane %v2778_v27, 6 }
0x27f3   :  { %v2874_v15 = vsel %vm639_vm5, %v2873_v29, %v2872_v1 }
0x27f4   :  { %2875 = vrot.lane.b32.xlu0 %v2874_v15, %s4031_s22 }
0x2814   :  { %v2847_v12 = vpop.permute.xlu1 %2846 }
0x2815   :  { %3675 = vmatmul.msk.f32.vlgmr.msrb.gmra.mxu1 %vm374_vm10, %v2847_v12 }
0x2866   :  { %v2876_v38 = vpop.permute.xlu0 %2875 }
0x2867   :  { %3676 = vmatmul.msk.f32.vlgmr.msrb.gmra.mxu2 %vm374_vm10, %v2876_v38 }
0x2892   :  { %v2867_v37 = vpop.f32.mrf.mxu1 }
0x28ea   :  { %v2896_v60 = vpop.f32.mrf.mxu2 }
0x28eb   :  { %v2897_v36 = vadd.f32 %v2896_v60, %v2867_v37 }
0x28ed   :  { %v2899_v21 = vadd.f32 %v5329_v23, %v2897_v36  ;;  %v3027_v23 = vld [vmem:[%s5631_s13 + $0x10] sm:$0xff] }
0x28ee   :  { %3066 = vmatpush.msra.mxu3 %v3027_v23 }
0x28ef   :  { %3948 = vtanh.f32 %v2899_v21 }
0x28f5   :  { %v3949_v3 = vpop.eup %3948 }
0x28f6   :  { %v2901_v7 = vmul.f32 %v3949_v3, %v4465_v46  ;;  %v3026_v46 = vld [vmem:[%s5631_s13 + $0x8] sm:$0xff] }
0x28f7   :  { %3067 = vmatpush.msra.mxu3 %v3026_v46 }
0x28f8   :  { %v2902_v2 = vadd.f32 %v2901_v7, %v4467_v48  ;;  %v3025_v48 = vld [vmem:[%s5631_s13] sm:$0xff]  ;;  %s4034_s13 = smov 80  }
0x28f9   :  { %3068 = vmatpush.msra.mxu3 %v3025_v48 }
0x28fa   :  { %2905 = vrot.lane.b32.xlu2 %v2902_v2, %s4030_s1  ;;  %v2903_v4 = vmul.f32 %v2902_v2, %v2838_v49 }
0x2902   :  { %3037 = vrot.lane.b32.xlu2 %v5085_v0, %s4031_s22 }
0x2954   :  { %v2906_v0 = vpop.permute.xlu2 %2905 }
0x2955   :  { %v2908_v34 = vmul.f32 %v2906_v0, %v2902_v2 }
0x2957   :  { %2910 = vrot.lane.b32.xlu0 %v2908_v34, %s4031_s22 }
0x295c   :  { %v3038_v17 = vpop.permute.xlu2 %3037 }
0x295d   :  { %3677 = vmatmul.msk.f32.vlgmr.msra.gmra.mxu3 %vm374_vm10, %v3038_v17 }
0x29c9   :  { %v2911_v8 = vpop.permute.xlu0 %2910 }
0x29ca   :  { %v2913_v18 = vadd.f32 %v2911_v8, %v2903_v4 }
0x29cc   :  { %3950 = vtanh.f32 %v2913_v18 }
0x29d2   :  { %v3951_v26 = vpop.eup %3950 }
0x29d3   :  { %2916 = vrot.lane.b32.xlu1 %v3951_v26, %s4030_s1 }
0x29e0   :  { %v3070_v57 = vpop.f32.mrf.mxu3 }
0x29e1   :  { %v3071_v35 = vadd.f32 %v3757_v61, %v3070_v57 }
0x29e3   :  { %3088 = vrot.lane.b32.xlu2 %v3071_v35, %s4029_s21  ;;  %v3082_v9 = vmul.f32 0.25, %v3071_v35 }
0x2a3d   :  { %v3089_v14 = vpop.permute.xlu2 %3088 }
0x2a45   :  { %v2917_v19 = vpop.permute.xlu1 %2916 }
0x2a46   :  { %v2919_v11 = vmul.f32 %v2917_v19, %v2902_v2 }
0x2a48   :  { %v2938_v5 = vrot.slane %v2919_v11, 1  ;;  %v2991_v41 = vperm.slane %v2919_v11, 0 }
0x2a4a   :  { %v2992_v32 = vperm.slane %v2938_v5, 0  ;;  %v3023_v47 = vsel %vm94_vm1, %v3021_v42, %v2991_v41 }
0x2a4b   :  { %3039 = vrot.lane.b32.xlu0 %v3023_v47, %s4031_s22 }
0x2a4c   :  { %v3024_v51 = vsel %vm94_vm1, %v3022_v44, %v2992_v32 }
0x2a53   :  { %3041 = vrot.lane.b32.xlu0 %v5089_v55, %s4031_s22 }
0x2abd   :  { %v3040_v22 = vpop.permute.xlu0 %3039 }
0x2abe   :  { %3678 = vmatmul.msk.f32.gmra.mxu3 %vm374_vm10, %v3040_v22 }
0x2ac5   :  { %v3042_v28 = vpop.permute.xlu0 %3041 }
0x2ac6   :  { %3679 = vmatmul.msk.f32.gmra.mxu3 %vm374_vm10, %v3042_v28 }
0x2b41   :  { %v3073_v63 = vpop.f32.mrf.mxu3 }
0x2b42   :  { %v3074_v16 = vadd.f32 %v3757_v61, %v3073_v63 }
0x2b44   :  { %3090 = vrot.lane.b32.xlu1 %v3074_v16, %s4029_s21  ;;  %v3083_v49 = vmul.f32 0.25, %v3074_v16  ;;  %v5493_v54 = vpack.i.bf16 %v3071_v35, %v3074_v16 }
0x2b49   :  { %v3076_v52 = vpop.f32.mrf.mxu3 }
0x2b4a   :  { %v5488_v43 = vadd.f32 %v3757_v61, %v3076_v52 }
0x2b4c   :  { %3043 = vrot.lane.b32.xlu1 %v3024_v51, %s4031_s22  ;;  %v3084_v62 = vmul.f32 0.25, %v5488_v43 }
0x2bb6   :  { %v3091_v45 = vpop.permute.xlu1 %3090 }
0x2bb7   :  { %3681 = vmatpush.xpose.msk.msrb.mxu0 %vm201_vm8, %v3091_v45 }
0x2bbb   :  { %3682 = vmatpush.xpose.msk.msrb.mxu0 %vm201_vm8, %v3089_v14 }
0x2bbe   :  { %3683 = vmatmul.msk.f32.vlgmr.msrb.gmra.mxu0 %vm201_vm8, %v3082_v9  ;;  %v3044_v55 = vpop.permute.xlu1 %3043 }
0x2bbf   :  { %3680 = vmatmul.msk.f32.gmra.mxu3 %vm374_vm10, %v3044_v55 }
0x2bc6   :  { %3684 = vmatmul.msk.f32.gmra.mxu0 %vm201_vm8, %v3083_v49 }
0x2c3b   :  { %v3119_v25 = vpop.f32.mrf.mxu0 }
0x2c3c   :  { %v3164_v53 = vsel %vm201_vm8, %v3119_v25, -inf }
0x2c3d   :  { %3165 = vmax.xlane.f32.xlu2 %v3164_v53 }
0x2c42   :  { %v3079_v56 = vpop.f32.mrf.mxu3 }
0x2c43   :  { %v5483_v59 = vadd.f32 %v3757_v61, %v3079_v56  ;;  %v3122_v6 = vpop.f32.mrf.mxu0 }
0x2c44   :  { %v3167_v24 = vsel %vm201_vm8, %v3122_v6, -inf }
0x2c45   :  { %3168 = vmax.xlane.f32.xlu0 %v3167_v24  ;;  %3129 = vrot.lane.b32.xlu1 %v5483_v59, %s4029_s21  ;;  %v3085_v30 = vmul.f32 0.25, %v5483_v59 }
0x2c4d   :  { %3127 = vrot.lane.b32.xlu1 %v5488_v43, %s4029_s21  ;;  %s4036_s21 = smov 48  }
0x2c55   :  { %3284 = vrot.lane.b32.xlu2 %v3074_v16, %s4034_s13 }
0x2c59   :  { %3732 = vrot.lane.b32.xlu0 %v5493_v54, %s4030_s1 }
0x2c5d   :  { %3282 = vrot.lane.b32.xlu2 %v3071_v35, %s4034_s13 }
0x2c61   :  { %3278 = vrot.lane.b32.xlu0 %v3082_v9, %s4035_s14 }
0x2c65   :  { %3280 = vrot.lane.b32.xlu2 %v3083_v49, %s4035_s14 }
0x2c69   :  { %3321 = vrot.lane.b32.xlu0 %v5488_v43, %s4034_s13 }
0x2c6d   :  { %3317 = vrot.lane.b32.xlu2 %v3084_v62, %s4035_s14 }
0x2c71   :  { %3319 = vrot.lane.b32.xlu0 %v3085_v30, %s4035_s14 }
0x2cb0   :  { %v3166_v39 = vpop.xlane.xlu2 %3165 }
0x2cb1   :  { %v3176_v20 = vsub.f32 %v3119_v25, %v3166_v39 }
0x2cb3   :  { %v3180_v58 = vmul.f32 1.442695, %v3176_v20 }
0x2cb5   :  { %3952 = vpow2.f32 %v3180_v58  ;;  %v3741_v58 = vpack.i.bf16 %v5488_v43, %v5483_v59 }
0x2cb7   :  { %v3130_v13 = vpop.permute.xlu1 %3129 }
0x2cb8   :  { %v3169_v33 = vpop.xlane.xlu0 %3168  ;;  %3685 = vmatpush.xpose.msk.msra.mxu1 %vm201_vm8, %v3130_v13  ;;  %v3285_v44 = vpop.permute.xlu2 %3284 }
0x2cb9   :  { %v3177_v42 = vsub.f32 %v3122_v6, %v3169_v33 }
0x2cbb   :  { %v3953_v50 = vpop.eup %3952  ;;  %v3182_v31 = vmul.f32 1.442695, %v3177_v42 }
0x2cbc   :  { %v3188_v40 = vsel %vm201_vm8, %v3953_v50, 0.0 }
0x2cbd   :  { %3954 = vpow2.f32 %v3182_v31  ;;  %3189 = vadd.xlane.f32.xlu1 %v3188_v40 }
0x2cbf   :  { %v3128_v27 = vpop.permute.xlu1 %3127 }
0x2cc0   :  { %3686 = vmatpush.xpose.msk.msra.mxu1 %vm201_vm8, %v3128_v27  ;;  %v3283_v29 = vpop.permute.xlu2 %3282 }
0x2cc3   :  { %v3955_v1 = vpop.eup %3954  ;;  %3687 = vmatmul.msk.f32.vlgmr.msra.gmra.mxu1 %vm201_vm8, %v3084_v62 }
0x2cc4   :  { %3693 = vmatpush.xpose.msk.msrb.mxu1 %vm201_vm8, %v3285_v44  ;;  %v3191_v15 = vsel %vm201_vm8, %v3955_v1, 0.0 }
0x2cc5   :  { %3192 = vadd.xlane.f32.xlu1 %v3191_v15 }
0x2cc8   :  { %3694 = vmatpush.xpose.msk.msrb.mxu1 %vm201_vm8, %v3283_v29  ;;  %v3281_v36 = vpop.permute.xlu2 %3280 }
0x2ccb   :  { %v3733_v12 = vpop.permute.xlu0 %3732  ;;  %3688 = vmatmul.msk.f32.gmra.mxu1 %vm201_vm8, %v3085_v30 }
0x2ccc   :  { %v3734_v38 = vunpack.i.l.bf16 %v3733_v12  ;;  %v3735_v37 = vunpack.i.h.bf16 %v3733_v12 }
0x2cce   :  { %3234 = vmatpush.msra.mxu2 %v3734_v38 }
0x2cd0   :  { %3235 = vmatpush.msra.mxu2 %v3735_v37  ;;  %v3318_v18 = vpop.permute.xlu2 %3317 }
0x2cd3   :  { %v3279_v60 = vpop.permute.xlu0 %3278 }
0x2cd4   :  { %3695 = vmatmul.msk.f32.vlgmr.msrb.gmra.mxu1 %vm201_vm8, %v3279_v60 }
0x2cdb   :  { %v3322_v8 = vpop.permute.xlu0 %3321 }
0x2cdc   :  { %3696 = vmatmul.msk.f32.gmra.mxu1 %vm201_vm8, %v3281_v36 }
0x2cde   :  { %3323 = vrot.lane.b32.xlu1 %v5483_v59, %s4034_s13 }
0x2ce3   :  { %v3320_v35 = vpop.permute.xlu0 %3319 }
0x2d30   :  { %v3190_v21 = vpop.xlane.xlu1 %3189 }
0x2d31   :  { %3956 = vrcp.f32 %v3190_v21 }
0x2d37   :  { %v3957_v3 = vpop.eup %3956 }
0x2d38   :  { %v3204_v7 = vmul.f32 %v3957_v3, %v3953_v50  ;;  %v3193_v2 = vpop.xlane.xlu1 %3192 }
0x2d39   :  { %3958 = vrcp.f32 %v3193_v2 }
0x2d3a   :  { %3689 = vmatmul.msk.f32.vlgmr.msra.gmra.mxu2 %vm201_vm8, %v3204_v7 }
0x2d3f   :  { %v3959_v10 = vpop.eup %3958 }
0x2d40   :  { %v3158_v23 = vpop.f32.mrf.mxu1  ;;  %v3205_v46 = vmul.f32 %v3959_v10, %v3955_v1 }
0x2d41   :  { %v3170_v48 = vsel %vm201_vm8, %v3158_v23, -inf }
0x2d42   :  { %3690 = vmatmul.msk.f32.gmra.mxu2 %vm201_vm8, %v3205_v46  ;;  %3171 = vmax.xlane.f32.xlu0 %v3170_v48 }
0x2d48   :  { %v3161_v0 = vpop.f32.mrf.mxu1 }
0x2d49   :  { %v3173_v57 = vsel %vm201_vm8, %v3161_v0, -inf }
0x2d50   :  { %v3324_v34 = vpop.permute.xlu1 %3323 }
0x2d51   :  { %v3311_v17 = vpop.f32.mrf.mxu1  ;;  %3697 = vmatpush.xpose.msk.msrb.mxu2 %vm201_vm8, %v3324_v34 }
0x2d52   :  { %v3356_v4 = vsel %vm201_vm8, %v3311_v17, -inf }
0x2d53   :  { %3357 = vmax.xlane.f32.xlu2 %v3356_v4 }
0x2d55   :  { %3698 = vmatpush.xpose.msk.msrb.mxu2 %vm201_vm8, %v3322_v8 }
0x2d58   :  { %3699 = vmatmul.msk.f32.vlgmr.msrb.gmra.mxu2 %vm201_vm8, %v3318_v18 }
0x2d59   :  { %v3314_v26 = vpop.f32.mrf.mxu1 }
0x2d5a   :  { %v3359_v61 = vsel %vm201_vm8, %v3314_v26, -inf }
0x2d5b   :  { %3360 = vmax.xlane.f32.xlu1 %v3359_v61  ;;  %3174 = vmax.xlane.f32.xlu2 %v3173_v57 }
0x2d60   :  { %3700 = vmatmul.msk.f32.gmra.mxu2 %vm201_vm8, %v3320_v35 }
0x2db5   :  { %v3172_v19 = vpop.xlane.xlu0 %3171 }
0x2db6   :  { %v3178_v11 = vsub.f32 %v3158_v23, %v3172_v19 }
0x2db8   :  { %v3184_v5 = vmul.f32 1.442695, %v3178_v11 }
0x2dba   :  { %3960 = vpow2.f32 %v3184_v5  ;;  %v3493_v5 = vld [vmem:[%s5633_s15 + $0x18] sm:$0xff] }
0x2dbb   :  { %3522 = vmatpush.msra.mxu1 %v3493_v5 }
0x2dbd   :  { %v5528_v22 = vpop.f32.mrf.mxu2 }
0x2dc0   :  { %v5524_v41 = vpop.eup %3960 }
0x2dc1   :  { %v3194_v32 = vsel %vm201_vm8, %v5524_v41, 0.0 }
0x2dc2   :  { %3195 = vadd.xlane.f32.xlu0 %v3194_v32  ;;  %v3491_v32 = vld [vmem:[%s5633_s15 + $0x8] sm:$0xff] }
0x2dc5   :  { %v5531_v52 = vpop.f32.mrf.mxu2 }
0x2dc6   :  { %v3358_v47 = vpop.xlane.xlu2 %3357 }
0x2dc7   :  { %v3368_v51 = vsub.f32 %v3311_v17, %v3358_v47  ;;  %v3490_v47 = vld [vmem:[%s5633_s15] sm:$0xff] }
0x2dc9   :  { %v3372_v28 = vmul.f32 1.442695, %v3368_v51 }
0x2dcb   :  { %3962 = vpow2.f32 %v3372_v28 }
0x2dce   :  { %v3361_v63 = vpop.xlane.xlu1 %3360  ;;  %v3175_v16 = vpop.xlane.xlu2 %3174 }
0x2dcf   :  { %v3369_v45 = vsub.f32 %v3314_v26, %v3361_v63  ;;  %v3179_v55 = vsub.f32 %v3161_v0, %v3175_v16 }
0x2dd1   :  { %v3963_v14 = vpop.eup %3962  ;;  %v3374_v9 = vmul.f32 1.442695, %v3369_v45  ;;  %v3186_v25 = vmul.f32 1.442695, %v3179_v55 }
0x2dd2   :  { %v3380_v49 = vsel %vm201_vm8, %v3963_v14, 0.0 }
0x2dd3   :  { %3964 = vpow2.f32 %v3374_v9  ;;  %3381 = vadd.xlane.f32.xlu1 %v3380_v49  ;;  %v3546_v49 = vld [vmem:[%s5635_s17 + $0x18] sm:$0xff] }
0x2dd4   :  { %3966 = vpow2.f32 %v3186_v25  ;;  %v3545_v25 = vld [vmem:[%s5635_s17 + $0x10] sm:$0xff]  ;;  %3575 = vmatpush.msra.mxu2 %v3546_v49 }
0x2dd6   :  { %3576 = vmatpush.msra.mxu2 %v3545_v25 }
0x2dd9   :  { %v3965_v53 = vpop.eup %3964 }
0x2dda   :  { %v3383_v56 = vsel %vm201_vm8, %v3965_v53, 0.0  ;;  %v3967_v62 = vpop.eup %3966 }
0x2ddb   :  { %v3350_v6 = vpop.f32.mrf.mxu2  ;;  %3384 = vadd.xlane.f32.xlu1 %v3383_v56  ;;  %v3197_v30 = vsel %vm201_vm8, %v3967_v62, 0.0 }
0x2ddc   :  { %v3362_v24 = vsel %vm201_vm8, %v3350_v6, -inf }
0x2ddd   :  { %3363 = vmax.xlane.f32.xlu0 %v3362_v24  ;;  %v3543_v24 = vld [vmem:[%s5635_s17] sm:$0xff] }
0x2de3   :  { %v3353_v39 = vpop.f32.mrf.mxu2  ;;  %3198 = vadd.xlane.f32.xlu1 %v3197_v30 }
0x2de4   :  { %v3365_v20 = vsel %vm201_vm8, %v3353_v39, -inf }
0x2de5   :  { %3366 = vmax.xlane.f32.xlu2 %v3365_v20 }
0x2df1   :  { %3742 = vrot.lane.b32.xlu0 %v3741_v58, %s4030_s1 }
0x2dfd   :  { %3737 = vrot.lane.b32.xlu2 %v5493_v54, %s4036_s21 }
0x2e05   :  { %3747 = vrot.lane.b32.xlu2 %v3741_v58, %s4036_s21 }
0x2e35   :  { %v3196_v13 = vpop.xlane.xlu0 %3195 }
0x2e46   :  { %v3382_v33 = vpop.xlane.xlu1 %3381 }
0x2e4e   :  { %v3385_v40 = vpop.xlane.xlu1 %3384 }
0x2e50   :  { %v3364_v42 = vpop.xlane.xlu0 %3363 }
0x2e51   :  { %v3370_v44 = vsub.f32 %v3350_v6, %v3364_v42  ;;  %v3544_v6 = vld [vmem:[%s5635_s17 + $0x8] sm:$0xff] }
0x2e52   :  { %3577 = vmatpush.msra.mxu2 %v3544_v6 }
0x2e53   :  { %v3376_v50 = vmul.f32 1.442695, %v3370_v44 }
0x2e54   :  { %3578 = vmatpush.msra.mxu2 %v3543_v24 }
0x2e55   :  { %3968 = vpow2.f32 %v3376_v50  ;;  %v3759_v50 = vld [vmem:[%s5636_s18] ss:$0 sm:$0xff] }
0x2e56   :  { %3970 = vrcp.f32 %v3382_v33  ;;  %v3199_v38 = vpop.xlane.xlu1 %3198 }
0x2e58   :  { %v3367_v31 = vpop.xlane.xlu2 %3366 }
0x2e59   :  { %v3371_v27 = vsub.f32 %v3353_v39, %v3367_v31 }
0x2e5b   :  { %v3969_v1 = vpop.eup %3968  ;;  %v3378_v29 = vmul.f32 1.442695, %v3371_v27 }
0x2e5c   :  { %v3386_v59 = vsel %vm201_vm8, %v3969_v1, 0.0  ;;  %v3971_v54 = vpop.eup %3970 }
0x2e5d   :  { %3972 = vpow2.f32 %v3378_v29  ;;  %3387 = vadd.xlane.f32.xlu1 %v3386_v59  ;;  %v3396_v21 = vmul.f32 %v3971_v54, %v3963_v14 }
0x2e5e   :  { %3974 = vrcp.f32 %v3196_v13 }
0x2e5f   :  { %3976 = vrcp.f32 %v3385_v40 }
0x2e60   :  { %v3738_v43 = vpop.permute.xlu2 %3737  ;;  %3978 = vrcp.f32 %v3199_v38 }
0x2e61   :  { %v3739_v15 = vunpack.i.l.bf16 %v3738_v43  ;;  %v3740_v37 = vunpack.i.h.bf16 %v3738_v43 }
0x2e63   :  { %v3973_v12 = vpop.eup %3972  ;;  %v3743_v60 = vpop.permute.xlu0 %3742  ;;  %3426 = vmatpush.msrb.mxu3 %v3739_v15 }
0x2e64   :  { %v3975_v36 = vpop.eup %3974  ;;  %v3744_v3 = vunpack.i.l.bf16 %v3743_v60  ;;  %v3389_v7 = vsel %vm201_vm8, %v3973_v12, 0.0  ;;  %v3745_v2 = vunpack.i.h.bf16 %v3743_v60 }
0x2e65   :  { %3390 = vadd.xlane.f32.xlu0 %v3389_v7  ;;  %3427 = vmatpush.msrb.mxu3 %v3740_v37  ;;  %v3206_v10 = vmul.f32 %v3975_v36, %v5524_v41  ;;  %v3977_v46 = vpop.eup %3976  ;;  %v3492_v41 = vld [vmem:[%s5633_s15 + $0x10] sm:$0xff] }
0x2e66   :  { %3269 = vmatpush.msra.mxu0 %v3744_v3  ;;  %3701 = vmatmul.msk.f32.vlgmr.msrb.gmra.mxu3 %vm201_vm8, %v3396_v21  ;;  %v3979_v34 = vpop.eup %3978  ;;  %v3397_v17 = vmul.f32 %v3977_v46, %v3965_v53 }
0x2e67   :  { %v3207_v4 = vmul.f32 %v3979_v34, %v3967_v62  ;;  %3523 = vmatpush.msra.mxu1 %v3492_v41  ;;  %v3758_v62 = vld [vmem:[%s5634_s16] ss:$0 sm:$0xff]  ;;  %s4037_s16 = smov [#allocation2]  }
0x2e68   :  { %3270 = vmatpush.msra.mxu0 %v3745_v2  ;;  %v3748_v23 = vpop.permute.xlu2 %3747  ;;  %s3602_s17 = sshll.u32 %s4037_s16, 4  ;;  %s3603_s17 = int_to_ptr.vmem [resolvable:$true] %s3602_s17 }
0x2e69   :  { %v3749_v48 = vunpack.i.l.bf16 %v3748_v23  ;;  %3691 = vmatmul.msk.f32.vlgmr.msra.gmra.mxu0 %vm201_vm8, %v3206_v10  ;;  %v3750_v0 = vunpack.i.h.bf16 %v3748_v23  ;;  %3524 = vmatpush.msra.mxu1 %v3491_v32 }
0x2e6b   :  { %3461 = vmatpush.msrb.mxu0 %v3749_v48  ;;  %3525 = vmatpush.msra.mxu1 %v3490_v47 }
0x2e6d   :  { %3462 = vmatpush.msrb.mxu0 %v3750_v0 }
0x2e6e   :  { %3702 = vmatmul.msk.f32.gmra.mxu3 %vm201_vm8, %v3397_v17 }
0x2e71   :  { %3692 = vmatmul.msk.f32.gmra.mxu0 %vm201_vm8, %v3207_v4 }
0x2ed0   :  { %v3388_v8 = vpop.xlane.xlu1 %3387 }
0x2ed1   :  { %3980 = vrcp.f32 %v3388_v8 }
0x2ed7   :  { %v3981_v18 = vpop.eup %3980 }
0x2ed8   :  { %v3398_v26 = vmul.f32 %v3981_v18, %v3969_v1  ;;  %v3391_v61 = vpop.xlane.xlu0 %3390 }
0x2ed9   :  { %3982 = vrcp.f32 %v3391_v61 }
0x2eda   :  { %3703 = vmatmul.msk.f32.vlgmr.msrb.gmra.mxu0 %vm201_vm8, %v3398_v26 }
0x2edf   :  { %v3983_v57 = vpop.eup %3982 }
0x2ee0   :  { %v3399_v35 = vmul.f32 %v3983_v57, %v3973_v12 }
0x2ee2   :  { %3704 = vmatmul.msk.f32.gmra.mxu0 %vm201_vm8, %v3399_v35 }
0x2ee6   :  { %v3272_v51 = vpop.f32.mrf.mxu0 }
0x2ee9   :  { %v3429_v19 = vpop.f32.mrf.mxu3 }
0x2eea   :  { %3474 = vrot.lane.b32.xlu1 %v3429_v19, %s4028_s30 }
0x2eee   :  { %v3275_v28 = vpop.f32.mrf.mxu0 }
0x2ef1   :  { %v3432_v11 = vpop.f32.mrf.mxu3 }
0x2ef2   :  { %3476 = vrot.lane.b32.xlu2 %v3432_v11, %s4028_s30 }
0x2f4c   :  { %v3477_v9 = vpop.permute.xlu2 %3476 }
0x2f4d   :  { %v3487_v55 = vsel %vm201_vm8, %v5531_v52, %v3477_v9 }
0x2f57   :  { %v3464_v63 = vpop.f32.mrf.mxu0 }
0x2f58   :  { %3478 = vrot.lane.b32.xlu2 %v3464_v63, %s4028_s30 }
0x2f5c   :  { %v3475_v16 = vpop.permute.xlu1 %3474 }
0x2f5d   :  { %v3486_v45 = vsel %vm201_vm8, %v5528_v22, %v3475_v16 }
0x2f5e   :  { %3705 = vmatmul.msk.f32.vlgmr.msra.gmra.mxu1 %vm374_vm10, %v3486_v45 }
0x2f5f   :  { %v3467_v14 = vpop.f32.mrf.mxu0 }
0x2f60   :  { %3480 = vrot.lane.b32.xlu2 %v3467_v14, %s4028_s30 }
0x2f66   :  { %3706 = vmatmul.msk.f32.gmra.mxu1 %vm374_vm10, %v3487_v55 }
0x2fb2   :  { %v3479_v22 = vpop.permute.xlu2 %3478 }
0x2fb3   :  { %v3488_v53 = vsel %vm201_vm8, %v3272_v51, %v3479_v22 }
0x2fb4   :  { %3707 = vmatmul.msk.f32.gmra.mxu1 %vm374_vm10, %v3488_v53 }
0x2fba   :  { %v3481_v56 = vpop.permute.xlu2 %3480 }
0x2fbb   :  { %v3489_v52 = vsel %vm201_vm8, %v3275_v28, %v3481_v56 }
0x2fbc   :  { %3708 = vmatmul.msk.f32.gmra.mxu1 %vm374_vm10, %v3489_v52 }
0x2fdb   :  { %v3527_v30 = vpop.f32.mrf.mxu1 }
0x2fdc   :  { %v3528_v39 = vadd.f32 %v3758_v62, %v3527_v30 }
0x2fde   :  { %3539 = vst.msk [vmem:[#allocation2] sm:$0xff] %vm374_vm10, %v3528_v39  ;;  %3709 = vmatmul.msk.f32.vlgmr.msra.gmra.mxu2 %vm374_vm10, %v3528_v39 }
0x2fe3   :  { %v3530_v20 = vpop.f32.mrf.mxu1 }
0x2fe4   :  { %v3531_v58 = vadd.f32 %v3758_v62, %v3530_v20 }
0x2fe6   :  { %3540 = vst.msk [vmem:[#allocation2 + $0x8] sm:$0xff] %vm374_vm10, %v3531_v58  ;;  %3710 = vmatmul.msk.f32.gmra.mxu2 %vm374_vm10, %v3531_v58 }
0x3031   :  { %v3533_v13 = vpop.f32.mrf.mxu1 }
0x3032   :  { %v3534_v33 = vadd.f32 %v3758_v62, %v3533_v13 }
0x3034   :  { %3541 = vst.msk [vmem:[#allocation2 + $0x10] sm:$0xff] %vm374_vm10, %v3534_v33  ;;  %3711 = vmatmul.msk.f32.gmra.mxu2 %vm374_vm10, %v3534_v33 }
0x3039   :  { %v3536_v42 = vpop.f32.mrf.mxu1 }
0x303a   :  { %v3537_v44 = vadd.f32 %v3758_v62, %v3536_v42 }
0x303c   :  { %3542 = vst.msk [vmem:[#allocation2 + $0x18] sm:$0xff] %vm374_vm10, %v3537_v44  ;;  %3712 = vmatmul.msk.f32.gmra.mxu2 %vm374_vm10, %v3537_v44 }
0x303d   :  { %3610 = dma.vmem_to_hbm [thread:$0]  %s3603_s17, 512, %s3605_s23, [#allocation3], %s4038_s24, %s4038_s24, %s5653_s2  }
0x3061   :  { %v3580_v31 = vpop.f32.mrf.mxu2 }
0x3062   :  { %v3581_v40 = vadd.f32 %v3759_v50, %v3580_v31 }
0x3064   :  { %3592 = vst [vmem:[%s5637_s19] sm:$0xff] %v3581_v40 }
0x3069   :  { %v3583_v27 = vpop.f32.mrf.mxu2 }
0x306a   :  { %v3584_v1 = vadd.f32 %v3759_v50, %v3583_v27 }
0x306c   :  { %3593 = vst [vmem:[%s5637_s19 + $0x8] sm:$0xff] %v3584_v1 }
0x30b7   :  { %v3586_v29 = vpop.f32.mrf.mxu2 }
0x30b8   :  { %v3587_v59 = vadd.f32 %v3759_v50, %v3586_v29 }
0x30ba   :  { %3594 = vst [vmem:[%s5637_s19 + $0x10] sm:$0xff] %v3587_v59 }
0x30bf   :  { %v3589_v43 = vpop.f32.mrf.mxu2 }
0x30c0   :  { %v3590_v54 = vadd.f32 %v3759_v50, %v3589_v43 }
0x30c2   :  { %3595 = vst [vmem:[%s5637_s19 + $0x18] sm:$0xff] %v3590_v54 }
0x30c3   :  { %4023 = dma.done.wait [#allocation3], 512  }
0x30c4   :  { %4024 = vsyncadd [#allocation3], 4294966784 }
0x30c5   :  { %3617 = vsyncpa [#allocation3], 1 }

</bundles_post_ra>
